<compile_context>
chip_gen: v5e
topology: v5e:2x2
jax: 0.10.0
libtpu: 0.0.40
codegen_flags: <defaults>
</compile_context>

<pallas_src>
import functools

import jax
import jax.numpy as jnp
from jax.experimental import pallas as pl
from jax.experimental.pallas import tpu as pltpu


def _base_conv_kernel(x_ref, w1_ref, b1_ref, w2_ref, b2_ref, o_ref, h_scr,
                      *, K, P, Ho, Wo, Ho2, Wo2):
    """Fused conv1 -> ReLU -> conv2 -> ReLU for one image (stride 1)."""
    cin = x_ref.shape[-1]       # in_channels
    c1 = w1_ref.shape[-1]       # out_channels (both convs)
    # cpad = w2_ref.shape[-1]   # out_channels padded to a multiple of 128

    # ---- conv1 (+bias, ReLU): accumulate 9 taps in float32 -----------------
    acc1 = jnp.zeros((Ho * Wo, c1), jnp.float32)
    for t in range(K * K):
        kh, kw = divmod(t, K)
        xs = x_ref[0, kh:kh + Ho, kw:kw + Wo, :]              # (Ho, Wo, Cin)
        xs = xs.reshape(Ho * Wo, cin).astype(jnp.bfloat16)    # layout-free reshape
        acc1 = acc1 + jnp.dot(xs, w1_ref[t],
                              preferred_element_type=jnp.float32)
    h1 = jnp.maximum(acc1 + b1_ref[...], 0.0)                 # (Ho*Wo, c1) f32

    # ---- stash intermediate in VMEM with a zero halo for conv2 -------------
    h_scr[...] = jnp.zeros_like(h_scr)
    h_scr[P:P + Ho, P:P + Wo, :] = h1.reshape(Ho, Wo, c1)

    # ---- conv2 (+bias, ReLU) at lane-dense padded width ---------------------
    acc2 = jnp.zeros((Ho2 * Wo2, w2_ref.shape[-1]), jnp.float32)
    for t in range(K * K):
        kh, kw = divmod(t, K)
        hs = h_scr[kh:kh + Ho2, kw:kw + Wo2, :]               # (Ho2, Wo2, c1)
        hs = hs.reshape(Ho2 * Wo2, c1).astype(jnp.bfloat16)
        acc2 = acc2 + jnp.dot(hs, w2_ref[t],
                              preferred_element_type=jnp.float32)
    out = jnp.maximum(acc2 + b2_ref[...], 0.0)                # (Ho2*Wo2, Cpad)

    # ---- lane-dense store: (c1, Ho2*Wo2), last dim a multiple of 128 --------
    out_t = jnp.transpose(out)[:c1, :]                        # (c1, Ho2*Wo2)
    o_ref[0] = out_t.astype(o_ref.dtype)


def base_conv_forward(x_nchw, params, *, padding, stride):
    """Forward pass of BaseConv. x is NCHW; returns NCHW."""
    # Reproduce the positional-argument binding of the reference module:
    # module `padding` -> Conv2d stride, module `stride` -> Conv2d padding.
    conv_stride, conv_padding = padding, stride
    if conv_stride != 1:
        # TODO(synk): generalize the fused kernel to stride > 1 (strided tap
        # slices + per-layer output shapes); the reference instance uses 1.
        raise NotImplementedError("fused BaseConv kernel is specialized to stride 1")

    N, Cin, H, W = x_nchw.shape
    w1, b1, w2, b2 = params["w1"], params["b1"], params["w2"], params["b2"]
    C1, _, K, _ = w1.shape
    P = conv_padding
    Hp, Wp = H + 2 * P, W + 2 * P
    Ho, Wo = Hp - K + 1, Wp - K + 1            # conv1 output (stride 1)
    Ho2, Wo2 = Ho + 2 * P - K + 1, Wo + 2 * P - K + 1   # conv2 output
    Cpad = ((C1 + 127) // 128) * 128           # lane-dense width for conv2 GEMM

    # Single cheap layout pass on the (small) input: NCHW -> padded NHWC.
    xp = jnp.pad(jnp.transpose(x_nchw, (0, 2, 3, 1)),
                 ((0, 0), (P, P), (P, P), (0, 0)))

    # Weights: (Cout, Cin, K, K) -> (K*K, Cin, Cout), bf16 for the MXU.
    w1_t = jnp.transpose(w1, (2, 3, 1, 0)).reshape(K * K, Cin, C1).astype(jnp.bfloat16)
    w2_t = jnp.transpose(w2, (2, 3, 1, 0)).reshape(K * K, C1, C1)
    w2_t = jnp.pad(w2_t, ((0, 0), (0, 0), (0, Cpad - C1))).astype(jnp.bfloat16)
    b1_r = b1.reshape(1, C1).astype(jnp.float32)
    b2_r = jnp.pad(b2.reshape(1, C1), ((0, 0), (0, Cpad - C1))).astype(jnp.float32)

    kernel = functools.partial(_base_conv_kernel, K=K, P=P,
                               Ho=Ho, Wo=Wo, Ho2=Ho2, Wo2=Wo2)

    out = pl.pallas_call(
        kernel,
        out_shape=jax.ShapeDtypeStruct((N, C1, Ho2 * Wo2), x_nchw.dtype),
        grid_spec=pltpu.PrefetchScalarGridSpec(
            num_scalar_prefetch=0,
            grid=(N,),                                   # one step per image
            in_specs=[
                pl.BlockSpec((1, Hp, Wp, Cin), lambda n: (n, 0, 0, 0)),   # image
                pl.BlockSpec((K * K, Cin, C1), lambda n: (0, 0, 0)),      # w1
                pl.BlockSpec((1, C1), lambda n: (0, 0)),                  # b1
                pl.BlockSpec((K * K, C1, Cpad), lambda n: (0, 0, 0)),     # w2 (padded)
                pl.BlockSpec((1, Cpad), lambda n: (0, 0)),                # b2 (padded)
            ],
            out_specs=pl.BlockSpec((1, C1, Ho2 * Wo2), lambda n: (n, 0, 0)),
            scratch_shapes=[pltpu.VMEM((Ho + 2 * P, Wo + 2 * P, C1), jnp.float32)],
        ),
        compiler_params=pltpu.CompilerParams(
            dimension_semantics=("parallel",),           # v7x: shard images over 2 TCs
            vmem_limit_bytes=32 * 1024 * 1024,
        ),
    )(xp, w1_t, b1_r, w2_t, b2_r)

    # Free reshape to NCHW (no host-side transpose needed on the output).
    return out.reshape(N, C1, Ho2, Wo2)


if __name__ == "__main__":
    key = jax.random.PRNGKey(0)
    kx, kw1, kb1, kw2, kb2 = jax.random.split(key, 5)

    in_c, out_c, K, padding, stride = 4, 8, 3, 1, 1
    N, H, W = 2, 16, 16

    x = jax.random.normal(kx, (N, in_c, H, W), jnp.float32)

    # Deterministic init mimicking PyTorch's default uniform(-1/sqrt(fan_in), +).
    fan1 = in_c * K * K
    fan2 = out_c * K * K
    bnd1 = 1.0 / (fan1 ** 0.5)
    bnd2 = 1.0 / (fan2 ** 0.5)
    params = {
        "w1": jax.random.uniform(kw1, (out_c, in_c, K, K), jnp.float32, -bnd1, bnd1),
        "b1": jax.random.uniform(kb1, (out_c,), jnp.float32, -bnd1, bnd1),
        "w2": jax.random.uniform(kw2, (out_c, out_c, K, K), jnp.float32, -bnd2, bnd2),
        "b2": jax.random.uniform(kb2, (out_c,), jnp.float32, -bnd2, bnd2),
    }

    fwd = jax.jit(functools.partial(base_conv_forward, padding=padding, stride=stride))
    y = fwd(x, params)
    jax.block_until_ready(y)

    # Pure-JAX float32 reference with the same (swapped) Conv2d binding.
    def ref_forward(xr, pr):
        s, p = padding, stride  # conv stride = module `padding`, conv padding = module `stride`

        def conv(z, w, b):
            z = jax.lax.conv_general_dilated(
                z, w, window_strides=(s, s), padding=[(p, p), (p, p)],
                dimension_numbers=("NCHW", "OIHW", "NCHW"),
                precision=jax.lax.Precision.HIGHEST)
            return jnp.maximum(z + b.reshape(1, -1, 1, 1), 0.0)

        return conv(conv(xr, pr["w1"], pr["b1"]), pr["w2"], pr["b2"])

    y_ref = ref_forward(x, params)

    assert y.shape == (N, out_c, H, W), y.shape
    assert bool(jnp.all(y >= 0.0))                       # ReLU output
    err = float(jnp.max(jnp.abs(y - y_ref)))
    assert err < 5e-2, f"max abs error vs f32 reference too large: {err}"
    print("KERNEL_OK")
</pallas_src>

<mosaic_0001>
module attributes {stable_mosaic.version = 11 : i64} {
  func.func @_base_conv_kernel(%arg0: i32, %arg1: memref<1x18x18x4xf32, #tpu.memory_space<vmem>>, %arg2: memref<9x4x8xbf16, #tpu.memory_space<vmem>>, %arg3: memref<1x8xf32, #tpu.memory_space<vmem>>, %arg4: memref<9x8x128xbf16, #tpu.memory_space<vmem>>, %arg5: memref<1x128xf32, #tpu.memory_space<vmem>>, %arg6: memref<1x8x256xf32, #tpu.memory_space<vmem>>, %arg7: memref<18x18x8xf32, #tpu.memory_space<vmem>>) attributes {dimension_semantics = [#tpu.dimension_semantics<parallel>], iteration_bounds = array<i64: 2>, scalar_prefetch = 0 : i64, scratch_operands = 1 : i64, tpu.core_type = #tpu.core_type<tc>, window_params = [{transform_indices = @transform_0, window_bounds = array<i64: 1, 18, 18, 4>}, {pipeline_mode = #tpu.pipeline_mode<synchronous>, transform_indices = @transform_1, window_bounds = array<i64: 9, 4, 8>}, {pipeline_mode = #tpu.pipeline_mode<synchronous>, transform_indices = @transform_2, window_bounds = array<i64: 1, 8>}, {pipeline_mode = #tpu.pipeline_mode<synchronous>, transform_indices = @transform_3, window_bounds = array<i64: 9, 8, 128>}, {pipeline_mode = #tpu.pipeline_mode<synchronous>, transform_indices = @transform_4, window_bounds = array<i64: 1, 128>}, {transform_indices = @transform_5, window_bounds = array<i64: 1, 8, 256>}]} {
    %cst = arith.constant 0.000000e+00 : f32
    %0 = vector.broadcast %cst : f32 to vector<256x8xf32>
    %c0 = arith.constant 0 : index
    %c0_0 = arith.constant 0 : index
    %c0_1 = arith.constant 0 : index
    %c0_2 = arith.constant 0 : index
    %1 = vector.load %arg1[%c0, %c0_0, %c0_1, %c0_2] : memref<1x18x18x4xf32, #tpu.memory_space<vmem>>, vector<1x16x16x4xf32>
    %2 = vector.shape_cast %1 : vector<1x16x16x4xf32> to vector<16x16x4xf32>
    %3 = vector.shape_cast %2 : vector<16x16x4xf32> to vector<256x4xf32>
    %4 = arith.truncf %3 : vector<256x4xf32> to vector<256x4xbf16>
    %c0_3 = arith.constant 0 : index
    %c0_4 = arith.constant 0 : index
    %c0_5 = arith.constant 0 : index
    %5 = vector.load %arg2[%c0_3, %c0_4, %c0_5] : memref<9x4x8xbf16, #tpu.memory_space<vmem>>, vector<1x4x8xbf16>
    %6 = vector.shape_cast %5 : vector<1x4x8xbf16> to vector<4x8xbf16>
    %cst_6 = arith.constant dense<0.000000e+00> : vector<256x8xf32>
    %7 = tpu.matmul %4, %6, %cst_6 {dimension_numbers = #tpu.dot_dimension_numbers<[1], [0], [0], [1], [0, 0, 1, 1], [], []>} : vector<256x4xbf16>, vector<4x8xbf16>, vector<256x8xf32> -> vector<256x8xf32>
    %8 = arith.addf %0, %7 : vector<256x8xf32>
    %c0_7 = arith.constant 0 : index
    %c0_8 = arith.constant 0 : index
    %c1 = arith.constant 1 : index
    %c0_9 = arith.constant 0 : index
    %9 = vector.load %arg1[%c0_7, %c0_8, %c1, %c0_9] : memref<1x18x18x4xf32, #tpu.memory_space<vmem>>, vector<1x16x16x4xf32>
    %10 = vector.shape_cast %9 : vector<1x16x16x4xf32> to vector<16x16x4xf32>
    %11 = vector.shape_cast %10 : vector<16x16x4xf32> to vector<256x4xf32>
    %12 = arith.truncf %11 : vector<256x4xf32> to vector<256x4xbf16>
    %c1_10 = arith.constant 1 : index
    %c0_11 = arith.constant 0 : index
    %c0_12 = arith.constant 0 : index
    %13 = vector.load %arg2[%c1_10, %c0_11, %c0_12] : memref<9x4x8xbf16, #tpu.memory_space<vmem>>, vector<1x4x8xbf16>
    %14 = vector.shape_cast %13 : vector<1x4x8xbf16> to vector<4x8xbf16>
    %cst_13 = arith.constant dense<0.000000e+00> : vector<256x8xf32>
    %15 = tpu.matmul %12, %14, %cst_13 {dimension_numbers = #tpu.dot_dimension_numbers<[1], [0], [0], [1], [0, 0, 1, 1], [], []>} : vector<256x4xbf16>, vector<4x8xbf16>, vector<256x8xf32> -> vector<256x8xf32>
    %16 = arith.addf %8, %15 : vector<256x8xf32>
    %c0_14 = arith.constant 0 : index
    %c0_15 = arith.constant 0 : index
    %c2 = arith.constant 2 : index
    %c0_16 = arith.constant 0 : index
    %17 = vector.load %arg1[%c0_14, %c0_15, %c2, %c0_16] : memref<1x18x18x4xf32, #tpu.memory_space<vmem>>, vector<1x16x16x4xf32>
    %18 = vector.shape_cast %17 : vector<1x16x16x4xf32> to vector<16x16x4xf32>
    %19 = vector.shape_cast %18 : vector<16x16x4xf32> to vector<256x4xf32>
    %20 = arith.truncf %19 : vector<256x4xf32> to vector<256x4xbf16>
    %c2_17 = arith.constant 2 : index
    %c0_18 = arith.constant 0 : index
    %c0_19 = arith.constant 0 : index
    %21 = vector.load %arg2[%c2_17, %c0_18, %c0_19] : memref<9x4x8xbf16, #tpu.memory_space<vmem>>, vector<1x4x8xbf16>
    %22 = vector.shape_cast %21 : vector<1x4x8xbf16> to vector<4x8xbf16>
    %cst_20 = arith.constant dense<0.000000e+00> : vector<256x8xf32>
    %23 = tpu.matmul %20, %22, %cst_20 {dimension_numbers = #tpu.dot_dimension_numbers<[1], [0], [0], [1], [0, 0, 1, 1], [], []>} : vector<256x4xbf16>, vector<4x8xbf16>, vector<256x8xf32> -> vector<256x8xf32>
    %24 = arith.addf %16, %23 : vector<256x8xf32>
    %c0_21 = arith.constant 0 : index
    %c1_22 = arith.constant 1 : index
    %c0_23 = arith.constant 0 : index
    %c0_24 = arith.constant 0 : index
    %25 = vector.load %arg1[%c0_21, %c1_22, %c0_23, %c0_24] : memref<1x18x18x4xf32, #tpu.memory_space<vmem>>, vector<1x16x16x4xf32>
    %26 = vector.shape_cast %25 : vector<1x16x16x4xf32> to vector<16x16x4xf32>
    %27 = vector.shape_cast %26 : vector<16x16x4xf32> to vector<256x4xf32>
    %28 = arith.truncf %27 : vector<256x4xf32> to vector<256x4xbf16>
    %c3 = arith.constant 3 : index
    %c0_25 = arith.constant 0 : index
    %c0_26 = arith.constant 0 : index
    %29 = vector.load %arg2[%c3, %c0_25, %c0_26] : memref<9x4x8xbf16, #tpu.memory_space<vmem>>, vector<1x4x8xbf16>
    %30 = vector.shape_cast %29 : vector<1x4x8xbf16> to vector<4x8xbf16>
    %cst_27 = arith.constant dense<0.000000e+00> : vector<256x8xf32>
    %31 = tpu.matmul %28, %30, %cst_27 {dimension_numbers = #tpu.dot_dimension_numbers<[1], [0], [0], [1], [0, 0, 1, 1], [], []>} : vector<256x4xbf16>, vector<4x8xbf16>, vector<256x8xf32> -> vector<256x8xf32>
    %32 = arith.addf %24, %31 : vector<256x8xf32>
    %c0_28 = arith.constant 0 : index
    %c1_29 = arith.constant 1 : index
    %c1_30 = arith.constant 1 : index
    %c0_31 = arith.constant 0 : index
    %33 = vector.load %arg1[%c0_28, %c1_29, %c1_30, %c0_31] : memref<1x18x18x4xf32, #tpu.memory_space<vmem>>, vector<1x16x16x4xf32>
    %34 = vector.shape_cast %33 : vector<1x16x16x4xf32> to vector<16x16x4xf32>
    %35 = vector.shape_cast %34 : vector<16x16x4xf32> to vector<256x4xf32>
    %36 = arith.truncf %35 : vector<256x4xf32> to vector<256x4xbf16>
    %c4 = arith.constant 4 : index
    %c0_32 = arith.constant 0 : index
    %c0_33 = arith.constant 0 : index
    %37 = vector.load %arg2[%c4, %c0_32, %c0_33] : memref<9x4x8xbf16, #tpu.memory_space<vmem>>, vector<1x4x8xbf16>
    %38 = vector.shape_cast %37 : vector<1x4x8xbf16> to vector<4x8xbf16>
    %cst_34 = arith.constant dense<0.000000e+00> : vector<256x8xf32>
    %39 = tpu.matmul %36, %38, %cst_34 {dimension_numbers = #tpu.dot_dimension_numbers<[1], [0], [0], [1], [0, 0, 1, 1], [], []>} : vector<256x4xbf16>, vector<4x8xbf16>, vector<256x8xf32> -> vector<256x8xf32>
    %40 = arith.addf %32, %39 : vector<256x8xf32>
    %c0_35 = arith.constant 0 : index
    %c1_36 = arith.constant 1 : index
    %c2_37 = arith.constant 2 : index
    %c0_38 = arith.constant 0 : index
    %41 = vector.load %arg1[%c0_35, %c1_36, %c2_37, %c0_38] : memref<1x18x18x4xf32, #tpu.memory_space<vmem>>, vector<1x16x16x4xf32>
    %42 = vector.shape_cast %41 : vector<1x16x16x4xf32> to vector<16x16x4xf32>
    %43 = vector.shape_cast %42 : vector<16x16x4xf32> to vector<256x4xf32>
    %44 = arith.truncf %43 : vector<256x4xf32> to vector<256x4xbf16>
    %c5 = arith.constant 5 : index
    %c0_39 = arith.constant 0 : index
    %c0_40 = arith.constant 0 : index
    %45 = vector.load %arg2[%c5, %c0_39, %c0_40] : memref<9x4x8xbf16, #tpu.memory_space<vmem>>, vector<1x4x8xbf16>
    %46 = vector.shape_cast %45 : vector<1x4x8xbf16> to vector<4x8xbf16>
    %cst_41 = arith.constant dense<0.000000e+00> : vector<256x8xf32>
    %47 = tpu.matmul %44, %46, %cst_41 {dimension_numbers = #tpu.dot_dimension_numbers<[1], [0], [0], [1], [0, 0, 1, 1], [], []>} : vector<256x4xbf16>, vector<4x8xbf16>, vector<256x8xf32> -> vector<256x8xf32>
    %48 = arith.addf %40, %47 : vector<256x8xf32>
    %c0_42 = arith.constant 0 : index
    %c2_43 = arith.constant 2 : index
    %c0_44 = arith.constant 0 : index
    %c0_45 = arith.constant 0 : index
    %49 = vector.load %arg1[%c0_42, %c2_43, %c0_44, %c0_45] : memref<1x18x18x4xf32, #tpu.memory_space<vmem>>, vector<1x16x16x4xf32>
    %50 = vector.shape_cast %49 : vector<1x16x16x4xf32> to vector<16x16x4xf32>
    %51 = vector.shape_cast %50 : vector<16x16x4xf32> to vector<256x4xf32>
    %52 = arith.truncf %51 : vector<256x4xf32> to vector<256x4xbf16>
    %c6 = arith.constant 6 : index
    %c0_46 = arith.constant 0 : index
    %c0_47 = arith.constant 0 : index
    %53 = vector.load %arg2[%c6, %c0_46, %c0_47] : memref<9x4x8xbf16, #tpu.memory_space<vmem>>, vector<1x4x8xbf16>
    %54 = vector.shape_cast %53 : vector<1x4x8xbf16> to vector<4x8xbf16>
    %cst_48 = arith.constant dense<0.000000e+00> : vector<256x8xf32>
    %55 = tpu.matmul %52, %54, %cst_48 {dimension_numbers = #tpu.dot_dimension_numbers<[1], [0], [0], [1], [0, 0, 1, 1], [], []>} : vector<256x4xbf16>, vector<4x8xbf16>, vector<256x8xf32> -> vector<256x8xf32>
    %56 = arith.addf %48, %55 : vector<256x8xf32>
    %c0_49 = arith.constant 0 : index
    %c2_50 = arith.constant 2 : index
    %c1_51 = arith.constant 1 : index
    %c0_52 = arith.constant 0 : index
    %57 = vector.load %arg1[%c0_49, %c2_50, %c1_51, %c0_52] : memref<1x18x18x4xf32, #tpu.memory_space<vmem>>, vector<1x16x16x4xf32>
    %58 = vector.shape_cast %57 : vector<1x16x16x4xf32> to vector<16x16x4xf32>
    %59 = vector.shape_cast %58 : vector<16x16x4xf32> to vector<256x4xf32>
    %60 = arith.truncf %59 : vector<256x4xf32> to vector<256x4xbf16>
    %c7 = arith.constant 7 : index
    %c0_53 = arith.constant 0 : index
    %c0_54 = arith.constant 0 : index
    %61 = vector.load %arg2[%c7, %c0_53, %c0_54] : memref<9x4x8xbf16, #tpu.memory_space<vmem>>, vector<1x4x8xbf16>
    %62 = vector.shape_cast %61 : vector<1x4x8xbf16> to vector<4x8xbf16>
    %cst_55 = arith.constant dense<0.000000e+00> : vector<256x8xf32>
    %63 = tpu.matmul %60, %62, %cst_55 {dimension_numbers = #tpu.dot_dimension_numbers<[1], [0], [0], [1], [0, 0, 1, 1], [], []>} : vector<256x4xbf16>, vector<4x8xbf16>, vector<256x8xf32> -> vector<256x8xf32>
    %64 = arith.addf %56, %63 : vector<256x8xf32>
    %c0_56 = arith.constant 0 : index
    %c2_57 = arith.constant 2 : index
    %c2_58 = arith.constant 2 : index
    %c0_59 = arith.constant 0 : index
    %65 = vector.load %arg1[%c0_56, %c2_57, %c2_58, %c0_59] : memref<1x18x18x4xf32, #tpu.memory_space<vmem>>, vector<1x16x16x4xf32>
    %66 = vector.shape_cast %65 : vector<1x16x16x4xf32> to vector<16x16x4xf32>
    %67 = vector.shape_cast %66 : vector<16x16x4xf32> to vector<256x4xf32>
    %68 = arith.truncf %67 : vector<256x4xf32> to vector<256x4xbf16>
    %c8 = arith.constant 8 : index
    %c0_60 = arith.constant 0 : index
    %c0_61 = arith.constant 0 : index
    %69 = vector.load %arg2[%c8, %c0_60, %c0_61] : memref<9x4x8xbf16, #tpu.memory_space<vmem>>, vector<1x4x8xbf16>
    %70 = vector.shape_cast %69 : vector<1x4x8xbf16> to vector<4x8xbf16>
    %cst_62 = arith.constant dense<0.000000e+00> : vector<256x8xf32>
    %71 = tpu.matmul %68, %70, %cst_62 {dimension_numbers = #tpu.dot_dimension_numbers<[1], [0], [0], [1], [0, 0, 1, 1], [], []>} : vector<256x4xbf16>, vector<4x8xbf16>, vector<256x8xf32> -> vector<256x8xf32>
    %72 = arith.addf %64, %71 : vector<256x8xf32>
    %c0_63 = arith.constant 0 : index
    %c0_64 = arith.constant 0 : index
    %73 = vector.load %arg3[%c0_63, %c0_64] : memref<1x8xf32, #tpu.memory_space<vmem>>, vector<1x8xf32>
    %74 = vector.broadcast %73 : vector<1x8xf32> to vector<256x8xf32>
    %75 = arith.addf %72, %74 : vector<256x8xf32>
    %cst_65 = arith.constant 0.000000e+00 : f32
    %76 = vector.broadcast %cst_65 : f32 to vector<256x8xf32>
    %77 = arith.maximumf %75, %76 : vector<256x8xf32>
    %cst_66 = arith.constant 0.000000e+00 : f32
    %78 = vector.broadcast %cst_66 : f32 to vector<18x18x8xf32>
    %c0_67 = arith.constant 0 : index
    %c0_68 = arith.constant 0 : index
    %c0_69 = arith.constant 0 : index
    %79 = vector.load %arg7[%c0_67, %c0_68, %c0_69] : memref<18x18x8xf32, #tpu.memory_space<vmem>>, vector<18x18x8xf32>
    tpu.vector_store %arg7[%c0_67, %c0_68, %c0_69], %78 {strides = array<i32>} : memref<18x18x8xf32, #tpu.memory_space<vmem>>, vector<18x18x8xf32>,
    %80 = vector.shape_cast %77 : vector<256x8xf32> to vector<16x16x8xf32>
    %c1_70 = arith.constant 1 : index
    %c1_71 = arith.constant 1 : index
    %c0_72 = arith.constant 0 : index
    %81 = vector.load %arg7[%c1_70, %c1_71, %c0_72] : memref<18x18x8xf32, #tpu.memory_space<vmem>>, vector<16x16x8xf32>
    tpu.vector_store %arg7[%c1_70, %c1_71, %c0_72], %80 {strides = array<i32>} : memref<18x18x8xf32, #tpu.memory_space<vmem>>, vector<16x16x8xf32>,
    %cst_73 = arith.constant 0.000000e+00 : f32
    %82 = vector.broadcast %cst_73 : f32 to vector<256x128xf32>
    %c0_74 = arith.constant 0 : index
    %c0_75 = arith.constant 0 : index
    %c0_76 = arith.constant 0 : index
    %83 = vector.load %arg7[%c0_74, %c0_75, %c0_76] : memref<18x18x8xf32, #tpu.memory_space<vmem>>, vector<16x16x8xf32>
    %84 = vector.shape_cast %83 : vector<16x16x8xf32> to vector<256x8xf32>
    %85 = arith.truncf %84 : vector<256x8xf32> to vector<256x8xbf16>
    %c0_77 = arith.constant 0 : index
    %c0_78 = arith.constant 0 : index
    %c0_79 = arith.constant 0 : index
    %86 = vector.load %arg4[%c0_77, %c0_78, %c0_79] : memref<9x8x128xbf16, #tpu.memory_space<vmem>>, vector<1x8x128xbf16>
    %87 = vector.shape_cast %86 : vector<1x8x128xbf16> to vector<8x128xbf16>
    %cst_80 = arith.constant dense<0.000000e+00> : vector<256x128xf32>
    %88 = tpu.matmul %85, %87, %cst_80 {dimension_numbers = #tpu.dot_dimension_numbers<[1], [0], [0], [1], [0, 0, 1, 1], [], []>} : vector<256x8xbf16>, vector<8x128xbf16>, vector<256x128xf32> -> vector<256x128xf32>
    %89 = arith.addf %82, %88 : vector<256x128xf32>
    %c0_81 = arith.constant 0 : index
    %c1_82 = arith.constant 1 : index
    %c0_83 = arith.constant 0 : index
    %90 = vector.load %arg7[%c0_81, %c1_82, %c0_83] : memref<18x18x8xf32, #tpu.memory_space<vmem>>, vector<16x16x8xf32>
    %91 = vector.shape_cast %90 : vector<16x16x8xf32> to vector<256x8xf32>
    %92 = arith.truncf %91 : vector<256x8xf32> to vector<256x8xbf16>
    %c1_84 = arith.constant 1 : index
    %c0_85 = arith.constant 0 : index
    %c0_86 = arith.constant 0 : index
    %93 = vector.load %arg4[%c1_84, %c0_85, %c0_86] : memref<9x8x128xbf16, #tpu.memory_space<vmem>>, vector<1x8x128xbf16>
    %94 = vector.shape_cast %93 : vector<1x8x128xbf16> to vector<8x128xbf16>
    %cst_87 = arith.constant dense<0.000000e+00> : vector<256x128xf32>
    %95 = tpu.matmul %92, %94, %cst_87 {dimension_numbers = #tpu.dot_dimension_numbers<[1], [0], [0], [1], [0, 0, 1, 1], [], []>} : vector<256x8xbf16>, vector<8x128xbf16>, vector<256x128xf32> -> vector<256x128xf32>
    %96 = arith.addf %89, %95 : vector<256x128xf32>
    %c0_88 = arith.constant 0 : index
    %c2_89 = arith.constant 2 : index
    %c0_90 = arith.constant 0 : index
    %97 = vector.load %arg7[%c0_88, %c2_89, %c0_90] : memref<18x18x8xf32, #tpu.memory_space<vmem>>, vector<16x16x8xf32>
    %98 = vector.shape_cast %97 : vector<16x16x8xf32> to vector<256x8xf32>
    %99 = arith.truncf %98 : vector<256x8xf32> to vector<256x8xbf16>
    %c2_91 = arith.constant 2 : index
    %c0_92 = arith.constant 0 : index
    %c0_93 = arith.constant 0 : index
    %100 = vector.load %arg4[%c2_91, %c0_92, %c0_93] : memref<9x8x128xbf16, #tpu.memory_space<vmem>>, vector<1x8x128xbf16>
    %101 = vector.shape_cast %100 : vector<1x8x128xbf16> to vector<8x128xbf16>
    %cst_94 = arith.constant dense<0.000000e+00> : vector<256x128xf32>
    %102 = tpu.matmul %99, %101, %cst_94 {dimension_numbers = #tpu.dot_dimension_numbers<[1], [0], [0], [1], [0, 0, 1, 1], [], []>} : vector<256x8xbf16>, vector<8x128xbf16>, vector<256x128xf32> -> vector<256x128xf32>
    %103 = arith.addf %96, %102 : vector<256x128xf32>
    %c1_95 = arith.constant 1 : index
    %c0_96 = arith.constant 0 : index
    %c0_97 = arith.constant 0 : index
    %104 = vector.load %arg7[%c1_95, %c0_96, %c0_97] : memref<18x18x8xf32, #tpu.memory_space<vmem>>, vector<16x16x8xf32>
    %105 = vector.shape_cast %104 : vector<16x16x8xf32> to vector<256x8xf32>
    %106 = arith.truncf %105 : vector<256x8xf32> to vector<256x8xbf16>
    %c3_98 = arith.constant 3 : index
    %c0_99 = arith.constant 0 : index
    %c0_100 = arith.constant 0 : index
    %107 = vector.load %arg4[%c3_98, %c0_99, %c0_100] : memref<9x8x128xbf16, #tpu.memory_space<vmem>>, vector<1x8x128xbf16>
    %108 = vector.shape_cast %107 : vector<1x8x128xbf16> to vector<8x128xbf16>
    %cst_101 = arith.constant dense<0.000000e+00> : vector<256x128xf32>
    %109 = tpu.matmul %106, %108, %cst_101 {dimension_numbers = #tpu.dot_dimension_numbers<[1], [0], [0], [1], [0, 0, 1, 1], [], []>} : vector<256x8xbf16>, vector<8x128xbf16>, vector<256x128xf32> -> vector<256x128xf32>
    %110 = arith.addf %103, %109 : vector<256x128xf32>
    %c1_102 = arith.constant 1 : index
    %c1_103 = arith.constant 1 : index
    %c0_104 = arith.constant 0 : index
    %111 = vector.load %arg7[%c1_102, %c1_103, %c0_104] : memref<18x18x8xf32, #tpu.memory_space<vmem>>, vector<16x16x8xf32>
    %112 = vector.shape_cast %111 : vector<16x16x8xf32> to vector<256x8xf32>
    %113 = arith.truncf %112 : vector<256x8xf32> to vector<256x8xbf16>
    %c4_105 = arith.constant 4 : index
    %c0_106 = arith.constant 0 : index
    %c0_107 = arith.constant 0 : index
    %114 = vector.load %arg4[%c4_105, %c0_106, %c0_107] : memref<9x8x128xbf16, #tpu.memory_space<vmem>>, vector<1x8x128xbf16>
    %115 = vector.shape_cast %114 : vector<1x8x128xbf16> to vector<8x128xbf16>
    %cst_108 = arith.constant dense<0.000000e+00> : vector<256x128xf32>
    %116 = tpu.matmul %113, %115, %cst_108 {dimension_numbers = #tpu.dot_dimension_numbers<[1], [0], [0], [1], [0, 0, 1, 1], [], []>} : vector<256x8xbf16>, vector<8x128xbf16>, vector<256x128xf32> -> vector<256x128xf32>
    %117 = arith.addf %110, %116 : vector<256x128xf32>
    %c1_109 = arith.constant 1 : index
    %c2_110 = arith.constant 2 : index
    %c0_111 = arith.constant 0 : index
    %118 = vector.load %arg7[%c1_109, %c2_110, %c0_111] : memref<18x18x8xf32, #tpu.memory_space<vmem>>, vector<16x16x8xf32>
    %119 = vector.shape_cast %118 : vector<16x16x8xf32> to vector<256x8xf32>
    %120 = arith.truncf %119 : vector<256x8xf32> to vector<256x8xbf16>
    %c5_112 = arith.constant 5 : index
    %c0_113 = arith.constant 0 : index
    %c0_114 = arith.constant 0 : index
    %121 = vector.load %arg4[%c5_112, %c0_113, %c0_114] : memref<9x8x128xbf16, #tpu.memory_space<vmem>>, vector<1x8x128xbf16>
    %122 = vector.shape_cast %121 : vector<1x8x128xbf16> to vector<8x128xbf16>
    %cst_115 = arith.constant dense<0.000000e+00> : vector<256x128xf32>
    %123 = tpu.matmul %120, %122, %cst_115 {dimension_numbers = #tpu.dot_dimension_numbers<[1], [0], [0], [1], [0, 0, 1, 1], [], []>} : vector<256x8xbf16>, vector<8x128xbf16>, vector<256x128xf32> -> vector<256x128xf32>
    %124 = arith.addf %117, %123 : vector<256x128xf32>
    %c2_116 = arith.constant 2 : index
    %c0_117 = arith.constant 0 : index
    %c0_118 = arith.constant 0 : index
    %125 = vector.load %arg7[%c2_116, %c0_117, %c0_118] : memref<18x18x8xf32, #tpu.memory_space<vmem>>, vector<16x16x8xf32>
    %126 = vector.shape_cast %125 : vector<16x16x8xf32> to vector<256x8xf32>
    %127 = arith.truncf %126 : vector<256x8xf32> to vector<256x8xbf16>
    %c6_119 = arith.constant 6 : index
    %c0_120 = arith.constant 0 : index
    %c0_121 = arith.constant 0 : index
    %128 = vector.load %arg4[%c6_119, %c0_120, %c0_121] : memref<9x8x128xbf16, #tpu.memory_space<vmem>>, vector<1x8x128xbf16>
    %129 = vector.shape_cast %128 : vector<1x8x128xbf16> to vector<8x128xbf16>
    %cst_122 = arith.constant dense<0.000000e+00> : vector<256x128xf32>
    %130 = tpu.matmul %127, %129, %cst_122 {dimension_numbers = #tpu.dot_dimension_numbers<[1], [0], [0], [1], [0, 0, 1, 1], [], []>} : vector<256x8xbf16>, vector<8x128xbf16>, vector<256x128xf32> -> vector<256x128xf32>
    %131 = arith.addf %124, %130 : vector<256x128xf32>
    %c2_123 = arith.constant 2 : index
    %c1_124 = arith.constant 1 : index
    %c0_125 = arith.constant 0 : index
    %132 = vector.load %arg7[%c2_123, %c1_124, %c0_125] : memref<18x18x8xf32, #tpu.memory_space<vmem>>, vector<16x16x8xf32>
    %133 = vector.shape_cast %132 : vector<16x16x8xf32> to vector<256x8xf32>
    %134 = arith.truncf %133 : vector<256x8xf32> to vector<256x8xbf16>
    %c7_126 = arith.constant 7 : index
    %c0_127 = arith.constant 0 : index
    %c0_128 = arith.constant 0 : index
    %135 = vector.load %arg4[%c7_126, %c0_127, %c0_128] : memref<9x8x128xbf16, #tpu.memory_space<vmem>>, vector<1x8x128xbf16>
    %136 = vector.shape_cast %135 : vector<1x8x128xbf16> to vector<8x128xbf16>
    %cst_129 = arith.constant dense<0.000000e+00> : vector<256x128xf32>
    %137 = tpu.matmul %134, %136, %cst_129 {dimension_numbers = #tpu.dot_dimension_numbers<[1], [0], [0], [1], [0, 0, 1, 1], [], []>} : vector<256x8xbf16>, vector<8x128xbf16>, vector<256x128xf32> -> vector<256x128xf32>
    %138 = arith.addf %131, %137 : vector<256x128xf32>
    %c2_130 = arith.constant 2 : index
    %c2_131 = arith.constant 2 : index
    %c0_132 = arith.constant 0 : index
    %139 = vector.load %arg7[%c2_130, %c2_131, %c0_132] : memref<18x18x8xf32, #tpu.memory_space<vmem>>, vector<16x16x8xf32>
    %140 = vector.shape_cast %139 : vector<16x16x8xf32> to vector<256x8xf32>
    %141 = arith.truncf %140 : vector<256x8xf32> to vector<256x8xbf16>
    %c8_133 = arith.constant 8 : index
    %c0_134 = arith.constant 0 : index
    %c0_135 = arith.constant 0 : index
    %142 = vector.load %arg4[%c8_133, %c0_134, %c0_135] : memref<9x8x128xbf16, #tpu.memory_space<vmem>>, vector<1x8x128xbf16>
    %143 = vector.shape_cast %142 : vector<1x8x128xbf16> to vector<8x128xbf16>
    %cst_136 = arith.constant dense<0.000000e+00> : vector<256x128xf32>
    %144 = tpu.matmul %141, %143, %cst_136 {dimension_numbers = #tpu.dot_dimension_numbers<[1], [0], [0], [1], [0, 0, 1, 1], [], []>} : vector<256x8xbf16>, vector<8x128xbf16>, vector<256x128xf32> -> vector<256x128xf32>
    %145 = arith.addf %138, %144 : vector<256x128xf32>
    %c0_137 = arith.constant 0 : index
    %c0_138 = arith.constant 0 : index
    %146 = vector.load %arg5[%c0_137, %c0_138] : memref<1x128xf32, #tpu.memory_space<vmem>>, vector<1x128xf32>
    %147 = vector.broadcast %146 : vector<1x128xf32> to vector<256x128xf32>
    %148 = arith.addf %145, %147 : vector<256x128xf32>
    %cst_139 = arith.constant 0.000000e+00 : f32
    %149 = vector.broadcast %cst_139 : f32 to vector<256x128xf32>
    %150 = arith.maximumf %148, %149 : vector<256x128xf32>
    %151 = tpu.transpose %150, [1, 0] : vector<256x128xf32> -> vector<128x256xf32>
    %152 = vector.extract_strided_slice %151 {offsets = [0, 0], sizes = [8, 256], strides = [1, 1]} : vector<128x256xf32> to vector<8x256xf32>
    %c0_140 = arith.constant 0 : index
    %c0_141 = arith.constant 0 : index
    %c0_142 = arith.constant 0 : index
    %153 = vector.load %arg6[%c0_140, %c0_141, %c0_142] : memref<1x8x256xf32, #tpu.memory_space<vmem>>, vector<1x8x256xf32>
    %154 = vector.shape_cast %153 : vector<1x8x256xf32> to vector<8x256xf32>
    %155 = vector.shape_cast %152 : vector<8x256xf32> to vector<1x8x256xf32>
    tpu.vector_store %arg6[%c0_140, %c0_141, %c0_142], %155 {strides = array<i32>} : memref<1x8x256xf32, #tpu.memory_space<vmem>>, vector<1x8x256xf32>,
    return
  }
  func.func @transform_0(%arg0: i32) -> (i32, i32, i32, i32) {
    %c0_i32 = arith.constant 0 : i32
    %c0_i32_0 = arith.constant 0 : i32
    %c0_i32_1 = arith.constant 0 : i32
    %c0_i32_2 = arith.constant 0 : i32
    return %arg0, %c0_i32, %c0_i32_0, %c0_i32_1 : i32, i32, i32, i32
  }
  func.func @transform_1(%arg0: i32) -> (i32, i32, i32) {
    %c0_i32 = arith.constant 0 : i32
    %c0_i32_0 = arith.constant 0 : i32
    %c0_i32_1 = arith.constant 0 : i32
    %c0_i32_2 = arith.constant 0 : i32
    return %c0_i32, %c0_i32_0, %c0_i32_1 : i32, i32, i32
  }
  func.func @transform_2(%arg0: i32) -> (i32, i32) {
    %c0_i32 = arith.constant 0 : i32
    %c0_i32_0 = arith.constant 0 : i32
    %c0_i32_1 = arith.constant 0 : i32
    return %c0_i32, %c0_i32_0 : i32, i32
  }
  func.func @transform_3(%arg0: i32) -> (i32, i32, i32) {
    %c0_i32 = arith.constant 0 : i32
    %c0_i32_0 = arith.constant 0 : i32
    %c0_i32_1 = arith.constant 0 : i32
    %c0_i32_2 = arith.constant 0 : i32
    return %c0_i32, %c0_i32_0, %c0_i32_1 : i32, i32, i32
  }
  func.func @transform_4(%arg0: i32) -> (i32, i32) {
    %c0_i32 = arith.constant 0 : i32
    %c0_i32_0 = arith.constant 0 : i32
    %c0_i32_1 = arith.constant 0 : i32
    return %c0_i32, %c0_i32_0 : i32, i32
  }
  func.func @transform_5(%arg0: i32) -> (i32, i32, i32) {
    %c0_i32 = arith.constant 0 : i32
    %c0_i32_0 = arith.constant 0 : i32
    %c0_i32_1 = arith.constant 0 : i32
    return %arg0, %c0_i32, %c0_i32_0 : i32, i32, i32
  }
}

</mosaic_0001>

<bundles_post_ra>
// kernel: base_conv_forward.1
= control target key start
LH: loop header
LB: loop body
LE: loop exit
PB: predicated region body
PF: predicated region fallthrough
CT: control target
= control target key end

     0   :  { %s5005_s18 = smov 0   ;;  %s6705_s0 = inlined_call_operand.vmem [shape: f32[2,18,18,4], index: 0, kind: input, shape index: {}]   ;;  %s6706_s1 = inlined_call_operand.vmem [shape: bf16[9,4,8], index: 1, kind: input, shape index: {}]   ;;  %s6707_s2 = inlined_call_operand.vmem [shape: f32[1,8], index: 2, kind: input, shape index: {}]   ;;  %s6708_s3 = inlined_call_operand.vmem [shape: bf16[9,8,128], index: 3, kind: input, shape index: {}]   ;;  %s6709_s4 = inlined_call_operand.vmem [shape: f32[1,128], index: 4, kind: input, shape index: {}]   ;;  %s6710_s5 = inlined_call_operand.vmem [shape: f32[2,8,256], index: 5, kind: output, shape index: {}]  }
   0x1 LB: > { %s4444_s19 = sadd.s32 4294967295, %s4972_s18   ;;  %p4448_p0 = scmp.ge.s32.totalorder %s4972_s18, 1  ;;  %s4972_s18 = sphi %s5005_s18, %s15_s18  }
   0x2   : > { %p187_p1 = scmp.lt.s32.totalorder %s4972_s18, 3 }
   0x4   : > { %p188_p2 = pnand %p4448_p0, %p187_p1 }
   0x6   : > { %191 = sbr.rel (%p188_p2) target bundleno = 1487 (0x5cf), region = 40 }
   0xb   : > { %v4452_v0 = vld [vmem:[%s6706_s1 + $0x2] sm:$0x3]  ;;  %vm374_vm0 = vcmask 1041408   ;;  %v274_v1 = vld [vmem:[%s6706_s1] sm:$0x3]  ;;  %p215_p3 = scmp.lt.s32.totalorder %s4444_s19, 1 }
   0xc   : > { %v376_v2 = vsel %vm374_vm0, %v4452_v0, 0  ;;  %v516_v3 = vsel %vm374_vm0, %v274_v1, 0  ;;  %v4485_v4 = vld [vmem:[%s6706_s1 + $0x4] sm:$0x3]  ;;  %v4534_v6 = vld [vmem:[%s6706_s1 + $0x6] sm:$0x3] }
   0xd   : > { %385 = vmatpush.bf16.msra.mxu0 %v376_v2  ;;  %4951 = vmatpush.bf16.msra.mxu2 %v376_v2  ;;  %s6797_s19 = smov (!%p215_p3, %s4444_s19), 1  ;;  %v706_v5 = vsel %vm374_vm0, %v4485_v4, 0  ;;  %v4583_v7 = vld [vmem:[%s6706_s1 + $0x8] sm:$0x3]  ;;  %v929_v8 = vsel %vm374_vm0, %v4534_v6, 0  ;;  %vm325_vm1 = vcmask 31744  }
   0xe   : > { %4952 = vmatpush.bf16.msra.mxu3 %v516_v3  ;;  %525 = vmatpush.bf16.msra.mxu1 %v516_v3  ;;  %v1151_v9 = vsel %vm374_vm0, %v4583_v7, 0  ;;  %s4953_s30 = smul.u32 432, %s6797_s19  ;;  %vm2467_vm2 = vcmask 1043456   ;;  %vm2231_vm3 = vcmask 64512   ;;  %vm2234_vm4 = vcmask 58368   ;;  %s4950_s20 = sshll.u32 %s6797_s19, 4 }
   0xf   : > { %s224_s23 = scalar_lea.vmem %s6710_s5, %s4950_s20 }
  0x10   : > { %s5039_s8 = scalar_lea.vmem %s6705_s0, %s4953_s30 }
  0x11   : > { %715 = vmatpush.bf16.msrb.mxu2 %v706_v5  ;;  %1160 = vmatpush.bf16.msrb.mxu0 %v1151_v9  ;;  %v275_v10 = vld [vmem:[%s5039_s8 + $0x1] sm:$0xff]  ;;  %v276_v11 = vld [vmem:[%s5039_s8 + $0x9] sm:$0xff]  ;;  %v277_v22 = vld [vmem:[%s5039_s8 + $0x19] sm:$0xff] }
  0x12   : > { %938 = vmatpush.bf16.msrb.mxu3 %v929_v8  ;;  %v291_v12 = vld [vmem:[%s5039_s8 + $0xc1] sm:$0xff]  ;;  %v307_v13 = vpack.c.bf16 %v276_v11, %v275_v10  ;;  %v292_v14 = vld [vmem:[%s5039_s8 + $0xc9] sm:$0xff]  ;;  %v293_v24 = vld [vmem:[%s5039_s8 + $0xd9] sm:$0xff] }
  0x13   : > { %v242_v15 = vld [vmem:[%s5039_s8 + $0xc0] sm:$0xff]  ;;  %v243_v16 = vld [vmem:[%s5039_s8 + $0xc8] sm:$0xff]  ;;  %v5047_v17 = vpack.c.bf16 %v292_v14, %v291_v12  ;;  %v244_v26 = vld [vmem:[%s5039_s8 + $0xd8] sm:$0xff] }
  0x14   : > { %v5049_v18 = vpack.c.bf16 %v243_v16, %v242_v15  ;;  %v226_v19 = vld [vmem:[%s5039_s8] sm:$0xff]  ;;  %v227_v20 = vld [vmem:[%s5039_s8 + $0x8] sm:$0xff]  ;;  %4453 = vmatmul.msk.bf16.vlgmr.msra.gmra.mxu0 %vm325_vm1, %v307_v13  ;;  %v228_v28 = vld [vmem:[%s5039_s8 + $0x18] sm:$0xff] }
  0x15   : > { %v258_v21 = vpack.c.bf16 %v227_v20, %v226_v19  ;;  %4461 = vmatmul.msk.bf16.vlgmr.msra.gmra.mxu2 %vm325_vm1, %v5047_v17  ;;  %v278_v23 = vld [vmem:[%s5039_s8 + $0x21] sm:$0xff]  ;;  %v279_v34 = vld [vmem:[%s5039_s8 + $0x31] sm:$0xff]  ;;  %v280_v35 = vld [vmem:[%s5039_s8 + $0x39] sm:$0xff] }
  0x16   : > { %4477 = vmatmul.msk.bf16.vlgmr.msra.gmra.mxu3 %vm325_vm1, %v5049_v18  ;;  %v294_v25 = vld [vmem:[%s5039_s8 + $0xe1] sm:$0xff]  ;;  %v5067_v30 = vpack.c.bf16 %v278_v23, %v277_v22  ;;  %v295_v36 = vld [vmem:[%s5039_s8 + $0xf1] sm:$0xff]  ;;  %v296_v37 = vld [vmem:[%s5039_s8 + $0xf9] sm:$0xff]  ;;  %v5091_v42 = vpack.c.bf16 %v280_v35, %v279_v34 }
  0x17   : > { %4469 = vmatmul.msk.bf16.vlgmr.msra.gmra.mxu1 %vm325_vm1, %v258_v21  ;;  %v245_v27 = vld [vmem:[%s5039_s8 + $0xe0] sm:$0xff]  ;;  %v5069_v31 = vpack.c.bf16 %v294_v25, %v293_v24  ;;  %v246_v38 = vld [vmem:[%s5039_s8 + $0xf0] sm:$0xff]  ;;  %v247_v39 = vld [vmem:[%s5039_s8 + $0xf8] sm:$0xff]  ;;  %v5093_v43 = vpack.c.bf16 %v296_v37, %v295_v36 }
  0x18   : > { %v229_v29 = vld [vmem:[%s5039_s8 + $0x20] sm:$0xff]  ;;  %v5071_v32 = vpack.c.bf16 %v245_v27, %v244_v26  ;;  %v230_v40 = vld [vmem:[%s5039_s8 + $0x30] sm:$0xff]  ;;  %v231_v41 = vld [vmem:[%s5039_s8 + $0x38] sm:$0xff]  ;;  %v5095_v44 = vpack.c.bf16 %v247_v39, %v246_v38 }
  0x19   : > { %v5073_v33 = vpack.c.bf16 %v229_v29, %v228_v28  ;;  %v5097_v45 = vpack.c.bf16 %v231_v41, %v230_v40  ;;  %v281_v46 = vld [vmem:[%s5039_s8 + $0x49] sm:$0xff]  ;;  %v282_v47 = vld [vmem:[%s5039_s8 + $0x51] sm:$0xff]  ;;  %v283_v58 = vld [vmem:[%s5039_s8 + $0x61] sm:$0xff] }
  0x1a   : > { %v297_v48 = vld [vmem:[%s5039_s8 + $0x109] sm:$0xff]  ;;  %v298_v49 = vld [vmem:[%s5039_s8 + $0x111] sm:$0xff]  ;;  %v5115_v54 = vpack.c.bf16 %v282_v47, %v281_v46  ;;  %v299_v60 = vld [vmem:[%s5039_s8 + $0x121] sm:$0xff] }
  0x1b   : > { %v248_v50 = vld [vmem:[%s5039_s8 + $0x108] sm:$0xff]  ;;  %v249_v51 = vld [vmem:[%s5039_s8 + $0x110] sm:$0xff]  ;;  %v5117_v55 = vpack.c.bf16 %v298_v49, %v297_v48  ;;  %v250_v62 = vld [vmem:[%s5039_s8 + $0x120] sm:$0xff] }
  0x1c   : > { %v232_v52 = vld [vmem:[%s5039_s8 + $0x48] sm:$0xff]  ;;  %v233_v53 = vld [vmem:[%s5039_s8 + $0x50] sm:$0xff]  ;;  %v5119_v56 = vpack.c.bf16 %v249_v51, %v248_v50  ;;  %v234_v0 = vld [vmem:[%s5039_s8 + $0x60] sm:$0xff] }
  0x1d   : > { %v5121_v57 = vpack.c.bf16 %v233_v53, %v232_v52  ;;  %v284_v59 = vld [vmem:[%s5039_s8 + $0x69] sm:$0xff]  ;;  %v285_v6 = vld [vmem:[%s5039_s8 + $0x79] sm:$0xff]  ;;  %v286_v7 = vld [vmem:[%s5039_s8 + $0x81] sm:$0xff] }
  0x1e   : > { %v300_v61 = vld [vmem:[%s5039_s8 + $0x129] sm:$0xff]  ;;  %v5139_v2 = vpack.c.bf16 %v284_v59, %v283_v58  ;;  %v301_v8 = vld [vmem:[%s5039_s8 + $0x139] sm:$0xff]  ;;  %v302_v9 = vld [vmem:[%s5039_s8 + $0x141] sm:$0xff]  ;;  %v5163_v14 = vpack.c.bf16 %v286_v7, %v285_v6 }
  0x1f   : > { %v251_v63 = vld [vmem:[%s5039_s8 + $0x128] sm:$0xff]  ;;  %v5141_v3 = vpack.c.bf16 %v300_v61, %v299_v60  ;;  %v252_v10 = vld [vmem:[%s5039_s8 + $0x138] sm:$0xff]  ;;  %v253_v11 = vld [vmem:[%s5039_s8 + $0x140] sm:$0xff]  ;;  %v5165_v15 = vpack.c.bf16 %v302_v9, %v301_v8 }
  0x20   : > { %v235_v1 = vld [vmem:[%s5039_s8 + $0x68] sm:$0xff]  ;;  %v5143_v4 = vpack.c.bf16 %v251_v63, %v250_v62  ;;  %v236_v12 = vld [vmem:[%s5039_s8 + $0x78] sm:$0xff]  ;;  %v237_v13 = vld [vmem:[%s5039_s8 + $0x80] sm:$0xff]  ;;  %v5167_v16 = vpack.c.bf16 %v253_v11, %v252_v10 }
  0x21   : > { %v5145_v5 = vpack.c.bf16 %v235_v1, %v234_v0  ;;  %v5169_v19 = vpack.c.bf16 %v237_v13, %v236_v12  ;;  %v287_v20 = vld [vmem:[%s5039_s8 + $0x91] sm:$0xff]  ;;  %v288_v21 = vld [vmem:[%s5039_s8 + $0x99] sm:$0xff]  ;;  %v4681_v36 = vld [vmem:[%s6706_s1 + $0xc] sm:$0x3] }
  0x22   : > { %v303_v22 = vld [vmem:[%s5039_s8 + $0x151] sm:$0xff]  ;;  %v304_v23 = vld [vmem:[%s5039_s8 + $0x159] sm:$0xff]  ;;  %v5187_v28 = vpack.c.bf16 %v288_v21, %v287_v20  ;;  %v4730_v37 = vld [vmem:[%s6706_s1 + $0xe] sm:$0x3]  ;;  %v1596_v38 = vsel %vm374_vm0, %v4681_v36, 0 }
  0x23   : > { %v254_v24 = vld [vmem:[%s5039_s8 + $0x150] sm:$0xff]  ;;  %v255_v25 = vld [vmem:[%s5039_s8 + $0x158] sm:$0xff]  ;;  %v5189_v29 = vpack.c.bf16 %v304_v23, %v303_v22  ;;  %v1818_v39 = vsel %vm374_vm0, %v4730_v37, 0  ;;  %1605 = vmatpush.bf16.msra.mxu2 %v1596_v38  ;;  %v4632_v40 = vld [vmem:[%s6706_s1 + $0xa] sm:$0x3] }
  0x24   : > { %4454 = vmatmul.msk.bf16.gmra.mxu0 %vm325_vm1, %v5067_v30  ;;  %v238_v26 = vld [vmem:[%s5039_s8 + $0x90] sm:$0xff]  ;;  %v239_v27 = vld [vmem:[%s5039_s8 + $0x98] sm:$0xff]  ;;  %v5191_v34 = vpack.c.bf16 %v255_v25, %v254_v24  ;;  %1827 = vmatpush.bf16.msra.mxu3 %v1818_v39  ;;  %v1373_v49 = vsel %vm374_vm0, %v4632_v40, 0  ;;  %v256_v52 = vld [vmem:[%s5039_s8 + $0x168] sm:$0xff] }
  0x25   : > { %4462 = vmatmul.msk.bf16.gmra.mxu2 %vm325_vm1, %v5069_v31  ;;  %v5193_v35 = vpack.c.bf16 %v239_v27, %v238_v26  ;;  %v4779_v41 = vld [vmem:[%s6706_s1 + $0x10] sm:$0x3]  ;;  %1382 = vmatpush.bf16.msrb.mxu1 %v1373_v49  ;;  %v240_v58 = vld [vmem:[%s5039_s8 + $0xa8] sm:$0xff]  ;;  %v4600_v6 = vld [vmem:[%s5039_s8 + $0x1a] sm:$0xff] }
  0x26   : > { %4478 = vmatmul.msk.bf16.gmra.mxu3 %vm325_vm1, %v5071_v32  ;;  %v289_v46 = vld [vmem:[%s5039_s8 + $0xa9] sm:$0xff]  ;;  %v290_v47 = vld [vmem:[%s5039_s8 + $0xb1] sm:$0xff]  ;;  %v2040_v50 = vsel %vm374_vm0, %v4779_v41, 0  ;;  %v4603_v26 = vld [vmem:[%s5039_s8 + $0x3a] sm:$0xff] }
  0x27   : > { %4470 = vmatmul.msk.bf16.gmra.mxu1 %vm325_vm1, %v5073_v33  ;;  %v305_v48 = vld [vmem:[%s5039_s8 + $0x169] sm:$0xff]  ;;  %v306_v51 = vld [vmem:[%s5039_s8 + $0x171] sm:$0xff]  ;;  %2049 = vmatpush.bf16.msra.mxu0 %v2040_v50  ;;  %v5227_v60 = vpack.c.bf16 %v290_v47, %v289_v46 }
  0x28   : > { %v257_v53 = vld [vmem:[%s5039_s8 + $0x170] sm:$0xff]  ;;  %v5229_v61 = vpack.c.bf16 %v306_v51, %v305_v48  ;;  %v607_v0 = vld [vmem:[%s5039_s8 + $0x2] sm:$0xff] }
  0x29   : > { %v241_v59 = vld [vmem:[%s5039_s8 + $0xb0] sm:$0xff]  ;;  %v5231_v62 = vpack.c.bf16 %v257_v53, %v256_v52  ;;  %v4601_v7 = vld [vmem:[%s5039_s8 + $0x22] sm:$0xff] }
  0x2a   : > { %v5233_v63 = vpack.c.bf16 %v241_v59, %v240_v58  ;;  %v608_v1 = vld [vmem:[%s5039_s8 + $0xa] sm:$0xff]  ;;  %v1306_v10 = vpack.c.bf16 %v4601_v7, %v4600_v6  ;;  %v4602_v25 = vld [vmem:[%s5039_s8 + $0x32] sm:$0xff] }
  0x2b   : > { %v639_v9 = vpack.c.bf16 %v608_v1, %v607_v0  ;;  %v4604_v50 = vld [vmem:[%s5039_s8 + $0x4a] sm:$0xff]  ;;  %v4605_v51 = vld [vmem:[%s5039_s8 + $0x52] sm:$0xff] }
  0x2c   : > { %v5282_v58 = vpack.c.bf16 %v4605_v51, %v4604_v50 }
  0x34   : > { %4455 = vmatmul.msk.bf16.gmra.mxu0 %vm325_vm1, %v5091_v42 }
  0x35   : > { %4463 = vmatmul.msk.bf16.gmra.mxu2 %vm325_vm1, %v5093_v43 }
  0x36   : > { %4479 = vmatmul.msk.bf16.gmra.mxu3 %vm325_vm1, %v5095_v44 }
  0x37   : > { %4471 = vmatmul.msk.bf16.gmra.mxu1 %vm325_vm1, %v5097_v45 }
  0x44   : > { %4456 = vmatmul.msk.bf16.gmra.mxu0 %vm325_vm1, %v5115_v54 }
  0x45   : > { %4464 = vmatmul.msk.bf16.gmra.mxu2 %vm325_vm1, %v5117_v55 }
  0x46   : > { %4480 = vmatmul.msk.bf16.gmra.mxu3 %vm325_vm1, %v5119_v56 }
  0x47   : > { %4472 = vmatmul.msk.bf16.gmra.mxu1 %vm325_vm1, %v5121_v57 }
  0x54   : > { %4457 = vmatmul.msk.bf16.gmra.mxu0 %vm325_vm1, %v5139_v2 }
  0x55   : > { %4465 = vmatmul.msk.bf16.gmra.mxu2 %vm325_vm1, %v5141_v3 }
  0x56   : > { %4481 = vmatmul.msk.bf16.gmra.mxu3 %vm325_vm1, %v5143_v4 }
  0x57   : > { %4473 = vmatmul.msk.bf16.gmra.mxu1 %vm325_vm1, %v5145_v5 }
  0x64   : > { %4458 = vmatmul.msk.bf16.gmra.mxu0 %vm325_vm1, %v5163_v14 }
  0x65   : > { %4466 = vmatmul.msk.bf16.gmra.mxu2 %vm325_vm1, %v5165_v15 }
  0x66   : > { %4482 = vmatmul.msk.bf16.gmra.mxu3 %vm325_vm1, %v5167_v16 }
  0x67   : > { %4474 = vmatmul.msk.bf16.gmra.mxu1 %vm325_vm1, %v5169_v19 }
  0x74   : > { %4459 = vmatmul.msk.bf16.gmra.mxu0 %vm325_vm1, %v5187_v28 }
  0x75   : > { %4467 = vmatmul.msk.bf16.gmra.mxu2 %vm325_vm1, %v5189_v29 }
  0x76   : > { %4483 = vmatmul.msk.bf16.gmra.mxu3 %vm325_vm1, %v5191_v34 }
  0x77   : > { %4475 = vmatmul.msk.bf16.gmra.mxu1 %vm325_vm1, %v5193_v35 }
  0x84   : > { %4460 = vmatmul.msk.bf16.gmra.mxu0 %vm325_vm1, %v5227_v60 }
  0x85   : > { %4468 = vmatmul.msk.bf16.gmra.mxu2 %vm325_vm1, %v5229_v61 }
  0x86   : > { %4484 = vmatmul.msk.bf16.gmra.mxu3 %vm325_vm1, %v5231_v62 }
  0x87   : > { %4476 = vmatmul.msk.bf16.gmra.mxu1 %vm325_vm1, %v5233_v63 }
  0x91   : > { %v387_v8 = vpop.f32.mrf.mxu0 }
  0x94   : > { %v527_v11 = vpop.f32.mrf.mxu1  ;;  %4584 = vmatmul.msk.bf16.vlgmr.msrb.gmra.mxu0 %vm325_vm1, %v5067_v30 }
  0x95   : > { %v5247_v12 = vadd.f32 %v527_v11, %v387_v8  ;;  %4486 = vmatmul.msk.bf16.vlgmr.msrb.gmra.mxu2 %vm325_vm1, %v639_v9  ;;  %v4606_v11 = vld [vmem:[%s5039_s8 + $0x62] sm:$0xff] }
  0x96   : > { %4535 = vmatmul.msk.bf16.vlgmr.msrb.gmra.mxu3 %vm325_vm1, %v5073_v33  ;;  %v5263_v33 = vpack.c.bf16 %v4603_v26, %v4602_v25 }
  0x97   : > { %4633 = vmatmul.msk.bf16.vlgmr.msrb.gmra.mxu1 %vm325_vm1, %v1306_v10 }
  0x98   : > { %v427_v13 = vpop.f32.mrf.mxu2 }
  0x99   : > { %v567_v20 = vpop.f32.mrf.mxu3  ;;  %v389_v22 = vpop.f32.mrf.mxu0 }
  0x9a   : > { %v5255_v21 = vadd.f32 %v567_v20, %v427_v13  ;;  %v4607_v13 = vld [vmem:[%s5039_s8 + $0x6a] sm:$0xff] }
  0x9c   : > { %v529_v23 = vpop.f32.mrf.mxu1 }
  0x9d   : > { %v5257_v24 = vadd.f32 %v529_v23, %v389_v22  ;;  %v5302_v23 = vpack.c.bf16 %v4607_v13, %v4606_v11  ;;  %v4610_v13 = vld [vmem:[%s5039_s8 + $0x92] sm:$0xff] }
  0xa0   : > { %v429_v27 = vpop.f32.mrf.mxu2 }
  0xa1   : > { %v569_v36 = vpop.f32.mrf.mxu3  ;;  %v392_v37 = vpop.f32.mrf.mxu0 }
  0xa2   : > { %v5261_v30 = vadd.f32 %v569_v36, %v429_v27 }
  0xa4   : > { %v532_v38 = vpop.f32.mrf.mxu1  ;;  %4585 = vmatmul.msk.bf16.gmra.mxu0 %vm325_vm1, %v5091_v42 }
  0xa5   : > { %v5265_v39 = vadd.f32 %v532_v38, %v392_v37  ;;  %4487 = vmatmul.msk.bf16.gmra.mxu2 %vm325_vm1, %v1306_v10 }
  0xa6   : > { %4536 = vmatmul.msk.bf16.gmra.mxu3 %vm325_vm1, %v5097_v45 }
  0xa7   : > { %4634 = vmatmul.msk.bf16.gmra.mxu1 %vm325_vm1, %v5263_v33 }
  0xa8   : > { %v432_v40 = vpop.f32.mrf.mxu2 }
  0xa9   : > { %v572_v41 = vpop.f32.mrf.mxu3  ;;  %v394_v47 = vpop.f32.mrf.mxu0 }
  0xaa   : > { %v5274_v46 = vadd.f32 %v572_v41, %v432_v40 }
  0xac   : > { %v534_v48 = vpop.f32.mrf.mxu1 }
  0xad   : > { %v5276_v49 = vadd.f32 %v534_v48, %v394_v47  ;;  %v4608_v47 = vld [vmem:[%s5039_s8 + $0x7a] sm:$0xff]  ;;  %v4609_v48 = vld [vmem:[%s5039_s8 + $0x82] sm:$0xff] }
  0xb0   : > { %v434_v52 = vpop.f32.mrf.mxu2 }
  0xb1   : > { %v574_v42 = vpop.f32.mrf.mxu3  ;;  %v397_v45 = vpop.f32.mrf.mxu0 }
  0xb2   : > { %v5280_v53 = vadd.f32 %v574_v42, %v434_v52  ;;  %v5322_v52 = vpack.c.bf16 %v4609_v48, %v4608_v47 }
  0xb4   : > { %v537_v59 = vpop.f32.mrf.mxu1  ;;  %4586 = vmatmul.msk.bf16.gmra.mxu0 %vm325_vm1, %v5115_v54 }
  0xb5   : > { %v5284_v0 = vadd.f32 %v537_v59, %v397_v45  ;;  %4488 = vmatmul.msk.bf16.gmra.mxu2 %vm325_vm1, %v5263_v33 }
  0xb6   : > { %4537 = vmatmul.msk.bf16.gmra.mxu3 %vm325_vm1, %v5121_v57 }
  0xb7   : > { %4635 = vmatmul.msk.bf16.gmra.mxu1 %vm325_vm1, %v5282_v58 }
  0xb8   : > { %v437_v1 = vpop.f32.mrf.mxu2 }
  0xb9   : > { %v577_v6 = vpop.f32.mrf.mxu3  ;;  %v399_v8 = vpop.f32.mrf.mxu0 }
  0xba   : > { %v5294_v7 = vadd.f32 %v577_v6, %v437_v1 }
  0xbc   : > { %v539_v9 = vpop.f32.mrf.mxu1 }
  0xbd   : > { %v5296_v10 = vadd.f32 %v539_v9, %v399_v8 }
  0xc0   : > { %v439_v54 = vpop.f32.mrf.mxu2 }
  0xc1   : > { %v579_v20 = vpop.f32.mrf.mxu3  ;;  %v402_v57 = vpop.f32.mrf.mxu0 }
  0xc2   : > { %v5300_v22 = vadd.f32 %v579_v20, %v439_v54  ;;  %v4611_v54 = vld [vmem:[%s5039_s8 + $0x9a] sm:$0xff] }
  0xc4   : > { %v542_v25 = vpop.f32.mrf.mxu1  ;;  %4587 = vmatmul.msk.bf16.gmra.mxu0 %vm325_vm1, %v5139_v2 }
  0xc5   : > { %v5304_v26 = vadd.f32 %v542_v25, %v402_v57  ;;  %4489 = vmatmul.msk.bf16.gmra.mxu2 %vm325_vm1, %v5282_v58  ;;  %v5342_v25 = vpack.c.bf16 %v4611_v54, %v4610_v13 }
  0xc6   : > { %4538 = vmatmul.msk.bf16.gmra.mxu3 %vm325_vm1, %v5145_v5 }
  0xc7   : > { %4636 = vmatmul.msk.bf16.gmra.mxu1 %vm325_vm1, %v5302_v23 }
  0xc8   : > { %v442_v27 = vpop.f32.mrf.mxu2 }
  0xc9   : > { %v582_v36 = vpop.f32.mrf.mxu3  ;;  %v404_v38 = vpop.f32.mrf.mxu0 }
  0xca   : > { %v5314_v37 = vadd.f32 %v582_v36, %v442_v27 }
  0xcc   : > { %v544_v40 = vpop.f32.mrf.mxu1 }
  0xcd   : > { %v5316_v41 = vadd.f32 %v544_v40, %v404_v38 }
  0xd0   : > { %v444_v2 = vpop.f32.mrf.mxu2 }
  0xd1   : > { %v584_v50 = vpop.f32.mrf.mxu3  ;;  %v407_v5 = vpop.f32.mrf.mxu0 }
  0xd2   : > { %v5320_v51 = vadd.f32 %v584_v50, %v444_v2 }
  0xd4   : > { %v547_v42 = vpop.f32.mrf.mxu1  ;;  %4588 = vmatmul.msk.bf16.gmra.mxu0 %vm325_vm1, %v5163_v14 }
  0xd5   : > { %v5324_v45 = vadd.f32 %v547_v42, %v407_v5  ;;  %4490 = vmatmul.msk.bf16.gmra.mxu2 %vm325_vm1, %v5302_v23  ;;  %v4612_v5 = vld [vmem:[%s5039_s8 + $0xaa] sm:$0xff]  ;;  %v4613_v42 = vld [vmem:[%s5039_s8 + $0xb2] sm:$0xff] }
  0xd6   : > { %4539 = vmatmul.msk.bf16.gmra.mxu3 %vm325_vm1, %v5169_v19 }
  0xd7   : > { %4637 = vmatmul.msk.bf16.gmra.mxu1 %vm325_vm1, %v5322_v52 }
  0xd8   : > { %v447_v59 = vpop.f32.mrf.mxu2 }
  0xd9   : > { %v587_v1 = vpop.f32.mrf.mxu3  ;;  %v409_v8 = vpop.f32.mrf.mxu0 }
  0xda   : > { %v5334_v6 = vadd.f32 %v587_v1, %v447_v59 }
  0xdc   : > { %v549_v9 = vpop.f32.mrf.mxu1 }
  0xdd   : > { %v5336_v11 = vadd.f32 %v549_v9, %v409_v8  ;;  %v5362_v8 = vpack.c.bf16 %v4613_v42, %v4612_v5 }
  0xe0   : > { %v449_v14 = vpop.f32.mrf.mxu2 }
  0xe1   : > { %v589_v20 = vpop.f32.mrf.mxu3  ;;  %v412_v19 = vpop.f32.mrf.mxu0 }
  0xe2   : > { %v5340_v57 = vadd.f32 %v589_v20, %v449_v14 }
  0xe4   : > { %v552_v27 = vpop.f32.mrf.mxu1  ;;  %4589 = vmatmul.msk.bf16.gmra.mxu0 %vm325_vm1, %v5187_v28 }
  0xe5   : > { %v5344_v36 = vadd.f32 %v552_v27, %v412_v19  ;;  %4491 = vmatmul.msk.bf16.gmra.mxu2 %vm325_vm1, %v5322_v52 }
  0xe6   : > { %4540 = vmatmul.msk.bf16.gmra.mxu3 %vm325_vm1, %v5193_v35 }
  0xe7   : > { %4638 = vmatmul.msk.bf16.gmra.mxu1 %vm325_vm1, %v5342_v25 }
  0xe8   : > { %v452_v38 = vpop.f32.mrf.mxu2 }
  0xe9   : > { %v592_v40 = vpop.f32.mrf.mxu3  ;;  %v414_v48 = vpop.f32.mrf.mxu0 }
  0xea   : > { %v5354_v47 = vadd.f32 %v592_v40, %v452_v38  ;;  %v4614_v40 = vld [vmem:[%s5039_s8 + $0xc2] sm:$0xff] }
  0xec   : > { %6732 = vst [vmem:[#allocation3_spill] sm:$0xff] %v5354_v47  ;;  %v554_v2 = vpop.f32.mrf.mxu1 }
  0xed   : > { %v5356_v50 = vadd.f32 %v554_v2, %v414_v48  ;;  %v4615_v48 = vld [vmem:[%s5039_s8 + $0xca] sm:$0xff] }
  0xf0   : > { %v454_v28 = vpop.f32.mrf.mxu2 }
  0xf1   : > { %v594_v59 = vpop.f32.mrf.mxu3  ;;  %v417_v35 = vpop.f32.mrf.mxu0 }
  0xf2   : > { %v5360_v1 = vadd.f32 %v594_v59, %v454_v28  ;;  %v5382_v28 = vpack.c.bf16 %v4615_v48, %v4614_v40  ;;  %v4617_v48 = vld [vmem:[%s5039_s8 + $0xe2] sm:$0xff] }
  0xf4   : > { %6733 = vst [vmem:[#allocation4_spill] sm:$0xff] %v5360_v1  ;;  %v557_v9 = vpop.f32.mrf.mxu1  ;;  %4590 = vmatmul.msk.bf16.gmra.mxu0 %vm325_vm1, %v5227_v60 }
  0xf5   : > { %v5364_v13 = vadd.f32 %v557_v9, %v417_v35  ;;  %4492 = vmatmul.msk.bf16.gmra.mxu2 %vm325_vm1, %v5342_v25  ;;  %6736 = vst [vmem:[#allocation7_spill] sm:$0xff] %v5382_v28  ;;  %v4796_v35 = vld [vmem:[%s6708_s3 + $0x4] sm:$0xf] }
  0xf6   : > { %4541 = vmatmul.msk.bf16.gmra.mxu3 %vm325_vm1, %v5233_v63  ;;  %v2469_v9 = vsel %vm2467_vm2, %v4796_v35, 0 }
  0xf7   : > { %4639 = vmatmul.msk.bf16.gmra.mxu1 %vm325_vm1, %v5362_v8 }
  0xf8   : > { %v457_v54 = vpop.f32.mrf.mxu2  ;;  %2478 = vmatpush.bf16.msra.mxu1 %v2469_v9 }
  0xf9   : > { %v597_v14 = vpop.f32.mrf.mxu3  ;;  %v419_v19 = vpop.f32.mrf.mxu0 }
  0xfa   : > { %v5374_v20 = vadd.f32 %v597_v14, %v457_v54 }
  0xfc   : > { %6734 = vst [vmem:[#allocation5_spill] sm:$0xff] %v5374_v20  ;;  %v559_v27 = vpop.f32.mrf.mxu1 }
  0xfd   : > { %v5376_v38 = vadd.f32 %v559_v27, %v419_v19 }
 0x100   : > { %v459_v60 = vpop.f32.mrf.mxu2 }
 0x101   : > { %v599_v2 = vpop.f32.mrf.mxu3  ;;  %v422_v42 = vpop.f32.mrf.mxu0 }
 0x102   : > { %v5380_v5 = vadd.f32 %v599_v2, %v459_v60 }
 0x104   : > { %6735 = vst [vmem:[#allocation6_spill] sm:$0xff] %v5380_v5  ;;  %v562_v63 = vpop.f32.mrf.mxu1  ;;  %4591 = vmatmul.msk.bf16.gmra.mxu0 %vm325_vm1, %v5047_v17 }
 0x105   : > { %v5384_v59 = vadd.f32 %v562_v63, %v422_v42  ;;  %4493 = vmatmul.msk.bf16.gmra.mxu2 %vm325_vm1, %v5362_v8 }
 0x106   : > { %4542 = vmatmul.msk.bf16.gmra.mxu3 %vm325_vm1, %v5049_v18  ;;  %v4616_v18 = vld [vmem:[%s5039_s8 + $0xda] sm:$0xff] }
 0x107   : > { %4640 = vmatmul.msk.bf16.gmra.mxu1 %vm325_vm1, %v5382_v28  ;;  %v5406_v5 = vpack.c.bf16 %v4617_v48, %v4616_v18 }
 0x108   : > { %v462_v54 = vpop.f32.mrf.mxu2 }
 0x109   : > { %v602_v14 = vpop.f32.mrf.mxu3  ;;  %v424_v19 = vpop.f32.mrf.mxu0 }
 0x10a   : > { %v5398_v17 = vadd.f32 %v602_v14, %v462_v54 }
 0x10c   : > { %6737 = vst [vmem:[#allocation8_spill] sm:$0xff] %v5398_v17  ;;  %v564_v27 = vpop.f32.mrf.mxu1 }
 0x10d   : > { %v5400_v40 = vadd.f32 %v564_v27, %v424_v19 }
 0x110   : > { %v464_v60 = vpop.f32.mrf.mxu2 }
 0x111   : > { %v604_v2 = vpop.f32.mrf.mxu3  ;;  %v1162_v63 = vpop.f32.mrf.mxu0 }
 0x112   : > { %v5404_v42 = vadd.f32 %v604_v2, %v464_v60  ;;  %v4619_v2 = vld [vmem:[%s5039_s8 + $0xfa] sm:$0xff] }
 0x114   : > { %6738 = vst [vmem:[#allocation9_spill] sm:$0xff] %v5404_v42  ;;  %v1384_v35 = vpop.f32.mrf.mxu1  ;;  %4592 = vmatmul.msk.bf16.gmra.mxu0 %vm325_vm1, %v5069_v31  ;;  %v4618_v31 = vld [vmem:[%s5039_s8 + $0xf2] sm:$0xff] }
 0x115   : > { %4494 = vmatmul.msk.bf16.gmra.mxu2 %vm325_vm1, %v5382_v28  ;;  %v5422_v28 = vpack.c.bf16 %v4619_v2, %v4618_v31 }
 0x116   : > { %4543 = vmatmul.msk.bf16.gmra.mxu3 %vm325_vm1, %v5071_v32 }
 0x117   : > { %4641 = vmatmul.msk.bf16.gmra.mxu1 %vm325_vm1, %v5406_v5 }
 0x118   : > { %v717_v9 = vpop.f32.mrf.mxu2 }
 0x119   : > { %v940_v54 = vpop.f32.mrf.mxu3  ;;  %v797_v14 = vadd.f32 %v717_v9, %v5247_v12  ;;  %v1164_v19 = vpop.f32.mrf.mxu0 }
 0x11b   : > { %v1020_v27 = vadd.f32 %v940_v54, %v797_v14  ;;  %v4620_v14 = vld [vmem:[%s5039_s8 + $0x10a] sm:$0xff] }
 0x11c   : > { %v1386_v18 = vpop.f32.mrf.mxu1 }
 0x11d   : > { %v1242_v48 = vadd.f32 %v1162_v63, %v1020_v27  ;;  %v4621_v27 = vld [vmem:[%s5039_s8 + $0x112] sm:$0xff] }
 0x11e   : > { %v5440_v31 = vpack.c.bf16 %v4621_v27, %v4620_v14  ;;  %v4623_v14 = vld [vmem:[%s5039_s8 + $0x12a] sm:$0xff] }
 0x11f   : > { %v5417_v60 = vadd.f32 %v1384_v35, %v1242_v48 }
 0x120   : > { %v719_v42 = vpop.f32.mrf.mxu2 }
 0x121   : > { %v942_v17 = vpop.f32.mrf.mxu3  ;;  %v798_v20 = vadd.f32 %v719_v42, %v5257_v24  ;;  %v1167_v32 = vpop.f32.mrf.mxu0 }
 0x123   : > { %v1021_v1 = vadd.f32 %v942_v17, %v798_v20 }
 0x124   : > { %v1389_v47 = vpop.f32.mrf.mxu1  ;;  %4593 = vmatmul.msk.bf16.gmra.mxu0 %vm325_vm1, %v5093_v43 }
 0x125   : > { %4495 = vmatmul.msk.bf16.gmra.mxu2 %vm325_vm1, %v5406_v5  ;;  %v1243_v12 = vadd.f32 %v1164_v19, %v1021_v1 }
 0x126   : > { %4544 = vmatmul.msk.bf16.gmra.mxu3 %vm325_vm1, %v5095_v44 }
 0x127   : > { %4642 = vmatmul.msk.bf16.gmra.mxu1 %vm325_vm1, %v5422_v28  ;;  %v5432_v24 = vadd.f32 %v1386_v18, %v1243_v12 }
 0x128   : > { %v722_v42 = vpop.f32.mrf.mxu2 }
 0x129   : > { %v945_v20 = vpop.f32.mrf.mxu3  ;;  %v799_v17 = vadd.f32 %v722_v42, %v5265_v39  ;;  %v1169_v63 = vpop.f32.mrf.mxu0 }
 0x12b   : > { %v1022_v35 = vadd.f32 %v945_v20, %v799_v17 }
 0x12c   : > { %v1391_v9 = vpop.f32.mrf.mxu1 }
 0x12d   : > { %v1244_v43 = vadd.f32 %v1167_v32, %v1022_v35 }
 0x12f   : > { %v5435_v54 = vadd.f32 %v1389_v47, %v1244_v43  ;;  %v4622_v43 = vld [vmem:[%s5039_s8 + $0x122] sm:$0xff] }
 0x130   : > { %v724_v48 = vpop.f32.mrf.mxu2 }
 0x131   : > { %v947_v44 = vpop.f32.mrf.mxu3  ;;  %v800_v1 = vadd.f32 %v724_v48, %v5276_v49  ;;  %v1172_v19 = vpop.f32.mrf.mxu0 }
 0x133   : > { %v1023_v18 = vadd.f32 %v947_v44, %v800_v1  ;;  %v5458_v44 = vpack.c.bf16 %v4623_v14, %v4622_v43 }
 0x134   : > { %v1394_v2 = vpop.f32.mrf.mxu1  ;;  %4594 = vmatmul.msk.bf16.gmra.mxu0 %vm325_vm1, %v5117_v55 }
 0x135   : > { %4496 = vmatmul.msk.bf16.gmra.mxu2 %vm325_vm1, %v5422_v28  ;;  %v1245_v39 = vadd.f32 %v1169_v63, %v1023_v18 }
 0x136   : > { %4545 = vmatmul.msk.bf16.gmra.mxu3 %vm325_vm1, %v5119_v56 }
 0x137   : > { %4643 = vmatmul.msk.bf16.gmra.mxu1 %vm325_vm1, %v5440_v31  ;;  %v5450_v49 = vadd.f32 %v1391_v9, %v1245_v39 }
 0x138   : > { %v727_v47 = vpop.f32.mrf.mxu2 }
 0x139   : > { %v950_v32 = vpop.f32.mrf.mxu3  ;;  %v801_v12 = vadd.f32 %v727_v47, %v5284_v0  ;;  %v1174_v42 = vpop.f32.mrf.mxu0 }
 0x13b   : > { %v1024_v20 = vadd.f32 %v950_v32, %v801_v12 }
 0x13c   : > { %v1396_v17 = vpop.f32.mrf.mxu1 }
 0x13d   : > { %v1246_v55 = vadd.f32 %v1172_v19, %v1024_v20  ;;  %v4624_v20 = vld [vmem:[%s5039_s8 + $0x13a] sm:$0xff] }
 0x13f   : > { %v5453_v35 = vadd.f32 %v1394_v2, %v1246_v55  ;;  %v4625_v55 = vld [vmem:[%s5039_s8 + $0x142] sm:$0xff] }
 0x140   : > { %v729_v27 = vpop.f32.mrf.mxu2 }
 0x141   : > { %v952_v56 = vpop.f32.mrf.mxu3  ;;  %v802_v63 = vadd.f32 %v729_v27, %v5296_v10  ;;  %v1177_v48 = vpop.f32.mrf.mxu0  ;;  %v5476_v27 = vpack.c.bf16 %v4625_v55, %v4624_v20 }
 0x143   : > { %v1025_v9 = vadd.f32 %v952_v56, %v802_v63 }
 0x144   : > { %v1399_v1 = vpop.f32.mrf.mxu1  ;;  %4595 = vmatmul.msk.bf16.gmra.mxu0 %vm325_vm1, %v5141_v3 }
 0x145   : > { %4497 = vmatmul.msk.bf16.gmra.mxu2 %vm325_vm1, %v5440_v31  ;;  %v1247_v0 = vadd.f32 %v1174_v42, %v1025_v9 }
 0x146   : > { %4546 = vmatmul.msk.bf16.gmra.mxu3 %vm325_vm1, %v5143_v4 }
 0x147   : > { %4644 = vmatmul.msk.bf16.gmra.mxu1 %vm325_vm1, %v5458_v44  ;;  %v5468_v10 = vadd.f32 %v1396_v17, %v1247_v0 }
 0x148   : > { %v732_v19 = vpop.f32.mrf.mxu2 }
 0x149   : > { %v955_v18 = vpop.f32.mrf.mxu3  ;;  %v803_v2 = vadd.f32 %v732_v19, %v5304_v26  ;;  %v1179_v39 = vpop.f32.mrf.mxu0 }
 0x14b   : > { %v1026_v47 = vadd.f32 %v955_v18, %v803_v2  ;;  %v4626_v2 = vld [vmem:[%s5039_s8 + $0x152] sm:$0xff] }
 0x14c   : > { %v1401_v32 = vpop.f32.mrf.mxu1 }
 0x14d   : > { %v1248_v3 = vadd.f32 %v1177_v48, %v1026_v47  ;;  %v4627_v47 = vld [vmem:[%s5039_s8 + $0x15a] sm:$0xff] }
 0x14f   : > { %v5471_v12 = vadd.f32 %v1399_v1, %v1248_v3 }
 0x150   : > { %v734_v43 = vpop.f32.mrf.mxu2 }
 0x151   : > { %v957_v4 = vpop.f32.mrf.mxu3  ;;  %v804_v42 = vadd.f32 %v734_v43, %v5316_v41  ;;  %v1182_v14 = vpop.f32.mrf.mxu0 }
 0x153   : > { %v1027_v17 = vadd.f32 %v957_v4, %v804_v42 }
 0x154   : > { %v1404_v56 = vpop.f32.mrf.mxu1  ;;  %4596 = vmatmul.msk.bf16.gmra.mxu0 %vm325_vm1, %v5165_v15 }
 0x155   : > { %4498 = vmatmul.msk.bf16.gmra.mxu2 %vm325_vm1, %v5458_v44  ;;  %v1249_v26 = vadd.f32 %v1179_v39, %v1027_v17 }
 0x156   : > { %4547 = vmatmul.msk.bf16.gmra.mxu3 %vm325_vm1, %v5167_v16 }
 0x157   : > { %4645 = vmatmul.msk.bf16.gmra.mxu1 %vm325_vm1, %v5476_v27  ;;  %v5486_v41 = vadd.f32 %v1401_v32, %v1249_v26  ;;  %v5496_v32 = vpack.c.bf16 %v4627_v47, %v4626_v2 }
 0x158   : > { %v737_v63 = vpop.f32.mrf.mxu2 }
 0x159   : > { %v960_v48 = vpop.f32.mrf.mxu3  ;;  %v805_v9 = vadd.f32 %v737_v63, %v5324_v45  ;;  %v1184_v1 = vpop.f32.mrf.mxu0  ;;  %v4628_v63 = vld [vmem:[%s5039_s8 + $0x16a] sm:$0xff] }
 0x15b   : > { %v1028_v0 = vadd.f32 %v960_v48, %v805_v9  ;;  %v4629_v48 = vld [vmem:[%s5039_s8 + $0x172] sm:$0xff] }
 0x15c   : > { %v5489_v19 = vpop.f32.mrf.mxu1 }
 0x15d   : > { %v1250_v15 = vadd.f32 %v1182_v14, %v1028_v0 }
 0x15f   : > { %v5491_v18 = vadd.f32 %v1404_v56, %v1250_v15  ;;  %v5516_v15 = vpack.c.bf16 %v4629_v48, %v4628_v63 }
 0x160   : > { %v739_v16 = vpop.f32.mrf.mxu2 }
 0x161   : > { %v962_v39 = vpop.f32.mrf.mxu3  ;;  %v806_v3 = vadd.f32 %v739_v16, %v5336_v11  ;;  %v1187_v20 = vpop.f32.mrf.mxu0 }
 0x163   : > { %v1029_v55 = vadd.f32 %v962_v39, %v806_v3 }
 0x164   : > { %v1409_v45 = vpop.f32.mrf.mxu1  ;;  %4597 = vmatmul.msk.bf16.gmra.mxu0 %vm325_vm1, %v5189_v29 }
 0x165   : > { %4499 = vmatmul.msk.bf16.gmra.mxu2 %vm325_vm1, %v5476_v27  ;;  %v5504_v43 = vadd.f32 %v1184_v1, %v1029_v55 }
 0x166   : > { %4548 = vmatmul.msk.bf16.gmra.mxu3 %vm325_vm1, %v5191_v34 }
 0x167   : > { %4646 = vmatmul.msk.bf16.gmra.mxu1 %vm325_vm1, %v5496_v32 }
 0x168   : > { %v742_v11 = vpop.f32.mrf.mxu2 }
 0x169   : > { %v965_v4 = vpop.f32.mrf.mxu3  ;;  %v807_v42 = vadd.f32 %v742_v11, %v5344_v36  ;;  %v1189_v14 = vpop.f32.mrf.mxu0  ;;  %v4582_v11 = vld [vmem:[%s5039_s8 + $0x189] sm:$0xff] }
 0x16b   : > { %v1030_v17 = vadd.f32 %v965_v4, %v807_v42  ;;  %v4532_v4 = vld [vmem:[%s5039_s8 + $0x180] sm:$0xff]  ;;  %v4533_v42 = vld [vmem:[%s5039_s8 + $0x188] sm:$0xff] }
 0x16c   : > { %v5509_v56 = vpop.f32.mrf.mxu1 }
 0x16d   : > { %v1252_v29 = vadd.f32 %v1187_v20, %v1030_v17  ;;  %v4631_v17 = vld [vmem:[%s5039_s8 + $0x18a] sm:$0xff] }
 0x16f   : > { %v5511_v26 = vadd.f32 %v1409_v45, %v1252_v29  ;;  %v4581_v45 = vld [vmem:[%s5039_s8 + $0x181] sm:$0xff] }
 0x170   : > { %v744_v9 = vpop.f32.mrf.mxu2  ;;  %v1099_v48 = vpack.c.bf16 %v4582_v11, %v4581_v45  ;;  %v4649_v11 = vld [vmem:[%s5039_s8 + $0x30] sm:$0xff] }
 0x171   : > { %v967_v34 = vpop.f32.mrf.mxu3  ;;  %v808_v1 = vadd.f32 %v744_v9, %v5356_v50  ;;  %v1192_v0 = vpop.f32.mrf.mxu0 }
 0x173   : > { %v1031_v2 = vadd.f32 %v967_v34, %v808_v1 }
 0x174   : > { %v1414_v36 = vpop.f32.mrf.mxu1  ;;  %4598 = vmatmul.msk.bf16.gmra.mxu0 %vm325_vm1, %v5229_v61 }
 0x175   : > { %4500 = vmatmul.msk.bf16.gmra.mxu2 %vm325_vm1, %v5496_v32  ;;  %v5524_v50 = vadd.f32 %v1189_v14, %v1031_v2  ;;  %v4630_v14 = vld [vmem:[%s5039_s8 + $0x182] sm:$0xff] }
 0x176   : > { %4549 = vmatmul.msk.bf16.gmra.mxu3 %vm325_vm1, %v5231_v62  ;;  %v5540_v1 = vpack.c.bf16 %v4631_v17, %v4630_v14  ;;  %v4699_v14 = vld [vmem:[%s5039_s8 + $0x39] sm:$0xff] }
 0x177   : > { %4647 = vmatmul.msk.bf16.gmra.mxu1 %vm325_vm1, %v5516_v15 }
 0x178   : > { %v747_v47 = vpop.f32.mrf.mxu2 }
 0x179   : > { %v970_v16 = vpop.f32.mrf.mxu3  ;;  %v809_v39 = vadd.f32 %v747_v47, %v5364_v13  ;;  %v1194_v3 = vpop.f32.mrf.mxu0  ;;  %v877_v13 = vpack.c.bf16 %v4533_v42, %v4532_v4  ;;  %v4650_v4 = vld [vmem:[%s5039_s8 + $0x38] sm:$0xff] }
 0x17a   : > { %v4698_v42 = vld [vmem:[%s5039_s8 + $0x31] sm:$0xff] }
 0x17b   : > { %v1032_v20 = vadd.f32 %v970_v16, %v809_v39 }
 0x17c   : > { %v5529_v61 = vpop.f32.mrf.mxu1 }
 0x17d   : > { %v1254_v55 = vadd.f32 %v1192_v0, %v1032_v20 }
 0x17f   : > { %v5535_v62 = vadd.f32 %v1414_v36, %v1254_v55 }
 0x180   : > { %v749_v29 = vpop.f32.mrf.mxu2 }
 0x181   : > { %v972_v63 = vpop.f32.mrf.mxu3  ;;  %v810_v9 = vadd.f32 %v749_v29, %v5376_v38  ;;  %v1197_v34 = vpop.f32.mrf.mxu0 }
 0x183   : > { %v1033_v0 = vadd.f32 %v972_v63, %v810_v9  ;;  %v1529_v9 = vpack.c.bf16 %v4650_v4, %v4649_v11  ;;  %v4651_v11 = vld [vmem:[%s5039_s8 + $0x48] sm:$0xff]  ;;  %v4652_v4 = vld [vmem:[%s5039_s8 + $0x50] sm:$0xff] }
 0x184   : > { %v1419_v2 = vpop.f32.mrf.mxu1  ;;  %4599 = vmatmul.msk.bf16.gmra.mxu0 %vm325_vm1, %v1099_v48 }
 0x185   : > { %4501 = vmatmul.msk.bf16.gmra.mxu2 %vm325_vm1, %v5516_v15  ;;  %v5546_v36 = vadd.f32 %v1194_v3, %v1033_v0 }
 0x186   : > { %4550 = vmatmul.msk.bf16.gmra.mxu3 %vm325_vm1, %v877_v13 }
 0x187   : > { %4648 = vmatmul.msk.bf16.gmra.mxu1 %vm325_vm1, %v5540_v1 }
 0x188   : > { %v752_v38 = vpop.f32.mrf.mxu2 }
 0x189   : > { %v975_v47 = vpop.f32.mrf.mxu3  ;;  %v811_v16 = vadd.f32 %v752_v38, %v5384_v59  ;;  %v1199_v39 = vpop.f32.mrf.mxu0  ;;  %v1751_v59 = vpack.c.bf16 %v4699_v14, %v4698_v42  ;;  %v4700_v42 = vld [vmem:[%s5039_s8 + $0x49] sm:$0xff]  ;;  %v4701_v14 = vld [vmem:[%s5039_s8 + $0x51] sm:$0xff] }
 0x18b   : > { %v1034_v20 = vadd.f32 %v975_v47, %v811_v16 }
 0x18c   : > { %v5551_v55 = vpop.f32.mrf.mxu1 }
 0x18d   : > { %v1256_v45 = vadd.f32 %v1197_v34, %v1034_v20 }
 0x18f   : > { %v5557_v17 = vadd.f32 %v1419_v2, %v1256_v45 }
 0x190   : > { %v754_v3 = vpop.f32.mrf.mxu2 }
 0x191   : > { %v977_v29 = vpop.f32.mrf.mxu3  ;;  %v812_v63 = vadd.f32 %v754_v3, %v5400_v40  ;;  %v1202_v48 = vpop.f32.mrf.mxu0 }
 0x193   : > { %v1035_v13 = vadd.f32 %v977_v29, %v812_v63 }
 0x194   : > { %v1424_v0 = vpop.f32.mrf.mxu1  ;;  %4780 = vmatmul.msk.bf16.vlgmr.msra.gmra.mxu0 %vm325_vm1, %v5263_v33 }
 0x195   : > { %4682 = vmatmul.msk.bf16.vlgmr.msra.gmra.mxu2 %vm325_vm1, %v1529_v9  ;;  %v5564_v34 = vadd.f32 %v1199_v39, %v1035_v13  ;;  %v1530_v9 = vpack.c.bf16 %v4652_v4, %v4651_v11  ;;  %v4653_v11 = vld [vmem:[%s5039_s8 + $0x60] sm:$0xff]  ;;  %v4654_v4 = vld [vmem:[%s5039_s8 + $0x68] sm:$0xff] }
 0x196   : > { %4731 = vmatmul.msk.bf16.vlgmr.msra.gmra.mxu3 %vm325_vm1, %v1751_v59 }
 0x198   : > { %v757_v2 = vpop.f32.mrf.mxu2 }
 0x199   : > { %v980_v40 = vpop.f32.mrf.mxu3  ;;  %v813_v38 = vadd.f32 %v757_v2, %v5255_v21  ;;  %v1204_v47 = vpop.f32.mrf.mxu0  ;;  %v1752_v21 = vpack.c.bf16 %v4701_v14, %v4700_v42  ;;  %v4702_v42 = vld [vmem:[%s5039_s8 + $0x61] sm:$0xff]  ;;  %v4703_v14 = vld [vmem:[%s5039_s8 + $0x69] sm:$0xff] }
 0x19b   : > { %v1036_v16 = vadd.f32 %v980_v40, %v813_v38 }
 0x19c   : > { %v5567_v20 = vpop.f32.mrf.mxu1 }
 0x19d   : > { %v1258_v45 = vadd.f32 %v1202_v48, %v1036_v16 }
 0x19f   : > { %v5573_v33 = vadd.f32 %v1424_v0, %v1258_v45 }
 0x1a0   : > { %v759_v3 = vpop.f32.mrf.mxu2 }
 0x1a1   : > { %v982_v29 = vpop.f32.mrf.mxu3  ;;  %v814_v39 = vadd.f32 %v759_v3, %v5261_v30  ;;  %v1207_v63 = vpop.f32.mrf.mxu0 }
 0x1a3   : > { %v1037_v59 = vadd.f32 %v982_v29, %v814_v39 }
 0x1a4   : > { %v1429_v13 = vpop.f32.mrf.mxu1  ;;  %4781 = vmatmul.msk.bf16.gmra.mxu0 %vm325_vm1, %v5282_v58 }
 0x1a5   : > { %4683 = vmatmul.msk.bf16.gmra.mxu2 %vm325_vm1, %v1530_v9  ;;  %v5580_v48 = vadd.f32 %v1204_v47, %v1037_v59  ;;  %v1531_v9 = vpack.c.bf16 %v4654_v4, %v4653_v11  ;;  %v4655_v11 = vld [vmem:[%s5039_s8 + $0x78] sm:$0xff]  ;;  %v4656_v4 = vld [vmem:[%s5039_s8 + $0x80] sm:$0xff] }
 0x1a6   : > { %4732 = vmatmul.msk.bf16.gmra.mxu3 %vm325_vm1, %v1752_v21 }
 0x1a8   : > { %v762_v0 = vpop.f32.mrf.mxu2 }
 0x1a9   : > { %v985_v30 = vpop.f32.mrf.mxu3  ;;  %v815_v2 = vadd.f32 %v762_v0, %v5274_v46  ;;  %v1209_v40 = vpop.f32.mrf.mxu0  ;;  %v1753_v46 = vpack.c.bf16 %v4703_v14, %v4702_v42  ;;  %v4704_v42 = vld [vmem:[%s5039_s8 + $0x79] sm:$0xff]  ;;  %v4705_v14 = vld [vmem:[%s5039_s8 + $0x81] sm:$0xff] }
 0x1ab   : > { %v1038_v38 = vadd.f32 %v985_v30, %v815_v2 }
 0x1ac   : > { %v5583_v16 = vpop.f32.mrf.mxu1 }
 0x1ad   : > { %v1260_v45 = vadd.f32 %v1207_v63, %v1038_v38 }
 0x1af   : > { %v5589_v58 = vadd.f32 %v1429_v13, %v1260_v45 }
 0x1b0   : > { %v764_v3 = vpop.f32.mrf.mxu2 }
 0x1b1   : > { %v987_v29 = vpop.f32.mrf.mxu3  ;;  %v816_v47 = vadd.f32 %v764_v3, %v5280_v53  ;;  %v1212_v39 = vpop.f32.mrf.mxu0 }
 0x1b3   : > { %v1039_v21 = vadd.f32 %v987_v29, %v816_v47 }
 0x1b4   : > { %v1434_v59 = vpop.f32.mrf.mxu1  ;;  %4782 = vmatmul.msk.bf16.gmra.mxu0 %vm325_vm1, %v5302_v23 }
 0x1b5   : > { %4684 = vmatmul.msk.bf16.gmra.mxu2 %vm325_vm1, %v1531_v9  ;;  %v5596_v63 = vadd.f32 %v1209_v40, %v1039_v21  ;;  %v1532_v9 = vpack.c.bf16 %v4656_v4, %v4655_v11  ;;  %v4657_v11 = vld [vmem:[%s5039_s8 + $0x90] sm:$0xff]  ;;  %v4658_v4 = vld [vmem:[%s5039_s8 + $0x98] sm:$0xff] }
 0x1b6   : > { %4733 = vmatmul.msk.bf16.gmra.mxu3 %vm325_vm1, %v1753_v46 }
 0x1b8   : > { %v767_v13 = vpop.f32.mrf.mxu2 }
 0x1b9   : > { %v990_v53 = vpop.f32.mrf.mxu3  ;;  %v817_v0 = vadd.f32 %v767_v13, %v5294_v7  ;;  %v1214_v30 = vpop.f32.mrf.mxu0  ;;  %v1754_v7 = vpack.c.bf16 %v4705_v14, %v4704_v42  ;;  %v4706_v42 = vld [vmem:[%s5039_s8 + $0x91] sm:$0xff]  ;;  %v4707_v14 = vld [vmem:[%s5039_s8 + $0x99] sm:$0xff] }
 0x1bb   : > { %v1040_v2 = vadd.f32 %v990_v53, %v817_v0 }
 0x1bc   : > { %v5599_v38 = vpop.f32.mrf.mxu1 }
 0x1bd   : > { %v1262_v45 = vadd.f32 %v1212_v39, %v1040_v2 }
 0x1bf   : > { %v5605_v23 = vadd.f32 %v1434_v59, %v1262_v45 }
 0x1c0   : > { %v769_v3 = vpop.f32.mrf.mxu2 }
 0x1c1   : > { %v992_v29 = vpop.f32.mrf.mxu3  ;;  %v818_v40 = vadd.f32 %v769_v3, %v5300_v22  ;;  %v1217_v47 = vpop.f32.mrf.mxu0 }
 0x1c3   : > { %v1041_v46 = vadd.f32 %v992_v29, %v818_v40 }
 0x1c4   : > { %v1439_v21 = vpop.f32.mrf.mxu1  ;;  %4783 = vmatmul.msk.bf16.gmra.mxu0 %vm325_vm1, %v5322_v52 }
 0x1c5   : > { %4685 = vmatmul.msk.bf16.gmra.mxu2 %vm325_vm1, %v1532_v9  ;;  %v5612_v39 = vadd.f32 %v1214_v30, %v1041_v46  ;;  %v1533_v9 = vpack.c.bf16 %v4658_v4, %v4657_v11  ;;  %v4659_v11 = vld [vmem:[%s5039_s8 + $0xa8] sm:$0xff]  ;;  %v4660_v4 = vld [vmem:[%s5039_s8 + $0xb0] sm:$0xff] }
 0x1c6   : > { %4734 = vmatmul.msk.bf16.gmra.mxu3 %vm325_vm1, %v1754_v7 }
 0x1c8   : > { %v772_v59 = vpop.f32.mrf.mxu2 }
 0x1c9   : > { %v995_v22 = vpop.f32.mrf.mxu3  ;;  %v819_v13 = vadd.f32 %v772_v59, %v5314_v37  ;;  %v1219_v53 = vpop.f32.mrf.mxu0  ;;  %v1755_v37 = vpack.c.bf16 %v4707_v14, %v4706_v42  ;;  %v4708_v42 = vld [vmem:[%s5039_s8 + $0xa9] sm:$0xff]  ;;  %v4709_v14 = vld [vmem:[%s5039_s8 + $0xb1] sm:$0xff] }
 0x1cb   : > { %v1042_v0 = vadd.f32 %v995_v22, %v819_v13 }
 0x1cc   : > { %v5615_v2 = vpop.f32.mrf.mxu1 }
 0x1cd   : > { %v1264_v45 = vadd.f32 %v1217_v47, %v1042_v0 }
 0x1cf   : > { %v5621_v52 = vadd.f32 %v1439_v21, %v1264_v45 }
 0x1d0   : > { %v774_v3 = vpop.f32.mrf.mxu2 }
 0x1d1   : > { %v997_v29 = vpop.f32.mrf.mxu3  ;;  %v820_v30 = vadd.f32 %v774_v3, %v5320_v51  ;;  %v1222_v40 = vpop.f32.mrf.mxu0 }
 0x1d3   : > { %v1043_v7 = vadd.f32 %v997_v29, %v820_v30 }
 0x1d4   : > { %v1444_v46 = vpop.f32.mrf.mxu1  ;;  %4784 = vmatmul.msk.bf16.gmra.mxu0 %vm325_vm1, %v5342_v25 }
 0x1d5   : > { %4686 = vmatmul.msk.bf16.gmra.mxu2 %vm325_vm1, %v1533_v9  ;;  %v5628_v47 = vadd.f32 %v1219_v53, %v1043_v7  ;;  %v1534_v9 = vpack.c.bf16 %v4660_v4, %v4659_v11  ;;  %v4661_v11 = vld [vmem:[%s5039_s8 + $0xc0] sm:$0xff] }
 0x1d6   : > { %4735 = vmatmul.msk.bf16.gmra.mxu3 %vm325_vm1, %v1755_v37 }
 0x1d8   : > { %v777_v21 = vpop.f32.mrf.mxu2 }
 0x1d9   : > { %v1000_v51 = vpop.f32.mrf.mxu3  ;;  %v821_v59 = vadd.f32 %v777_v21, %v5334_v6  ;;  %v1224_v22 = vpop.f32.mrf.mxu0  ;;  %v1756_v6 = vpack.c.bf16 %v4709_v14, %v4708_v42  ;;  %v6740_v21 = vld [vmem:[#allocation3_spill] sm:$0xff]  ;;  %v4662_v42 = vld [vmem:[%s5039_s8 + $0xc8] sm:$0xff] }
 0x1da   : > { %v4710_v14 = vld [vmem:[%s5039_s8 + $0xc1] sm:$0xff] }
 0x1db   : > { %v1044_v13 = vadd.f32 %v1000_v51, %v821_v59 }
 0x1dc   : > { %v5631_v0 = vpop.f32.mrf.mxu1 }
 0x1dd   : > { %6739 = vst [vmem:[#allocation10_spill] sm:$0xff] %v5631_v0  ;;  %v1266_v45 = vadd.f32 %v1222_v40, %v1044_v13 }
 0x1df   : > { %v5637_v25 = vadd.f32 %v1444_v46, %v1266_v45 }
 0x1e0   : > { %v779_v3 = vpop.f32.mrf.mxu2 }
 0x1e1   : > { %v1002_v29 = vpop.f32.mrf.mxu3  ;;  %v822_v53 = vadd.f32 %v779_v3, %v5340_v57  ;;  %v1227_v30 = vpop.f32.mrf.mxu0  ;;  %v4711_v3 = vld [vmem:[%s5039_s8 + $0xc9] sm:$0xff] }
 0x1e2   : > { %v1757_v0 = vpack.c.bf16 %v4711_v3, %v4710_v14  ;;  %v4663_v14 = vld [vmem:[%s5039_s8 + $0xd8] sm:$0xff]  ;;  %v4664_v3 = vld [vmem:[%s5039_s8 + $0xe0] sm:$0xff] }
 0x1e3   : > { %v1045_v37 = vadd.f32 %v1002_v29, %v822_v53 }
 0x1e4   : > { %v1449_v7 = vpop.f32.mrf.mxu1  ;;  %4785 = vmatmul.msk.bf16.gmra.mxu0 %vm325_vm1, %v5362_v8 }
 0x1e5   : > { %4687 = vmatmul.msk.bf16.gmra.mxu2 %vm325_vm1, %v1534_v9  ;;  %v5644_v40 = vadd.f32 %v1224_v22, %v1045_v37  ;;  %v6741_v9 = vld [vmem:[#allocation4_spill] sm:$0xff]  ;;  %v1535_v37 = vpack.c.bf16 %v4662_v42, %v4661_v11 }
 0x1e6   : > { %4736 = vmatmul.msk.bf16.gmra.mxu3 %vm325_vm1, %v1756_v6 }
 0x1e8   : > { %v782_v46 = vpop.f32.mrf.mxu2 }
 0x1e9   : > { %v1005_v57 = vpop.f32.mrf.mxu3  ;;  %v823_v51 = vadd.f32 %v782_v46, %v6740_v21  ;;  %v1229_v59 = vpop.f32.mrf.mxu0  ;;  %v4974_v21 = vmov 0.0  }
 0x1ea   : > { %2236 = vst.msk [vmem:[#allocation2 + $0x18] sm:$0xff] %vm2231_vm3, %v4974_v21 }
 0x1eb   : > { %v1046_v13 = vadd.f32 %v1005_v57, %v823_v51  ;;  %2237 = vst.msk [vmem:[#allocation2 + $0x20] sm:$0xff] %vm2231_vm3, %v4974_v21 }
 0x1ec   : > { %v5648_v4 = vpop.f32.mrf.mxu1  ;;  %2232 = vst.msk [vmem:[#allocation2] sm:$0xff] %vm2231_vm3, %v4974_v21 }
 0x1ed   : > { %v1268_v45 = vadd.f32 %v1227_v30, %v1046_v13  ;;  %v6742_v30 = vld [vmem:[#allocation7_spill] sm:$0xff]  ;;  %2233 = vst.msk [vmem:[#allocation2 + $0x8] sm:$0xff] %vm2231_vm3, %v4974_v21 }
 0x1ee   : > { %2239 = vst.msk [vmem:[#allocation2 + $0x30] sm:$0xff] %vm2231_vm3, %v4974_v21 }
 0x1ef   : > { %v5653_v8 = vadd.f32 %v1449_v7, %v1268_v45  ;;  %2240 = vst.msk [vmem:[#allocation2 + $0x38] sm:$0xff] %vm2231_vm3, %v4974_v21 }
 0x1f0   : > { %v784_v29 = vpop.f32.mrf.mxu2  ;;  %2242 = vst.msk [vmem:[#allocation2 + $0x48] sm:$0xff] %vm2231_vm3, %v4974_v21 }
 0x1f1   : > { %v1007_v53 = vpop.f32.mrf.mxu3  ;;  %v824_v22 = vadd.f32 %v784_v29, %v6741_v9  ;;  %v1232_v6 = vpop.f32.mrf.mxu0  ;;  %2243 = vst.msk [vmem:[#allocation2 + $0x50] sm:$0xff] %vm2231_vm3, %v4974_v21  ;;  %v4712_v29 = vld [vmem:[%s5039_s8 + $0xd9] sm:$0xff] }
 0x1f2   : > { %2245 = vst.msk [vmem:[#allocation2 + $0x60] sm:$0xff] %vm2231_vm3, %v4974_v21 }
 0x1f3   : > { %v1047_v46 = vadd.f32 %v1007_v53, %v824_v22  ;;  %2246 = vst.msk [vmem:[#allocation2 + $0x68] sm:$0xff] %vm2231_vm3, %v4974_v21  ;;  %v4713_v53 = vld [vmem:[%s5039_s8 + $0xe1] sm:$0xff] }
 0x1f4   : > { %4786 = vmatmul.msk.bf16.gmra.mxu0 %vm325_vm1, %v6742_v30  ;;  %v1454_v57 = vpop.f32.mrf.mxu1  ;;  %2248 = vst.msk [vmem:[#allocation2 + $0x78] sm:$0xff] %vm2231_vm3, %v4974_v21 }
 0x1f5   : > { %4688 = vmatmul.msk.bf16.gmra.mxu2 %vm325_vm1, %v1535_v37  ;;  %v5664_v7 = vadd.f32 %v1229_v59, %v1047_v46  ;;  %2249 = vst.msk [vmem:[#allocation2 + $0x80] sm:$0xff] %vm2231_vm3, %v4974_v21 }
 0x1f6   : > { %4737 = vmatmul.msk.bf16.gmra.mxu3 %vm325_vm1, %v1757_v0  ;;  %v6743_v0 = vld [vmem:[#allocation5_spill] sm:$0xff]  ;;  %2251 = vst.msk [vmem:[#allocation2 + $0x90] sm:$0xff] %vm2231_vm3, %v4974_v21 }
 0x1f7   : > { %2252 = vst.msk [vmem:[#allocation2 + $0x98] sm:$0xff] %vm2231_vm3, %v4974_v21 }
 0x1f8   : > { %v787_v51 = vpop.f32.mrf.mxu2  ;;  %2254 = vst.msk [vmem:[#allocation2 + $0xa8] sm:$0xff] %vm2231_vm3, %v4974_v21 }
 0x1f9   : > { %v1010_v13 = vpop.f32.mrf.mxu3  ;;  %v825_v59 = vadd.f32 %v787_v51, %v6743_v0  ;;  %v1234_v45 = vpop.f32.mrf.mxu0  ;;  %v1536_v51 = vpack.c.bf16 %v4664_v3, %v4663_v14  ;;  %2255 = vst.msk [vmem:[#allocation2 + $0xb0] sm:$0xff] %vm2231_vm3, %v4974_v21 }
 0x1fa   : > { %2257 = vst.msk [vmem:[#allocation2 + $0xc0] sm:$0xff] %vm2231_vm3, %v4974_v21 }
 0x1fb   : > { %v1048_v11 = vadd.f32 %v1010_v13, %v825_v59  ;;  %v1758_v13 = vpack.c.bf16 %v4713_v53, %v4712_v29  ;;  %v2368_v59 = vld [vmem:[%s6708_s3] sm:$0xf]  ;;  %2258 = vst.msk [vmem:[#allocation2 + $0xc8] sm:$0xff] %vm2231_vm3, %v4974_v21  ;;  %v6745_v53 = vld [vmem:[#allocation8_spill] sm:$0xff] }
 0x1fc   : > { %v5700_v0 = vpop.f32.mrf.mxu1  ;;  %2260 = vst.msk [vmem:[#allocation2 + $0xd8] sm:$0xff] %vm2231_vm3, %v4974_v21 }
 0x1fd   : > { %v1270_v42 = vadd.f32 %v1232_v6, %v1048_v11  ;;  %v6744_v6 = vld [vmem:[#allocation6_spill] sm:$0xff]  ;;  %2261 = vst.msk [vmem:[#allocation2 + $0xe0] sm:$0xff] %vm2231_vm3, %v4974_v21 }
 0x1fe   : > { %v4829_v11 = vld [vmem:[%s6708_s3 + $0x8] sm:$0xf]  ;;  %2263 = vst.msk [vmem:[#allocation2 + $0xf0] sm:$0xff] %vm2231_vm3, %v4974_v21 }
 0x1ff   : > { %v5691_v9 = vadd.f32 %v1454_v57, %v1270_v42  ;;  %v2609_v42 = vsel %vm2467_vm2, %v2368_v59, 0  ;;  %v2799_v14 = vsel %vm2467_vm2, %v4829_v11, 0  ;;  %2264 = vst.msk [vmem:[#allocation2 + $0xf8] sm:$0xff] %vm2231_vm3, %v4974_v21  ;;  %v4665_v11 = vld [vmem:[%s5039_s8 + $0xf0] sm:$0xff] }
 0x200   : > { %v789_v22 = vpop.f32.mrf.mxu2  ;;  %2618 = vmatpush.bf16.msrb.mxu2 %v2609_v42  ;;  %2808 = vmatpush.bf16.msrb.mxu3 %v2799_v14  ;;  %2266 = vst.msk [vmem:[#allocation2 + $0x108] sm:$0xff] %vm2231_vm3, %v4974_v21  ;;  %v4666_v42 = vld [vmem:[%s5039_s8 + $0xf8] sm:$0xff] }
 0x201   : > { %v1012_v37 = vpop.f32.mrf.mxu3  ;;  %v826_v46 = vadd.f32 %v789_v22, %v6744_v6  ;;  %v1237_v30 = vpop.f32.mrf.mxu0  ;;  %2267 = vst.msk [vmem:[#allocation2 + $0x110] sm:$0xff] %vm2231_vm3, %v4974_v21  ;;  %v4846_v6 = vld [vmem:[%s6708_s3 + $0xc] sm:$0xf]  ;;  %v4714_v14 = vld [vmem:[%s5039_s8 + $0xf1] sm:$0xff] }
 0x202   : > { %2269 = vst.msk [vmem:[#allocation2 + $0x120] sm:$0xff] %vm2231_vm3, %v4974_v21 }
 0x203   : > { %v1049_v57 = vadd.f32 %v1012_v37, %v826_v46  ;;  %v4863_v46 = vld [vmem:[%s6708_s3 + $0x10] sm:$0xf]  ;;  %2270 = vst.msk [vmem:[#allocation2 + $0x128] sm:$0xff] %vm2231_vm3, %v4974_v21 }
 0x204   : > { %4787 = vmatmul.msk.bf16.gmra.mxu0 %vm325_vm1, %v5406_v5  ;;  %2272 = vst.msk [vmem:[#allocation2 + $0x138] sm:$0xff] %vm2231_vm3, %v4974_v21 }
 0x205   : > { %4689 = vmatmul.msk.bf16.gmra.mxu2 %vm325_vm1, %v1536_v51  ;;  %v5720_v3 = vadd.f32 %v1234_v45, %v1049_v57  ;;  %v1459_v51 = vpop.f32.mrf.mxu1  ;;  %v3243_v57 = vsel %vm2467_vm2, %v4863_v46, 0  ;;  %2273 = vst.msk [vmem:[#allocation2 + $0x140] sm:$0xff] %vm2231_vm3, %v4974_v21  ;;  %v1537_v46 = vpack.c.bf16 %v4666_v42, %v4665_v11 }
 0x206   : > { %4738 = vmatmul.msk.bf16.gmra.mxu3 %vm325_vm1, %v1758_v13  ;;  %v3021_v13 = vsel %vm2467_vm2, %v4846_v6, 0  ;;  %3252 = vmatpush.bf16.msrb.mxu1 %v3243_v57  ;;  %2275 = vst.msk [vmem:[#allocation2 + $0x150] sm:$0xff] %vm2231_vm3, %v4974_v21 }
 0x207   : > { %3030 = vmatpush.bf16.msrb.mxu0 %v3021_v13  ;;  %2276 = vst.msk [vmem:[#allocation2 + $0x158] sm:$0xff] %vm2231_vm3, %v4974_v21 }
 0x208   : > { %v792_v5 = vpop.f32.mrf.mxu2  ;;  %2278 = vst.msk [vmem:[#allocation2 + $0x168] sm:$0xff] %vm2231_vm3, %v4974_v21 }
 0x209   : > { %v1015_v29 = vpop.f32.mrf.mxu3  ;;  %v827_v45 = vadd.f32 %v792_v5, %v6745_v53  ;;  %v1239_v22 = vpop.f32.mrf.mxu0  ;;  %v4715_v5 = vld [vmem:[%s5039_s8 + $0xf9] sm:$0xff]  ;;  %2279 = vst.msk [vmem:[#allocation2 + $0x170] sm:$0xff] %vm2231_vm3, %v4974_v21 }
 0x20a   : > { %v1759_v13 = vpack.c.bf16 %v4715_v5, %v4714_v14  ;;  %2281 = vst.msk [vmem:[#allocation2 + $0x180] sm:$0xff] %vm2231_vm3, %v4974_v21  ;;  %v5792_v14 = vld [vmem:[%s6707_s2] ss:$0 sm:$0xff]  ;;  %v2369_v5 = vld [vmem:[#allocation2 + $0x1] sm:$0xff] }
 0x20b   : > { %v1050_v37 = vadd.f32 %v1015_v29, %v827_v45  ;;  %2282 = vst.msk [vmem:[#allocation2 + $0x188] sm:$0xff] %vm2231_vm3, %v4974_v21 }
 0x20c   : > { %2284 = vst.msk [vmem:[#allocation2 + $0x198] sm:$0xff] %vm2231_vm3, %v4974_v21 }
 0x20d   : > { %v1272_v59 = vadd.f32 %v1237_v30, %v1050_v37  ;;  %v6747_v30 = vld [vmem:[#allocation9_spill] sm:$0xff]  ;;  %2285 = vst.msk [vmem:[#allocation2 + $0x1a0] sm:$0xff] %vm2231_vm3, %v4974_v21 }
 0x20e   : > { %2235 = vst.msk [vmem:[#allocation2 + $0x10] sm:$0x3] %vm2234_vm4, %v4974_v21 }
 0x20f   : > { %v5755_v29 = vadd.f32 %v1459_v51, %v1272_v59  ;;  %2238 = vst.msk [vmem:[#allocation2 + $0x28] sm:$0x3] %vm2234_vm4, %v4974_v21 }
 0x210   : > { %v794_v53 = vpop.f32.mrf.mxu2  ;;  %2241 = vst.msk [vmem:[#allocation2 + $0x40] sm:$0x3] %vm2234_vm4, %v4974_v21 }
 0x211   : > { %6746 = vst [vmem:[#allocation3_spill] sm:$0xff] %v5755_v29  ;;  %v1017_v45 = vpop.f32.mrf.mxu3  ;;  %v828_v37 = vadd.f32 %v794_v53, %v6747_v30  ;;  %v2051_v6 = vpop.f32.mrf.mxu0  ;;  %v4667_v53 = vld [vmem:[%s5039_s8 + $0x108] sm:$0xff] }
 0x212   : > { %2244 = vst.msk [vmem:[#allocation2 + $0x58] sm:$0x3] %vm2234_vm4, %v4974_v21 }
 0x213   : > { %v1051_v51 = vadd.f32 %v1017_v45, %v828_v37  ;;  %2247 = vst.msk [vmem:[#allocation2 + $0x70] sm:$0x3] %vm2234_vm4, %v4974_v21  ;;  %v4668_v45 = vld [vmem:[%s5039_s8 + $0x110] sm:$0xff] }
 0x214   : > { %4788 = vmatmul.msk.bf16.gmra.mxu0 %vm325_vm1, %v5422_v28  ;;  %2250 = vst.msk [vmem:[#allocation2 + $0x88] sm:$0x3] %vm2234_vm4, %v4974_v21  ;;  %v4716_v37 = vld [vmem:[%s5039_s8 + $0x109] sm:$0xff] }
 0x215   : > { %4690 = vmatmul.msk.bf16.gmra.mxu2 %vm325_vm1, %v1537_v46  ;;  %v5774_v57 = vadd.f32 %v1239_v22, %v1051_v51  ;;  %2253 = vst.msk [vmem:[#allocation2 + $0xa0] sm:$0x3] %vm2234_vm4, %v4974_v21  ;;  %v2370_v30 = vld [vmem:[#allocation2 + $0x9] sm:$0xff]  ;;  %v4717_v46 = vld [vmem:[%s5039_s8 + $0x111] sm:$0xff] }
 0x216   : > { %4739 = vmatmul.msk.bf16.gmra.mxu3 %vm325_vm1, %v1759_v13  ;;  %2256 = vst.msk [vmem:[#allocation2 + $0xb8] sm:$0x3] %vm2234_vm4, %v4974_v21  ;;  %v2401_v51 = vpack.c.bf16 %v2370_v30, %v2369_v5 }
 0x217   : > { %6748 = vst [vmem:[#allocation4_spill] sm:$0xff] %v5774_v57  ;;  %v1538_v57 = vpack.c.bf16 %v4668_v45, %v4667_v53 }
 0x218   : > { %v1607_v28 = vpop.f32.mrf.mxu2  ;;  %2259 = vst.msk [vmem:[#allocation2 + $0xd0] sm:$0x3] %vm2234_vm4, %v4974_v21  ;;  %4797 = vmatmul.msk.bf16.vlgmr.msra.gmra.mxu1 %vm2231_vm3, %v2401_v51  ;;  %v4670_v51 = vld [vmem:[%s5039_s8 + $0x128] sm:$0xff] }
 0x219   : > { %v1829_v59 = vpop.f32.mrf.mxu3  ;;  %v1687_v22 = vadd.f32 %v1607_v28, %v5417_v60  ;;  %v2053_v11 = vpop.f32.mrf.mxu0  ;;  %2262 = vst.msk [vmem:[#allocation2 + $0xe8] sm:$0x3] %vm2234_vm4, %v4974_v21 }
 0x21a   : > { %2265 = vst.msk [vmem:[#allocation2 + $0x100] sm:$0x3] %vm2234_vm4, %v4974_v21 }
 0x21b   : > { %v1909_v42 = vadd.f32 %v1829_v59, %v1687_v22  ;;  %2268 = vst.msk [vmem:[#allocation2 + $0x118] sm:$0x3] %vm2234_vm4, %v4974_v21 }
 0x21c   : > { %2271 = vst.msk [vmem:[#allocation2 + $0x130] sm:$0x3] %vm2234_vm4, %v4974_v21 }
 0x21d   : > { %v2131_v60 = vadd.f32 %v2051_v6, %v1909_v42  ;;  %2274 = vst.msk [vmem:[#allocation2 + $0x148] sm:$0x3] %vm2234_vm4, %v4974_v21 }
 0x21e   : > { %2277 = vst.msk [vmem:[#allocation2 + $0x160] sm:$0x3] %vm2234_vm4, %v4974_v21 }
 0x21f   : > { %v2167_v13 = vadd.f32 %v5792_v14, %v2131_v60  ;;  %v1760_v60 = vpack.c.bf16 %v4717_v46, %v4716_v37  ;;  %2280 = vst.msk [vmem:[#allocation2 + $0x178] sm:$0x3] %vm2234_vm4, %v4974_v21 }
 0x220   : > { %v1609_v6 = vpop.f32.mrf.mxu2  ;;  %2283 = vst.msk [vmem:[#allocation2 + $0x190] sm:$0x3] %vm2234_vm4, %v4974_v21 }
 0x221   : > { %v1831_v28 = vpop.f32.mrf.mxu3  ;;  %v2199_v59 = vmax.f32 %v2167_v13, 0.0  ;;  %v1688_v22 = vadd.f32 %v1609_v6, %v5432_v24  ;;  %v2056_v42 = vpop.f32.mrf.mxu0  ;;  %2286 = vst.msk [vmem:[#allocation2 + $0x1a8] sm:$0x3] %vm2234_vm4, %v4974_v21  ;;  %v4669_v13 = vld [vmem:[%s5039_s8 + $0x120] sm:$0xff] }
 0x222   : > { %v4718_v6 = vld [vmem:[%s5039_s8 + $0x121] sm:$0xff] }
 0x223   : > { %2288 = vst.msk [vmem:[#allocation2 + $0x19] sm:$0xff] %vm2231_vm3, %v2199_v59  ;;  %v1910_v5 = vadd.f32 %v1831_v28, %v1688_v22  ;;  %v4719_v28 = vld [vmem:[%s5039_s8 + $0x129] sm:$0xff] }
 0x224   : > { %4789 = vmatmul.msk.bf16.gmra.mxu0 %vm325_vm1, %v5440_v31  ;;  %v1761_v29 = vpack.c.bf16 %v4719_v28, %v4718_v6  ;;  %v4672_v28 = vld [vmem:[%s5039_s8 + $0x140] sm:$0xff] }
 0x225   : > { %v2132_v30 = vadd.f32 %v2053_v11, %v1910_v5  ;;  %4691 = vmatmul.msk.bf16.gmra.mxu2 %vm325_vm1, %v1538_v57 }
 0x226   : > { %4740 = vmatmul.msk.bf16.gmra.mxu3 %vm325_vm1, %v1760_v60 }
 0x227   : > { %v2168_v24 = vadd.f32 %v5792_v14, %v2132_v30 }
 0x228   : > { %v1612_v31 = vpop.f32.mrf.mxu2 }
 0x229   : > { %v1834_v11 = vpop.f32.mrf.mxu3  ;;  %v2200_v57 = vmax.f32 %v2168_v24, 0.0  ;;  %v1689_v53 = vadd.f32 %v1612_v31, %v5435_v54  ;;  %v2058_v45 = vpop.f32.mrf.mxu0  ;;  %v1539_v24 = vpack.c.bf16 %v4670_v51, %v4669_v13 }
 0x22a   : > { %v2371_v54 = vld [vmem:[#allocation2 + $0x19] sm:$0xff] }
 0x22b   : > { %2289 = vst.msk [vmem:[#allocation2 + $0x21] sm:$0xff] %vm2231_vm3, %v2200_v57  ;;  %v1911_v37 = vadd.f32 %v1834_v11, %v1689_v53 }
 0x22d   : > { %v2133_v46 = vadd.f32 %v2056_v42, %v1911_v37 }
 0x22f   : > { %v2169_v59 = vadd.f32 %v5792_v14, %v2133_v46 }
 0x230   : > { %v1614_v22 = vpop.f32.mrf.mxu2 }
 0x231   : > { %v1836_v60 = vpop.f32.mrf.mxu3  ;;  %v2201_v5 = vmax.f32 %v2169_v59, 0.0  ;;  %v1690_v30 = vadd.f32 %v1614_v22, %v5450_v49  ;;  %v2061_v21 = vpop.f32.mrf.mxu0  ;;  %v4720_v59 = vld [vmem:[%s5039_s8 + $0x139] sm:$0xff]  ;;  %v4721_v22 = vld [vmem:[%s5039_s8 + $0x141] sm:$0xff] }
 0x232   : > { %v2372_v31 = vld [vmem:[#allocation2 + $0x21] sm:$0xff] }
 0x233   : > { %2290 = vst.msk [vmem:[#allocation2 + $0x31] sm:$0xff] %vm2231_vm3, %v2201_v5  ;;  %v1912_v11 = vadd.f32 %v1836_v60, %v1690_v30  ;;  %v2402_v42 = vpack.c.bf16 %v2372_v31, %v2371_v54 }
 0x234   : > { %4790 = vmatmul.msk.bf16.gmra.mxu0 %vm325_vm1, %v5458_v44 }
 0x235   : > { %v2134_v57 = vadd.f32 %v2058_v45, %v1912_v11  ;;  %4692 = vmatmul.msk.bf16.gmra.mxu2 %vm325_vm1, %v1539_v24  ;;  %4798 = vmatmul.msk.bf16.gmra.mxu1 %vm2231_vm3, %v2402_v42  ;;  %v4671_v45 = vld [vmem:[%s5039_s8 + $0x138] sm:$0xff]  ;;  %v1762_v11 = vpack.c.bf16 %v4721_v22, %v4720_v59 }
 0x236   : > { %4741 = vmatmul.msk.bf16.gmra.mxu3 %vm325_vm1, %v1761_v29  ;;  %v1540_v31 = vpack.c.bf16 %v4672_v28, %v4671_v45  ;;  %v4674_v45 = vld [vmem:[%s5039_s8 + $0x158] sm:$0xff] }
 0x237   : > { %v2170_v49 = vadd.f32 %v5792_v14, %v2134_v57  ;;  %v4722_v28 = vld [vmem:[%s5039_s8 + $0x151] sm:$0xff]  ;;  %v4723_v59 = vld [vmem:[%s5039_s8 + $0x159] sm:$0xff] }
 0x238   : > { %v1617_v53 = vpop.f32.mrf.mxu2 }
 0x239   : > { %v1839_v37 = vpop.f32.mrf.mxu3  ;;  %v2202_v46 = vmax.f32 %v2170_v49, 0.0  ;;  %v1691_v13 = vadd.f32 %v1617_v53, %v5453_v35  ;;  %v2063_v51 = vpop.f32.mrf.mxu0 }
 0x23a   : > { %v2373_v35 = vld [vmem:[#allocation2 + $0x31] sm:$0xff] }
 0x23b   : > { %2291 = vst.msk [vmem:[#allocation2 + $0x39] sm:$0xff] %vm2231_vm3, %v2202_v46  ;;  %v1913_v44 = vadd.f32 %v1839_v37, %v1691_v13 }
 0x23d   : > { %v2135_v6 = vadd.f32 %v2061_v21, %v1913_v44 }
 0x23f   : > { %v2171_v29 = vadd.f32 %v5792_v14, %v2135_v6 }
 0x240   : > { %v1619_v60 = vpop.f32.mrf.mxu2 }
 0x241   : > { %v1841_v5 = vpop.f32.mrf.mxu3  ;;  %v2203_v30 = vmax.f32 %v2171_v29, 0.0  ;;  %v1692_v24 = vadd.f32 %v1619_v60, %v5468_v10  ;;  %v2066_v54 = vpop.f32.mrf.mxu0 }
 0x242   : > { %v2374_v42 = vld [vmem:[#allocation2 + $0x39] sm:$0xff] }
 0x243   : > { %2292 = vst.msk [vmem:[#allocation2 + $0x49] sm:$0xff] %vm2231_vm3, %v2203_v30  ;;  %v1914_v57 = vadd.f32 %v1841_v5, %v1692_v24  ;;  %v2403_v21 = vpack.c.bf16 %v2374_v42, %v2373_v35 }
 0x244   : > { %4791 = vmatmul.msk.bf16.gmra.mxu0 %vm325_vm1, %v5476_v27 }
 0x245   : > { %v2136_v49 = vadd.f32 %v2063_v51, %v1914_v57  ;;  %4693 = vmatmul.msk.bf16.gmra.mxu2 %vm325_vm1, %v1540_v31  ;;  %4799 = vmatmul.msk.bf16.gmra.mxu1 %vm2231_vm3, %v2403_v21  ;;  %v4673_v51 = vld [vmem:[%s5039_s8 + $0x150] sm:$0xff] }
 0x246   : > { %4742 = vmatmul.msk.bf16.gmra.mxu3 %vm325_vm1, %v1762_v11  ;;  %v1541_v31 = vpack.c.bf16 %v4674_v45, %v4673_v51  ;;  %v1763_v11 = vpack.c.bf16 %v4723_v59, %v4722_v28  ;;  %v1473_v51 = vadd.f32 %v5489_v19, %v5504_v43 }
 0x247   : > { %v2172_v10 = vadd.f32 %v5792_v14, %v2136_v49 }
 0x248   : > { %v1622_v53 = vpop.f32.mrf.mxu2 }
 0x249   : > { %v1844_v37 = vpop.f32.mrf.mxu3  ;;  %v2204_v46 = vmax.f32 %v2172_v10, 0.0  ;;  %v1693_v13 = vadd.f32 %v1622_v53, %v5471_v12  ;;  %v2068_v44 = vpop.f32.mrf.mxu0 }
 0x24a   : > { %v2375_v12 = vld [vmem:[#allocation2 + $0x49] sm:$0xff] }
 0x24b   : > { %2293 = vst.msk [vmem:[#allocation2 + $0x51] sm:$0xff] %vm2231_vm3, %v2204_v46  ;;  %v1915_v27 = vadd.f32 %v1844_v37, %v1693_v13  ;;  %v4675_v13 = vld [vmem:[%s5039_s8 + $0x168] sm:$0xff] }
 0x24d   : > { %v2137_v6 = vadd.f32 %v2066_v54, %v1915_v27  ;;  %v4724_v27 = vld [vmem:[%s5039_s8 + $0x169] sm:$0xff] }
 0x24f   : > { %v2173_v22 = vadd.f32 %v5792_v14, %v2137_v6  ;;  %v4725_v6 = vld [vmem:[%s5039_s8 + $0x171] sm:$0xff] }
 0x250   : > { %v1624_v29 = vpop.f32.mrf.mxu2 }
 0x251   : > { %v1846_v60 = vpop.f32.mrf.mxu3  ;;  %v2205_v5 = vmax.f32 %v2173_v22, 0.0  ;;  %v1694_v30 = vadd.f32 %v1624_v29, %v5486_v41  ;;  %v2071_v24 = vpop.f32.mrf.mxu0 }
 0x252   : > { %v2376_v35 = vld [vmem:[#allocation2 + $0x51] sm:$0xff] }
 0x253   : > { %2294 = vst.msk [vmem:[#allocation2 + $0x61] sm:$0xff] %vm2231_vm3, %v2205_v5  ;;  %v1916_v42 = vadd.f32 %v1846_v60, %v1694_v30  ;;  %v2404_v54 = vpack.c.bf16 %v2376_v35, %v2375_v12  ;;  %v1764_v5 = vpack.c.bf16 %v4725_v6, %v4724_v27 }
 0x254   : > { %4792 = vmatmul.msk.bf16.gmra.mxu0 %vm325_vm1, %v5496_v32 }
 0x255   : > { %v2138_v57 = vadd.f32 %v2068_v44, %v1916_v42  ;;  %4694 = vmatmul.msk.bf16.gmra.mxu2 %vm325_vm1, %v1541_v31  ;;  %4800 = vmatmul.msk.bf16.gmra.mxu1 %vm2231_vm3, %v2404_v54  ;;  %v4676_v44 = vld [vmem:[%s5039_s8 + $0x170] sm:$0xff] }
 0x256   : > { %4743 = vmatmul.msk.bf16.gmra.mxu3 %vm325_vm1, %v1763_v11 }
 0x257   : > { %v2174_v41 = vadd.f32 %v5792_v14, %v2138_v57 }
 0x258   : > { %v1627_v21 = vpop.f32.mrf.mxu2 }
 0x259   : > { %v1849_v49 = vpop.f32.mrf.mxu3  ;;  %v2206_v10 = vmax.f32 %v2174_v41, 0.0  ;;  %v1695_v53 = vadd.f32 %v1627_v21, %v5491_v18  ;;  %v2073_v37 = vpop.f32.mrf.mxu0  ;;  %v1542_v18 = vpack.c.bf16 %v4676_v44, %v4675_v13  ;;  %v4677_v21 = vld [vmem:[%s5039_s8 + $0x180] sm:$0xff] }
 0x25a   : > { %v2377_v30 = vld [vmem:[#allocation2 + $0x61] sm:$0xff] }
 0x25b   : > { %2295 = vst.msk [vmem:[#allocation2 + $0x69] sm:$0xff] %vm2231_vm3, %v2206_v10  ;;  %v1917_v32 = vadd.f32 %v1849_v49, %v1695_v53  ;;  %v4678_v49 = vld [vmem:[%s5039_s8 + $0x188] sm:$0xff] }
 0x25c   : > { %v4726_v10 = vld [vmem:[%s5039_s8 + $0x181] sm:$0xff]  ;;  %v4727_v53 = vld [vmem:[%s5039_s8 + $0x189] sm:$0xff] }
 0x25d   : > { %v2139_v46 = vadd.f32 %v2071_v24, %v1917_v32 }
 0x25f   : > { %v2175_v45 = vadd.f32 %v5792_v14, %v2139_v46 }
 0x260   : > { %v1629_v28 = vpop.f32.mrf.mxu2 }
 0x261   : > { %v1851_v59 = vpop.f32.mrf.mxu3  ;;  %v2207_v22 = vmax.f32 %v2175_v45, 0.0  ;;  %v1696_v29 = vadd.f32 %v1629_v28, %v1473_v51  ;;  %v2076_v60 = vpop.f32.mrf.mxu0  ;;  %v1765_v51 = vpack.c.bf16 %v4727_v53, %v4726_v10 }
 0x262   : > { %v2378_v31 = vld [vmem:[#allocation2 + $0x69] sm:$0xff] }
 0x263   : > { %2296 = vst.msk [vmem:[#allocation2 + $0x79] sm:$0xff] %vm2231_vm3, %v2207_v22  ;;  %v1918_v24 = vadd.f32 %v1851_v59, %v1696_v29  ;;  %v2405_v11 = vpack.c.bf16 %v2378_v31, %v2377_v30 }
 0x264   : > { %4793 = vmatmul.msk.bf16.gmra.mxu0 %vm325_vm1, %v5516_v15 }
 0x265   : > { %v2140_v19 = vadd.f32 %v2073_v37, %v1918_v24  ;;  %4695 = vmatmul.msk.bf16.gmra.mxu2 %vm325_vm1, %v1542_v18  ;;  %4801 = vmatmul.msk.bf16.gmra.mxu1 %vm2231_vm3, %v2405_v11  ;;  %v1475_v37 = vadd.f32 %v5509_v56, %v5524_v50  ;;  %v4679_v24 = vld [vmem:[%s5039_s8 + $0x198] sm:$0xff] }
 0x266   : > { %4744 = vmatmul.msk.bf16.gmra.mxu3 %vm325_vm1, %v1764_v5  ;;  %v4777_v11 = vld [vmem:[%s5039_s8 + $0x19a] sm:$0xff] }
 0x267   : > { %v2176_v43 = vadd.f32 %v5792_v14, %v2140_v19  ;;  %v4778_v19 = vld [vmem:[%s5039_s8 + $0x1a2] sm:$0xff] }
 0x268   : > { %v1632_v12 = vpop.f32.mrf.mxu2 }
 0x269   : > { %v1854_v35 = vpop.f32.mrf.mxu3  ;;  %v2208_v42 = vmax.f32 %v2176_v43, 0.0  ;;  %v1697_v54 = vadd.f32 %v1632_v12, %v5511_v26  ;;  %v2078_v57 = vpop.f32.mrf.mxu0  ;;  %v1543_v26 = vpack.c.bf16 %v4678_v49, %v4677_v21  ;;  %v4680_v43 = vld [vmem:[%s5039_s8 + $0x1a0] sm:$0xff] }
 0x26a   : > { %v2379_v45 = vld [vmem:[#allocation2 + $0x79] sm:$0xff]  ;;  %v1544_v10 = vpack.c.bf16 %v4680_v43, %v4679_v24 }
 0x26b   : > { %2297 = vst.msk [vmem:[#allocation2 + $0x81] sm:$0xff] %vm2231_vm3, %v2208_v42  ;;  %v1919_v15 = vadd.f32 %v1854_v35, %v1697_v54  ;;  %v4728_v12 = vld [vmem:[%s5039_s8 + $0x199] sm:$0xff]  ;;  %v4729_v35 = vld [vmem:[%s5039_s8 + $0x1a1] sm:$0xff]  ;;  %v1477_v42 = vadd.f32 %v5529_v61, %v5546_v36 }
 0x26c   : > { %v1766_v53 = vpack.c.bf16 %v4729_v35, %v4728_v12  ;;  %v2922_v43 = vld [vmem:[#allocation2 + $0x18] sm:$0xff] }
 0x26d   : > { %v2141_v41 = vadd.f32 %v2076_v60, %v1919_v15 }
 0x26f   : > { %v2177_v32 = vadd.f32 %v5792_v14, %v2141_v41  ;;  %v1988_v41 = vpack.c.bf16 %v4778_v19, %v4777_v11 }
 0x270   : > { %v1634_v46 = vpop.f32.mrf.mxu2 }
 0x271   : > { %v1856_v13 = vpop.f32.mrf.mxu3  ;;  %v2209_v44 = vmax.f32 %v2177_v32, 0.0  ;;  %v1698_v27 = vadd.f32 %v1634_v46, %v1475_v37  ;;  %v2081_v6 = vpop.f32.mrf.mxu0 }
 0x272   : > { %v2380_v28 = vld [vmem:[#allocation2 + $0x81] sm:$0xff] }
 0x273   : > { %2298 = vst.msk [vmem:[#allocation2 + $0x91] sm:$0xff] %vm2231_vm3, %v2209_v44  ;;  %v1920_v59 = vadd.f32 %v1856_v13, %v1698_v27  ;;  %v5906_v22 = vpack.c.bf16 %v2380_v28, %v2379_v45 }
 0x274   : > { %4794 = vmatmul.msk.bf16.gmra.mxu0 %vm325_vm1, %v5540_v1 }
 0x275   : > { %v2142_v56 = vadd.f32 %v2078_v57, %v1920_v59  ;;  %4696 = vmatmul.msk.bf16.gmra.mxu2 %vm325_vm1, %v1543_v26  ;;  %4802 = vmatmul.msk.bf16.gmra.mxu1 %vm2231_vm3, %v5906_v22  ;;  %v2320_v59 = vld [vmem:[#allocation2] sm:$0xff] }
 0x276   : > { %4745 = vmatmul.msk.bf16.gmra.mxu3 %vm325_vm1, %v1765_v51 }
 0x277   : > { %v2178_v50 = vadd.f32 %v5792_v14, %v2142_v56  ;;  %v2321_v56 = vld [vmem:[#allocation2 + $0x8] sm:$0xff] }
 0x278   : > { %v1637_v29 = vpop.f32.mrf.mxu2  ;;  %v2352_v11 = vpack.c.bf16 %v2321_v56, %v2320_v59 }
 0x279   : > { %v1859_v60 = vpop.f32.mrf.mxu3  ;;  %v2210_v18 = vmax.f32 %v2178_v50, 0.0  ;;  %v1699_v5 = vadd.f32 %v1637_v29, %v5535_v62  ;;  %v2083_v1 = vpop.f32.mrf.mxu0  ;;  %v2700_v50 = vld [vmem:[#allocation2 + $0x2] sm:$0xff]  ;;  %v2701_v29 = vld [vmem:[#allocation2 + $0xa] sm:$0xff] }
 0x27a   : > { %v2381_v37 = vld [vmem:[#allocation2 + $0x91] sm:$0xff]  ;;  %v2732_v19 = vpack.c.bf16 %v2701_v29, %v2700_v50 }
 0x27b   : > { %2299 = vst.msk [vmem:[#allocation2 + $0x99] sm:$0xff] %vm2231_vm3, %v2210_v18  ;;  %v1921_v30 = vadd.f32 %v1859_v60, %v1699_v5  ;;  %v1479_v60 = vadd.f32 %v5551_v55, %v5564_v34  ;;  %v2923_v5 = vld [vmem:[#allocation2 + $0x20] sm:$0xff] }
 0x27d   : > { %v2143_v31 = vadd.f32 %v2081_v6, %v1921_v30 }
 0x27f   : > { %v2179_v54 = vadd.f32 %v5792_v14, %v2143_v31 }
 0x280   : > { %v1639_v57 = vpop.f32.mrf.mxu2 }
 0x281   : > { %v1861_v15 = vpop.f32.mrf.mxu3  ;;  %v2211_v62 = vmax.f32 %v2179_v54, 0.0  ;;  %v1700_v21 = vadd.f32 %v1639_v57, %v1477_v42  ;;  %v2086_v49 = vpop.f32.mrf.mxu0  ;;  %v2954_v42 = vpack.c.bf16 %v2923_v5, %v2922_v43  ;;  %v1483_v43 = vadd.f32 %v5583_v16, %v5596_v63 }
 0x282   : > { %v2382_v32 = vld [vmem:[#allocation2 + $0x99] sm:$0xff] }
 0x283   : > { %2300 = vst.msk [vmem:[#allocation2 + $0xa9] sm:$0xff] %vm2231_vm3, %v2211_v62  ;;  %v1922_v46 = vadd.f32 %v1861_v15, %v1700_v21  ;;  %v5927_v13 = vpack.c.bf16 %v2382_v32, %v2381_v37  ;;  %v5949_v62 = vpop.f32.mrf.mxu1  ;;  %v1481_v32 = vadd.f32 %v5567_v20, %v5580_v48 }
 0x284   : > { %4795 = vmatmul.msk.bf16.gmra.mxu0 %vm325_vm1, %v1988_v41 }
 0x285   : > { %v2144_v61 = vadd.f32 %v2083_v1, %v1922_v46  ;;  %4697 = vmatmul.msk.bf16.gmra.mxu2 %vm325_vm1, %v1544_v10  ;;  %4803 = vmatmul.msk.bf16.gmra.mxu1 %vm2231_vm3, %v5927_v13 }
 0x286   : > { %4746 = vmatmul.msk.bf16.gmra.mxu3 %vm325_vm1, %v1766_v53 }
 0x287   : > { %v2180_v36 = vadd.f32 %v5792_v14, %v2144_v61  ;;  %v2925_v61 = vld [vmem:[#allocation2 + $0x38] sm:$0xff] }
 0x288   : > { %v1642_v44 = vpop.f32.mrf.mxu2 }
 0x289   : > { %v1864_v27 = vpop.f32.mrf.mxu3  ;;  %v2212_v6 = vmax.f32 %v2180_v36, 0.0  ;;  %v1701_v26 = vadd.f32 %v1642_v44, %v5557_v17  ;;  %v2088_v51 = vpop.f32.mrf.mxu0 }
 0x28a   : > { %v2383_v12 = vld [vmem:[#allocation2 + $0xa9] sm:$0xff] }
 0x28b   : > { %2301 = vst.msk [vmem:[#allocation2 + $0xb1] sm:$0xff] %vm2231_vm3, %v2212_v6  ;;  %v1923_v45 = vadd.f32 %v1864_v27, %v1701_v26  ;;  %v2702_v27 = vld [vmem:[#allocation2 + $0x1a] sm:$0xff]  ;;  %v2703_v6 = vld [vmem:[#allocation2 + $0x22] sm:$0xff] }
 0x28c   : > { %v5963_v29 = vpack.c.bf16 %v2703_v6, %v2702_v27 }
 0x28d   : > { %v2145_v28 = vadd.f32 %v2086_v49, %v1923_v45 }
 0x28f   : > { %v2181_v18 = vadd.f32 %v5792_v14, %v2145_v28  ;;  %v2924_v28 = vld [vmem:[#allocation2 + $0x30] sm:$0xff] }
 0x290   : > { %v1644_v1 = vpop.f32.mrf.mxu2  ;;  %v5958_v50 = vpack.c.bf16 %v2925_v61, %v2924_v28 }
 0x291   : > { %v1866_v30 = vpop.f32.mrf.mxu3  ;;  %v2213_v31 = vmax.f32 %v2181_v18, 0.0  ;;  %v1702_v24 = vadd.f32 %v1644_v1, %v1479_v60  ;;  %v2091_v17 = vpop.f32.mrf.mxu0 }
 0x292   : > { %v2384_v35 = vld [vmem:[#allocation2 + $0xb1] sm:$0xff] }
 0x293   : > { %2302 = vst.msk [vmem:[#allocation2 + $0xc1] sm:$0xff] %vm2231_vm3, %v2213_v31  ;;  %v1924_v54 = vadd.f32 %v1866_v30, %v1702_v24  ;;  %v5941_v57 = vpack.c.bf16 %v2384_v35, %v2383_v12  ;;  %v2927_v35 = vld [vmem:[#allocation2 + $0x50] sm:$0xff] }
 0x294   : > { %4847 = vmatmul.msk.bf16.vlgmr.msrb.gmra.mxu0 %vm2231_vm3, %v2954_v42 }
 0x295   : > { %v2146_v55 = vadd.f32 %v2088_v51, %v1924_v54  ;;  %4813 = vmatmul.msk.bf16.vlgmr.msrb.gmra.mxu2 %vm2231_vm3, %v2352_v11  ;;  %4804 = vmatmul.msk.bf16.gmra.mxu1 %vm2231_vm3, %v5941_v57  ;;  %v5956_v51 = vpop.f32.mrf.mxu1 }
 0x296   : > { %4830 = vmatmul.msk.bf16.vlgmr.msrb.gmra.mxu3 %vm2231_vm3, %v2732_v19 }
 0x297   : > { %v2182_v34 = vadd.f32 %v5792_v14, %v2146_v55  ;;  %v2704_v55 = vld [vmem:[#allocation2 + $0x32] sm:$0xff] }
 0x298   : > { %v1647_v15 = vpop.f32.mrf.mxu2 }
 0x299   : > { %v1869_v41 = vpop.f32.mrf.mxu3  ;;  %v2214_v21 = vmax.f32 %v2182_v34, 0.0  ;;  %v1703_v49 = vadd.f32 %v1647_v15, %v5573_v33  ;;  %v2093_v10 = vpop.f32.mrf.mxu0  ;;  %v2705_v34 = vld [vmem:[#allocation2 + $0x3a] sm:$0xff] }
 0x29a   : > { %v2385_v59 = vld [vmem:[#allocation2 + $0xc1] sm:$0xff]  ;;  %v5987_v63 = vpack.c.bf16 %v2705_v34, %v2704_v55 }
 0x29b   : > { %2303 = vst.msk [vmem:[#allocation2 + $0xc9] sm:$0xff] %vm2231_vm3, %v2214_v21  ;;  %v1925_v53 = vadd.f32 %v1869_v41, %v1703_v49  ;;  %v2926_v21 = vld [vmem:[#allocation2 + $0x48] sm:$0xff] }
 0x29d   : > { %v2147_v37 = vadd.f32 %v2091_v17, %v1925_v53  ;;  %v5975_v17 = vpop.f32.mrf.mxu1  ;;  %v5980_v53 = vpack.c.bf16 %v2927_v35, %v2926_v21 }
 0x29f   : > { %v2183_v46 = vadd.f32 %v5792_v14, %v2147_v37 }
 0x2a0   : > { %v1649_v36 = vpop.f32.mrf.mxu2 }
 0x2a1   : > { %v1871_v44 = vpop.f32.mrf.mxu3  ;;  %v2215_v26 = vmax.f32 %v2183_v46, 0.0  ;;  %v1704_v45 = vadd.f32 %v1649_v36, %v1481_v32  ;;  %v2096_v33 = vpop.f32.mrf.mxu0 }
 0x2a2   : > { %v2386_v56 = vld [vmem:[#allocation2 + $0xc9] sm:$0xff] }
 0x2a3   : > { %2304 = vst.msk [vmem:[#allocation2 + $0xd9] sm:$0xff] %vm2231_vm3, %v2215_v26  ;;  %v1926_v20 = vadd.f32 %v1871_v44, %v1704_v45  ;;  %v5961_v48 = vpack.c.bf16 %v2386_v56, %v2385_v59  ;;  %v1485_v59 = vadd.f32 %v5599_v38, %v5612_v39 }
 0x2a4   : > { %4848 = vmatmul.msk.bf16.gmra.mxu0 %vm2231_vm3, %v5958_v50 }
 0x2a5   : > { %v2148_v60 = vadd.f32 %v2093_v10, %v1926_v20  ;;  %4814 = vmatmul.msk.bf16.gmra.mxu2 %vm2231_vm3, %v2954_v42  ;;  %4805 = vmatmul.msk.bf16.gmra.mxu1 %vm2231_vm3, %v5961_v48  ;;  %v2929_v20 = vld [vmem:[#allocation2 + $0x68] sm:$0xff] }
 0x2a6   : > { %4831 = vmatmul.msk.bf16.gmra.mxu3 %vm2231_vm3, %v5963_v29 }
 0x2a7   : > { %v2184_v18 = vadd.f32 %v5792_v14, %v2148_v60 }
 0x2a8   : > { %v1652_v5 = vpop.f32.mrf.mxu2 }
 0x2a9   : > { %v1874_v1 = vpop.f32.mrf.mxu3  ;;  %v2216_v30 = vmax.f32 %v2184_v18, 0.0  ;;  %v1705_v31 = vadd.f32 %v1652_v5, %v5589_v58  ;;  %v2098_v24 = vpop.f32.mrf.mxu0  ;;  %v2706_v5 = vld [vmem:[#allocation2 + $0x4a] sm:$0xff] }
 0x2aa   : > { %v2387_v49 = vld [vmem:[#allocation2 + $0xd9] sm:$0xff] }
 0x2ab   : > { %2305 = vst.msk [vmem:[#allocation2 + $0xe1] sm:$0xff] %vm2231_vm3, %v2216_v30  ;;  %v1927_v11 = vadd.f32 %v1874_v1, %v1705_v31  ;;  %v2707_v1 = vld [vmem:[#allocation2 + $0x52] sm:$0xff] }
 0x2ac   : > { %v6012_v39 = vpack.c.bf16 %v2707_v1, %v2706_v5 }
 0x2ad   : > { %v2149_v19 = vadd.f32 %v2096_v33, %v1927_v11 }
 0x2af   : > { %v2185_v12 = vadd.f32 %v5792_v14, %v2149_v19 }
 0x2b0   : > { %v1654_v42 = vpop.f32.mrf.mxu2 }
 0x2b1   : > { %v1876_v54 = vpop.f32.mrf.mxu3  ;;  %v2217_v15 = vmax.f32 %v2185_v12, 0.0  ;;  %v1706_v41 = vadd.f32 %v1654_v42, %v1483_v43  ;;  %v2101_v58 = vpop.f32.mrf.mxu0 }
 0x2b2   : > { %v2388_v10 = vld [vmem:[#allocation2 + $0xe1] sm:$0xff]  ;;  %v5983_v32 = vpop.f32.mrf.mxu1 }
 0x2b3   : > { %2306 = vst.msk [vmem:[#allocation2 + $0xf1] sm:$0xff] %vm2231_vm3, %v2217_v15  ;;  %v1928_v37 = vadd.f32 %v1876_v54, %v1706_v41  ;;  %v5985_v16 = vpack.c.bf16 %v2388_v10, %v2387_v49 }
 0x2b4   : > { %4849 = vmatmul.msk.bf16.gmra.mxu0 %vm2231_vm3, %v5980_v53 }
 0x2b5   : > { %v2150_v46 = vadd.f32 %v2098_v24, %v1928_v37  ;;  %4815 = vmatmul.msk.bf16.gmra.mxu2 %vm2231_vm3, %v5958_v50  ;;  %4806 = vmatmul.msk.bf16.gmra.mxu1 %vm2231_vm3, %v5985_v16  ;;  %v2928_v24 = vld [vmem:[#allocation2 + $0x60] sm:$0xff]  ;;  %v1487_v37 = vadd.f32 %v5615_v2, %v5628_v47 }
 0x2b6   : > { %4832 = vmatmul.msk.bf16.gmra.mxu3 %vm2231_vm3, %v5987_v63  ;;  %v6005_v43 = vpack.c.bf16 %v2929_v20, %v2928_v24 }
 0x2b7   : > { %v2186_v61 = vadd.f32 %v5792_v14, %v2150_v46 }
 0x2b8   : > { %v1657_v36 = vpop.f32.mrf.mxu2 }
 0x2b9   : > { %v1879_v44 = vpop.f32.mrf.mxu3  ;;  %v2218_v27 = vmax.f32 %v2186_v61, 0.0  ;;  %v1707_v6 = vadd.f32 %v1657_v36, %v5605_v23  ;;  %v2103_v26 = vpop.f32.mrf.mxu0  ;;  %v2931_v61 = vld [vmem:[#allocation2 + $0x80] sm:$0xff] }
 0x2ba   : > { %v6000_v33 = vpop.f32.mrf.mxu1  ;;  %v2389_v11 = vld [vmem:[#allocation2 + $0xf1] sm:$0xff] }
 0x2bb   : > { %2307 = vst.msk [vmem:[#allocation2 + $0xf9] sm:$0xff] %vm2231_vm3, %v2218_v27  ;;  %v1929_v45 = vadd.f32 %v1879_v44, %v1707_v6  ;;  %v2708_v27 = vld [vmem:[#allocation2 + $0x62] sm:$0xff]  ;;  %v2709_v6 = vld [vmem:[#allocation2 + $0x6a] sm:$0xff] }
 0x2bc   : > { %v6037_v47 = vpack.c.bf16 %v2709_v6, %v2708_v27 }
 0x2bd   : > { %v2151_v28 = vadd.f32 %v2101_v58, %v1929_v45 }
 0x2bf   : > { %v2187_v56 = vadd.f32 %v5792_v14, %v2151_v28  ;;  %v2930_v28 = vld [vmem:[#allocation2 + $0x78] sm:$0xff] }
 0x2c0   : > { %v1659_v60 = vpop.f32.mrf.mxu2  ;;  %v6030_v20 = vpack.c.bf16 %v2931_v61, %v2930_v28  ;;  %v2932_v61 = vld [vmem:[#allocation2 + $0x90] sm:$0xff] }
 0x2c1   : > { %v1881_v18 = vpop.f32.mrf.mxu3  ;;  %v2219_v30 = vmax.f32 %v2187_v56, 0.0  ;;  %v1708_v31 = vadd.f32 %v1659_v60, %v1485_v59  ;;  %v2106_v23 = vpop.f32.mrf.mxu0 }
 0x2c2   : > { %v2390_v19 = vld [vmem:[#allocation2 + $0xf9] sm:$0xff]  ;;  %v6008_v35 = vpop.f32.mrf.mxu1 }
 0x2c3   : > { %2308 = vst.msk [vmem:[#allocation2 + $0x109] sm:$0xff] %vm2231_vm3, %v2219_v30  ;;  %v1930_v12 = vadd.f32 %v1881_v18, %v1708_v31  ;;  %v6010_v38 = vpack.c.bf16 %v2390_v19, %v2389_v11 }
 0x2c4   : > { %4850 = vmatmul.msk.bf16.gmra.mxu0 %vm2231_vm3, %v6005_v43 }
 0x2c5   : > { %v2152_v42 = vadd.f32 %v2103_v26, %v1930_v12  ;;  %4816 = vmatmul.msk.bf16.gmra.mxu2 %vm2231_vm3, %v5980_v53  ;;  %4807 = vmatmul.msk.bf16.gmra.mxu1 %vm2231_vm3, %v6010_v38 }
 0x2c6   : > { %4833 = vmatmul.msk.bf16.gmra.mxu3 %vm2231_vm3, %v6012_v39 }
 0x2c7   : > { %v2188_v54 = vadd.f32 %v5792_v14, %v2152_v42 }
 0x2c8   : > { %v1662_v55 = vpop.f32.mrf.mxu2 }
 0x2c9   : > { %v1884_v34 = vpop.f32.mrf.mxu3  ;;  %v2220_v15 = vmax.f32 %v2188_v54, 0.0  ;;  %v1709_v41 = vadd.f32 %v1662_v55, %v5621_v52  ;;  %v2108_v58 = vpop.f32.mrf.mxu0  ;;  %v6749_v54 = vld [vmem:[#allocation10_spill] sm:$0xff] }
 0x2ca   : > { %v6025_v49 = vpop.f32.mrf.mxu1  ;;  %v2391_v59 = vld [vmem:[#allocation2 + $0x109] sm:$0xff]  ;;  %v1489_v55 = vadd.f32 %v6749_v54, %v5644_v40 }
 0x2cb   : > { %2309 = vst.msk [vmem:[#allocation2 + $0x111] sm:$0xff] %vm2231_vm3, %v2220_v15  ;;  %v1931_v21 = vadd.f32 %v1884_v34, %v1709_v41  ;;  %v2933_v15 = vld [vmem:[#allocation2 + $0x98] sm:$0xff] }
 0x2cc   : > { %v6055_v27 = vpack.c.bf16 %v2933_v15, %v2932_v61 }
 0x2cd   : > { %v2153_v10 = vadd.f32 %v2106_v23, %v1931_v21  ;;  %v2710_v21 = vld [vmem:[#allocation2 + $0x7a] sm:$0xff] }
 0x2cf   : > { %v2189_v46 = vadd.f32 %v5792_v14, %v2153_v10  ;;  %v2711_v10 = vld [vmem:[#allocation2 + $0x82] sm:$0xff] }
 0x2d0   : > { %v1664_v36 = vpop.f32.mrf.mxu2 }
 0x2d1   : > { %v1886_v44 = vpop.f32.mrf.mxu3  ;;  %v2221_v26 = vmax.f32 %v2189_v46, 0.0  ;;  %v1710_v45 = vadd.f32 %v1664_v36, %v1487_v37  ;;  %v2111_v52 = vpop.f32.mrf.mxu0 }
 0x2d2   : > { %v2392_v56 = vld [vmem:[#allocation2 + $0x111] sm:$0xff]  ;;  %v6033_v18 = vpop.f32.mrf.mxu1 }
 0x2d3   : > { %2310 = vst.msk [vmem:[#allocation2 + $0x121] sm:$0xff] %vm2231_vm3, %v2221_v26  ;;  %v1932_v60 = vadd.f32 %v1886_v44, %v1710_v45  ;;  %v6035_v2 = vpack.c.bf16 %v2392_v56, %v2391_v59  ;;  %v6062_v45 = vpack.c.bf16 %v2711_v10, %v2710_v21 }
 0x2d4   : > { %4851 = vmatmul.msk.bf16.gmra.mxu0 %vm2231_vm3, %v6030_v20 }
 0x2d5   : > { %v2154_v5 = vadd.f32 %v2108_v58, %v1932_v60  ;;  %4817 = vmatmul.msk.bf16.gmra.mxu2 %vm2231_vm3, %v6005_v43  ;;  %4808 = vmatmul.msk.bf16.gmra.mxu1 %vm2231_vm3, %v6035_v2 }
 0x2d6   : > { %4834 = vmatmul.msk.bf16.gmra.mxu3 %vm2231_vm3, %v6037_v47 }
 0x2d7   : > { %v2190_v1 = vadd.f32 %v5792_v14, %v2154_v5 }
 0x2d8   : > { %v1667_v30 = vpop.f32.mrf.mxu2 }
 0x2d9   : > { %v1889_v31 = vpop.f32.mrf.mxu3  ;;  %v2222_v23 = vmax.f32 %v2190_v1, 0.0  ;;  %v1711_v24 = vadd.f32 %v1667_v30, %v5637_v25  ;;  %v2113_v11 = vpop.f32.mrf.mxu0 }
 0x2da   : > { %v6050_v12 = vpop.f32.mrf.mxu1  ;;  %v2393_v36 = vld [vmem:[#allocation2 + $0x121] sm:$0xff] }
 0x2db   : > { %2311 = vst.msk [vmem:[#allocation2 + $0x129] sm:$0xff] %vm2231_vm3, %v2222_v23  ;;  %v1933_v19 = vadd.f32 %v1889_v31, %v1711_v24  ;;  %v1491_v24 = vadd.f32 %v5648_v4, %v5664_v7 }
 0x2dd   : > { %v2155_v42 = vadd.f32 %v2111_v52, %v1933_v19  ;;  %v2935_v19 = vld [vmem:[#allocation2 + $0xb0] sm:$0xff] }
 0x2df   : > { %v2191_v34 = vadd.f32 %v5792_v14, %v2155_v42 }
 0x2e0   : > { %v1669_v41 = vpop.f32.mrf.mxu2 }
 0x2e1   : > { %v1891_v58 = vpop.f32.mrf.mxu3  ;;  %v2223_v37 = vmax.f32 %v2191_v34, 0.0  ;;  %v1712_v46 = vadd.f32 %v1669_v41, %v1489_v55  ;;  %v2116_v25 = vpop.f32.mrf.mxu0  ;;  %v2712_v55 = vld [vmem:[#allocation2 + $0x92] sm:$0xff]  ;;  %v2713_v34 = vld [vmem:[#allocation2 + $0x9a] sm:$0xff] }
 0x2e2   : > { %v2394_v44 = vld [vmem:[#allocation2 + $0x129] sm:$0xff]  ;;  %v6058_v26 = vpop.f32.mrf.mxu1  ;;  %v6087_v7 = vpack.c.bf16 %v2713_v34, %v2712_v55  ;;  %v2715_v34 = vld [vmem:[#allocation2 + $0xb2] sm:$0xff] }
 0x2e3   : > { %2312 = vst.msk [vmem:[#allocation2 + $0x139] sm:$0xff] %vm2231_vm3, %v2223_v37  ;;  %v1934_v6 = vadd.f32 %v1891_v58, %v1712_v46  ;;  %v6060_v40 = vpack.c.bf16 %v2394_v44, %v2393_v36  ;;  %v2934_v58 = vld [vmem:[#allocation2 + $0xa8] sm:$0xff] }
 0x2e4   : > { %4852 = vmatmul.msk.bf16.gmra.mxu0 %vm2231_vm3, %v6055_v27  ;;  %v6080_v37 = vpack.c.bf16 %v2935_v19, %v2934_v58  ;;  %6752 = vst [vmem:[#allocation6_spill] sm:$0xff] %v6087_v7  ;;  %v2937_v19 = vld [vmem:[#allocation2 + $0xc8] sm:$0xff] }
 0x2e5   : > { %v2156_v52 = vadd.f32 %v2113_v11, %v1934_v6  ;;  %4818 = vmatmul.msk.bf16.gmra.mxu2 %vm2231_vm3, %v6030_v20  ;;  %4809 = vmatmul.msk.bf16.gmra.mxu1 %vm2231_vm3, %v6060_v40  ;;  %v2714_v55 = vld [vmem:[#allocation2 + $0xaa] sm:$0xff] }
 0x2e6   : > { %4835 = vmatmul.msk.bf16.gmra.mxu3 %vm2231_vm3, %v6062_v45  ;;  %6750 = vst [vmem:[#allocation7_spill] sm:$0xff] %v6080_v37 }
 0x2e7   : > { %v2192_v28 = vadd.f32 %v5792_v14, %v2156_v52 }
 0x2e8   : > { %v1672_v59 = vpop.f32.mrf.mxu2 }
 0x2e9   : > { %v1894_v56 = vpop.f32.mrf.mxu3  ;;  %v2224_v60 = vmax.f32 %v2192_v28, 0.0  ;;  %v1713_v5 = vadd.f32 %v1672_v59, %v5653_v8  ;;  %v2118_v1 = vpop.f32.mrf.mxu0 }
 0x2ea   : > { %v6075_v31 = vpop.f32.mrf.mxu1  ;;  %v2395_v21 = vld [vmem:[#allocation2 + $0x139] sm:$0xff] }
 0x2eb   : > { %2313 = vst.msk [vmem:[#allocation2 + $0x141] sm:$0xff] %vm2231_vm3, %v2224_v60  ;;  %v1935_v30 = vadd.f32 %v1894_v56, %v1713_v5  ;;  %v4880_v5 = vld [vmem:[%s6708_s3 + $0x14] sm:$0xf] }
 0x2ed   : > { %v2157_v23 = vadd.f32 %v2116_v25, %v1935_v30  ;;  %v3465_v30 = vsel %vm2467_vm2, %v4880_v5, 0 }
 0x2ee   : > { %3474 = vmatpush.bf16.msra.mxu2 %v3465_v30 }
 0x2ef   : > { %v2193_v11 = vadd.f32 %v5792_v14, %v2157_v23 }
 0x2f0   : > { %v1674_v42 = vpop.f32.mrf.mxu2 }
 0x2f1   : > { %v1896_v54 = vpop.f32.mrf.mxu3  ;;  %v2225_v15 = vmax.f32 %v2193_v11, 0.0  ;;  %v1714_v41 = vadd.f32 %v1674_v42, %v1491_v24  ;;  %v2121_v8 = vpop.f32.mrf.mxu0 }
 0x2f2   : > { %v2396_v10 = vld [vmem:[#allocation2 + $0x141] sm:$0xff]  ;;  %v6083_v25 = vpop.f32.mrf.mxu1 }
 0x2f3   : > { %2314 = vst.msk [vmem:[#allocation2 + $0x151] sm:$0xff] %vm2231_vm3, %v2225_v15  ;;  %v1936_v46 = vadd.f32 %v1896_v54, %v1714_v41  ;;  %v6085_v4 = vpack.c.bf16 %v2396_v10, %v2395_v21  ;;  %v2936_v21 = vld [vmem:[#allocation2 + $0xc0] sm:$0xff] }
 0x2f4   : > { %4853 = vmatmul.msk.bf16.gmra.mxu0 %vm2231_vm3, %v6080_v37 }
 0x2f5   : > { %6751 = vst [vmem:[#allocation5_spill] sm:$0xff] %v6085_v4  ;;  %v2158_v61 = vadd.f32 %v2118_v1, %v1936_v46  ;;  %4819 = vmatmul.msk.bf16.gmra.mxu2 %vm2231_vm3, %v6055_v27  ;;  %4810 = vmatmul.msk.bf16.gmra.mxu1 %vm2231_vm3, %v6085_v4  ;;  %v4897_v1 = vld [vmem:[%s6708_s3 + $0x18] sm:$0xf] }
 0x2f6   : > { %4836 = vmatmul.msk.bf16.gmra.mxu3 %vm2231_vm3, %v6087_v7  ;;  %v3688_v23 = vsel %vm2467_vm2, %v4897_v1, 0 }
 0x2f7   : > { %v2194_v36 = vadd.f32 %v5792_v14, %v2158_v61  ;;  %3697 = vmatpush.bf16.msra.mxu3 %v3688_v23  ;;  %v6113_v61 = vpack.c.bf16 %v2937_v19, %v2936_v21  ;;  %v6756_v23 = vld [vmem:[#allocation3_spill] sm:$0xff] }
 0x2f8   : > { %v1677_v44 = vpop.f32.mrf.mxu2 }
 0x2f9   : > { %v1899_v6 = vpop.f32.mrf.mxu3  ;;  %v2226_v52 = vmax.f32 %v2194_v36, 0.0  ;;  %v1715_v28 = vadd.f32 %v1677_v44, %v5691_v9  ;;  %v2123_v59 = vpop.f32.mrf.mxu0  ;;  %v1493_v9 = vadd.f32 %v5700_v0, %v5720_v3  ;;  %6753 = vst [vmem:[#allocation8_spill] sm:$0xff] %v6113_v61  ;;  %v6120_v3 = vpack.c.bf16 %v2715_v34, %v2714_v55 }
 0x2fa   : > { %v6100_v60 = vpop.f32.mrf.mxu1  ;;  %v2397_v10 = vld [vmem:[#allocation2 + $0x151] sm:$0xff] }
 0x2fb   : > { %2315 = vst.msk [vmem:[#allocation2 + $0x159] sm:$0xff] %vm2231_vm3, %v2226_v52  ;;  %v1937_v56 = vadd.f32 %v1899_v6, %v1715_v28  ;;  %v4931_v52 = vld [vmem:[%s6708_s3 + $0x20] sm:$0xf] }
 0x2fc   : > { %6755 = vst [vmem:[#allocation10_spill] sm:$0xff] %v6120_v3  ;;  %v4965_v28 = vld [vmem:[%s6707_s2] ss:$0 sm:$0xff] }
 0x2fd   : > { %v2159_v24 = vadd.f32 %v2121_v8, %v1937_v56 }
 0x2ff   : > { %v2195_v11 = vadd.f32 %v5792_v14, %v2159_v24  ;;  %v4914_v14 = vld [vmem:[%s6708_s3 + $0x1c] sm:$0xf] }
 0x300   : > { %v1679_v42 = vpop.f32.mrf.mxu2  ;;  %v3910_v44 = vsel %vm2467_vm2, %v4914_v14, 0 }
 0x301   : > { %v1901_v54 = vpop.f32.mrf.mxu3  ;;  %v2227_v15 = vmax.f32 %v2195_v11, 0.0  ;;  %v1716_v41 = vadd.f32 %v1679_v42, %v1493_v9  ;;  %v2126_v58 = vpop.f32.mrf.mxu0  ;;  %3919 = vmatpush.bf16.msra.mxu0 %v3910_v44 }
 0x302   : > { %v2398_v46 = vld [vmem:[#allocation2 + $0x159] sm:$0xff]  ;;  %v6116_v36 = vpop.f32.mrf.mxu1 }
 0x303   : > { %2316 = vst.msk [vmem:[#allocation2 + $0x169] sm:$0xff] %vm2231_vm3, %v2227_v15  ;;  %v1938_v8 = vadd.f32 %v1901_v54, %v1716_v41  ;;  %v6118_v0 = vpack.c.bf16 %v2398_v46, %v2397_v10  ;;  %v6757_v54 = vld [vmem:[#allocation4_spill] sm:$0xff]  ;;  %v2939_v15 = vld [vmem:[#allocation2 + $0xe0] sm:$0xff]  ;;  %v2717_v46 = vld [vmem:[#allocation2 + $0xca] sm:$0xff] }
 0x304   : > { %4854 = vmatmul.msk.bf16.gmra.mxu0 %vm2231_vm3, %v6113_v61  ;;  %v1495_v55 = vadd.f32 %v5949_v62, %v6757_v54  ;;  %v2716_v10 = vld [vmem:[#allocation2 + $0xc2] sm:$0xff] }
 0x305   : > { %6754 = vst [vmem:[#allocation9_spill] sm:$0xff] %v6118_v0  ;;  %v2160_v6 = vadd.f32 %v2123_v59, %v1938_v8  ;;  %4820 = vmatmul.msk.bf16.gmra.mxu2 %vm2231_vm3, %v6080_v37  ;;  %4811 = vmatmul.msk.bf16.gmra.mxu1 %vm2231_vm3, %v6118_v0  ;;  %v4132_v59 = vsel %vm2467_vm2, %v4931_v52, 0  ;;  %v3151_v0 = vld [vmem:[#allocation2 + $0x69] sm:$0xff] }
 0x306   : > { %4837 = vmatmul.msk.bf16.gmra.mxu3 %vm2231_vm3, %v6120_v3  ;;  %4141 = vmatpush.bf16.msra.mxu1 %v4132_v59 }
 0x307   : > { %v2196_v56 = vadd.f32 %v4965_v28, %v2160_v6  ;;  %v2938_v6 = vld [vmem:[#allocation2 + $0xd8] sm:$0xff] }
 0x308   : > { %v1682_v5 = vpop.f32.mrf.mxu2  ;;  %v6147_v59 = vpack.c.bf16 %v2939_v15, %v2938_v6  ;;  %v2940_v6 = vld [vmem:[#allocation2 + $0xf0] sm:$0xff] }
 0x309   : > { %v1904_v1 = vpop.f32.mrf.mxu3  ;;  %v2228_v30 = vmax.f32 %v2196_v56, 0.0  ;;  %v1717_v24 = vadd.f32 %v1682_v5, %v6756_v23  ;;  %v2128_v9 = vpop.f32.mrf.mxu0 }
 0x30a   : > { %v6143_v19 = vpop.f32.mrf.mxu1  ;;  %v2399_v52 = vld [vmem:[#allocation2 + $0x169] sm:$0xff]  ;;  %6758 = vst [vmem:[#allocation3_spill] sm:$0xff] %v6147_v59 }
 0x30b   : > { %2317 = vst.msk [vmem:[#allocation2 + $0x171] sm:$0xff] %vm2231_vm3, %v2228_v30  ;;  %v1939_v11 = vadd.f32 %v1904_v1, %v1717_v24  ;;  %v6154_v1 = vpack.c.bf16 %v2717_v46, %v2716_v10  ;;  %v2718_v46 = vld [vmem:[#allocation2 + $0xda] sm:$0xff] }
 0x30d   : > { %v2161_v42 = vadd.f32 %v2126_v58, %v1939_v11  ;;  %6760 = vst [vmem:[#allocation11_spill] sm:$0xff] %v6154_v1 }
 0x30f   : > { %v2197_v34 = vadd.f32 %v4965_v28, %v2161_v42 }
 0x310   : > { %v1684_v41 = vpop.f32.mrf.mxu2 }
 0x311   : > { %v1906_v21 = vpop.f32.mrf.mxu3  ;;  %v2229_v8 = vmax.f32 %v2197_v34, 0.0  ;;  %v1718_v14 = vadd.f32 %v1684_v41, %v1495_v55  ;;  %v3032_v44 = vpop.f32.mrf.mxu0  ;;  %v2941_v41 = vld [vmem:[#allocation2 + $0xf8] sm:$0xff] }
 0x312   : > { %v2400_v56 = vld [vmem:[#allocation2 + $0x171] sm:$0xff]  ;;  %v6150_v5 = vpop.f32.mrf.mxu1 }
 0x313   : > { %2318 = vst.msk [vmem:[#allocation2 + $0x181] sm:$0xff] %vm2231_vm3, %v2229_v8  ;;  %v1940_v58 = vadd.f32 %v1906_v21, %v1718_v14  ;;  %v6152_v62 = vpack.c.bf16 %v2400_v56, %v2399_v52  ;;  %v2719_v8 = vld [vmem:[#allocation2 + $0xe2] sm:$0xff]  ;;  %v6171_v56 = vpack.c.bf16 %v2941_v41, %v2940_v6  ;;  %v2721_v6 = vld [vmem:[#allocation2 + $0xfa] sm:$0xff] }
 0x314   : > { %4855 = vmatmul.msk.bf16.gmra.mxu0 %vm2231_vm3, %v6147_v59  ;;  %v3145_v52 = vld [vmem:[#allocation2 + $0x21] sm:$0xff] }
 0x315   : > { %6759 = vst [vmem:[#allocation4_spill] sm:$0xff] %v6152_v62  ;;  %v2162_v30 = vadd.f32 %v2128_v9, %v1940_v58  ;;  %4821 = vmatmul.msk.bf16.gmra.mxu2 %vm2231_vm3, %v6113_v61  ;;  %4812 = vmatmul.msk.bf16.gmra.mxu1 %vm2231_vm3, %v6152_v62  ;;  %v3149_v62 = vld [vmem:[#allocation2 + $0x51] sm:$0xff] }
 0x316   : > { %4838 = vmatmul.msk.bf16.gmra.mxu3 %vm2231_vm3, %v6154_v1  ;;  %6761 = vst [vmem:[#allocation12_spill] sm:$0xff] %v6171_v56 }
 0x317   : > { %v2198_v23 = vadd.f32 %v4965_v28, %v2162_v30  ;;  %v6175_v30 = vpack.c.bf16 %v2719_v8, %v2718_v46 }
 0x318   : > { %v2620_v24 = vpop.f32.mrf.mxu2 }
 0x319   : > { %v2810_v11 = vpop.f32.mrf.mxu3  ;;  %v2230_v42 = vmax.f32 %v2198_v23, 0.0  ;;  %v2621_v54 = vadd.f32 %v2620_v24, %v5956_v51  ;;  %v3034_v55 = vpop.f32.mrf.mxu0  ;;  %6762 = vst [vmem:[#allocation13_spill] sm:$0xff] %v6175_v30  ;;  %v3144_v23 = vld [vmem:[#allocation2 + $0x19] sm:$0xff] }
 0x31a   : > { %v6166_v9 = vpop.f32.mrf.mxu1 }
 0x31b   : > { %2319 = vst.msk [vmem:[#allocation2 + $0x189] sm:$0xff] %vm2231_vm3, %v2230_v42  ;;  %v2890_v34 = vadd.f32 %v2810_v11, %v2621_v54 }
 0x31d   : > { %v6168_v15 = vadd.f32 %v3032_v44, %v2890_v34  ;;  %v3176_v44 = vpack.c.bf16 %v3145_v52, %v3144_v23  ;;  %v3147_v23 = vld [vmem:[#allocation2 + $0x39] sm:$0xff] }
 0x320   : > { %v2622_v21 = vpop.f32.mrf.mxu2 }
 0x321   : > { %v2812_v10 = vpop.f32.mrf.mxu3  ;;  %v2623_v28 = vadd.f32 %v2622_v21, %v5975_v17  ;;  %v3037_v14 = vpop.f32.mrf.mxu0 }
 0x322   : > { %v6173_v58 = vpop.f32.mrf.mxu1 }
 0x323   : > { %v2891_v51 = vadd.f32 %v2812_v10, %v2623_v28  ;;  %v2943_v10 = vld [vmem:[#allocation2 + $0x110] sm:$0xff] }
 0x324   : > { %4856 = vmatmul.msk.bf16.gmra.mxu0 %vm2231_vm3, %v6171_v56  ;;  %v2720_v28 = vld [vmem:[#allocation2 + $0xf2] sm:$0xff] }
 0x325   : > { %4822 = vmatmul.msk.bf16.gmra.mxu2 %vm2231_vm3, %v6147_v59  ;;  %v6183_v17 = vadd.f32 %v3034_v55, %v2891_v51  ;;  %4864 = vmatmul.msk.bf16.vlgmr.msrb.gmra.mxu1 %vm2231_vm3, %v3176_v44  ;;  %v2942_v51 = vld [vmem:[#allocation2 + $0x108] sm:$0xff] }
 0x326   : > { %4839 = vmatmul.msk.bf16.gmra.mxu3 %vm2231_vm3, %v6175_v30  ;;  %v6192_v44 = vpack.c.bf16 %v2943_v10, %v2942_v51 }
 0x328   : > { %v2625_v24 = vpop.f32.mrf.mxu2  ;;  %6763 = vst [vmem:[#allocation14_spill] sm:$0xff] %v6192_v44 }
 0x329   : > { %v2815_v11 = vpop.f32.mrf.mxu3  ;;  %v2626_v42 = vadd.f32 %v2625_v24, %v5983_v32  ;;  %v3039_v54 = vpop.f32.mrf.mxu0  ;;  %v6196_v24 = vpack.c.bf16 %v2721_v6, %v2720_v28 }
 0x32a   : > { %v6187_v41 = vpop.f32.mrf.mxu1 }
 0x32b   : > { %v2892_v34 = vadd.f32 %v2815_v11, %v2626_v42  ;;  %6764 = vst [vmem:[#allocation15_spill] sm:$0xff] %v6196_v24  ;;  %v3146_v11 = vld [vmem:[#allocation2 + $0x31] sm:$0xff] }
 0x32d   : > { %v6189_v21 = vadd.f32 %v3037_v14, %v2892_v34  ;;  %v6200_v14 = vpack.c.bf16 %v3147_v23, %v3146_v11  ;;  %v2722_v11 = vld [vmem:[#allocation2 + $0x10a] sm:$0xff] }
 0x330   : > { %v2627_v46 = vpop.f32.mrf.mxu2 }
 0x331   : > { %v2817_v8 = vpop.f32.mrf.mxu3  ;;  %v2628_v55 = vadd.f32 %v2627_v46, %v6000_v33  ;;  %v3042_v52 = vpop.f32.mrf.mxu0 }
 0x332   : > { %v6194_v32 = vpop.f32.mrf.mxu1 }
 0x333   : > { %v2893_v30 = vadd.f32 %v2817_v8, %v2628_v55  ;;  %v2945_v55 = vld [vmem:[#allocation2 + $0x128] sm:$0xff] }
 0x334   : > { %4857 = vmatmul.msk.bf16.gmra.mxu0 %vm2231_vm3, %v6192_v44 }
 0x335   : > { %4823 = vmatmul.msk.bf16.gmra.mxu2 %vm2231_vm3, %v6171_v56  ;;  %v6206_v33 = vadd.f32 %v3039_v54, %v2893_v30  ;;  %4865 = vmatmul.msk.bf16.gmra.mxu1 %vm2231_vm3, %v6200_v14  ;;  %v2944_v56 = vld [vmem:[#allocation2 + $0x120] sm:$0xff] }
 0x336   : > { %4840 = vmatmul.msk.bf16.gmra.mxu3 %vm2231_vm3, %v6196_v24  ;;  %v2723_v24 = vld [vmem:[#allocation2 + $0x112] sm:$0xff]  ;;  %v6216_v59 = vpack.c.bf16 %v2945_v55, %v2944_v56 }
 0x338   : > { %v2630_v42 = vpop.f32.mrf.mxu2  ;;  %6765 = vst [vmem:[#allocation16_spill] sm:$0xff] %v6216_v59 }
 0x339   : > { %v2820_v34 = vpop.f32.mrf.mxu3  ;;  %v2631_v10 = vadd.f32 %v2630_v42, %v6008_v35  ;;  %v3044_v46 = vpop.f32.mrf.mxu0  ;;  %v6220_v42 = vpack.c.bf16 %v2723_v24, %v2722_v11 }
 0x33a   : > { %v6211_v28 = vpop.f32.mrf.mxu1 }
 0x33b   : > { %v2894_v8 = vadd.f32 %v2820_v34, %v2631_v10  ;;  %6766 = vst [vmem:[#allocation17_spill] sm:$0xff] %v6220_v42  ;;  %v3148_v34 = vld [vmem:[#allocation2 + $0x49] sm:$0xff] }
 0x33d   : > { %v6213_v6 = vadd.f32 %v3042_v52, %v2894_v8  ;;  %v6224_v52 = vpack.c.bf16 %v3149_v62, %v3148_v34  ;;  %v2724_v34 = vld [vmem:[#allocation2 + $0x122] sm:$0xff] }
 0x340   : > { %v2632_v51 = vpop.f32.mrf.mxu2 }
 0x341   : > { %v2822_v23 = vpop.f32.mrf.mxu3  ;;  %v2633_v30 = vadd.f32 %v2632_v51, %v6025_v49  ;;  %v3047_v54 = vpop.f32.mrf.mxu0 }
 0x342   : > { %v6218_v35 = vpop.f32.mrf.mxu1 }
 0x343   : > { %v2895_v1 = vadd.f32 %v2822_v23, %v2633_v30  ;;  %v2947_v23 = vld [vmem:[#allocation2 + $0x140] sm:$0xff] }
 0x344   : > { %4858 = vmatmul.msk.bf16.gmra.mxu0 %vm2231_vm3, %v6216_v59 }
 0x345   : > { %4824 = vmatmul.msk.bf16.gmra.mxu2 %vm2231_vm3, %v6192_v44  ;;  %v6230_v49 = vadd.f32 %v3044_v46, %v2895_v1  ;;  %4866 = vmatmul.msk.bf16.gmra.mxu1 %vm2231_vm3, %v6224_v52  ;;  %v2946_v44 = vld [vmem:[#allocation2 + $0x138] sm:$0xff] }
 0x346   : > { %4841 = vmatmul.msk.bf16.gmra.mxu3 %vm2231_vm3, %v6220_v42  ;;  %v2725_v42 = vld [vmem:[#allocation2 + $0x12a] sm:$0xff]  ;;  %v6240_v61 = vpack.c.bf16 %v2947_v23, %v2946_v44 }
 0x348   : > { %v2635_v56 = vpop.f32.mrf.mxu2  ;;  %6767 = vst [vmem:[#allocation18_spill] sm:$0xff] %v6240_v61 }
 0x349   : > { %v2825_v24 = vpop.f32.mrf.mxu3  ;;  %v2636_v10 = vadd.f32 %v2635_v56, %v6033_v18  ;;  %v3049_v8 = vpop.f32.mrf.mxu0  ;;  %v6244_v56 = vpack.c.bf16 %v2725_v42, %v2724_v34 }
 0x34a   : > { %v6235_v51 = vpop.f32.mrf.mxu1 }
 0x34b   : > { %v2896_v55 = vadd.f32 %v2825_v24, %v2636_v10  ;;  %6768 = vst [vmem:[#allocation19_spill] sm:$0xff] %v6244_v56  ;;  %v3150_v24 = vld [vmem:[#allocation2 + $0x61] sm:$0xff] }
 0x34d   : > { %v6237_v62 = vadd.f32 %v3047_v54, %v2896_v55  ;;  %v6248_v54 = vpack.c.bf16 %v3151_v0, %v3150_v24  ;;  %v2726_v24 = vld [vmem:[#allocation2 + $0x13a] sm:$0xff] }
 0x350   : > { %v2637_v11 = vpop.f32.mrf.mxu2 }
 0x351   : > { %v2827_v30 = vpop.f32.mrf.mxu3  ;;  %v2638_v1 = vadd.f32 %v2637_v11, %v6050_v12  ;;  %v3052_v46 = vpop.f32.mrf.mxu0 }
 0x352   : > { %v6242_v18 = vpop.f32.mrf.mxu1 }
 0x353   : > { %v2897_v3 = vadd.f32 %v2827_v30, %v2638_v1  ;;  %v2949_v30 = vld [vmem:[#allocation2 + $0x158] sm:$0xff] }
 0x354   : > { %4859 = vmatmul.msk.bf16.gmra.mxu0 %vm2231_vm3, %v6240_v61 }
 0x355   : > { %4825 = vmatmul.msk.bf16.gmra.mxu2 %vm2231_vm3, %v6216_v59  ;;  %v6254_v12 = vadd.f32 %v3049_v8, %v2897_v3  ;;  %4867 = vmatmul.msk.bf16.gmra.mxu1 %vm2231_vm3, %v6248_v54  ;;  %v2948_v59 = vld [vmem:[#allocation2 + $0x150] sm:$0xff] }
 0x356   : > { %4842 = vmatmul.msk.bf16.gmra.mxu3 %vm2231_vm3, %v6244_v56  ;;  %v2727_v56 = vld [vmem:[#allocation2 + $0x142] sm:$0xff]  ;;  %v6264_v4 = vpack.c.bf16 %v2949_v30, %v2948_v59  ;;  %v2951_v30 = vld [vmem:[#allocation2 + $0x170] sm:$0xff] }
 0x358   : > { %v2640_v44 = vpop.f32.mrf.mxu2  ;;  %6769 = vst [vmem:[#allocation20_spill] sm:$0xff] %v6264_v4 }
 0x359   : > { %v2830_v42 = vpop.f32.mrf.mxu3  ;;  %v2641_v10 = vadd.f32 %v2640_v44, %v6058_v26  ;;  %v3054_v55 = vpop.f32.mrf.mxu0  ;;  %v6268_v26 = vpack.c.bf16 %v2727_v56, %v2726_v24  ;;  %v2728_v24 = vld [vmem:[#allocation2 + $0x152] sm:$0xff] }
 0x35a   : > { %v6259_v11 = vpop.f32.mrf.mxu1 }
 0x35b   : > { %v2898_v23 = vadd.f32 %v2830_v42, %v2641_v10  ;;  %6770 = vst [vmem:[#allocation21_spill] sm:$0xff] %v6268_v26 }
 0x35d   : > { %v6261_v0 = vadd.f32 %v3052_v46, %v2898_v23 }
 0x360   : > { %v2642_v34 = vpop.f32.mrf.mxu2 }
 0x361   : > { %v2832_v1 = vpop.f32.mrf.mxu3  ;;  %v2643_v3 = vadd.f32 %v2642_v34, %v6075_v31  ;;  %v3057_v8 = vpop.f32.mrf.mxu0 }
 0x362   : > { %v6266_v7 = vpop.f32.mrf.mxu1 }
 0x363   : > { %v2899_v37 = vadd.f32 %v2832_v1, %v2643_v3  ;;  %v2729_v3 = vld [vmem:[#allocation2 + $0x15a] sm:$0xff] }
 0x364   : > { %4860 = vmatmul.msk.bf16.gmra.mxu0 %vm2231_vm3, %v6264_v4 }
 0x365   : > { %4826 = vmatmul.msk.bf16.gmra.mxu2 %vm2231_vm3, %v6240_v61  ;;  %v6276_v46 = vadd.f32 %v3054_v55, %v2899_v37  ;;  %4868 = vmatmul.msk.bf16.gmra.mxu1 %vm2231_vm3, %v5906_v22 }
 0x366   : > { %4843 = vmatmul.msk.bf16.gmra.mxu3 %vm2231_vm3, %v6268_v26  ;;  %v2950_v26 = vld [vmem:[#allocation2 + $0x168] sm:$0xff] }
 0x367   : > { %6771 = vst [vmem:[#allocation22_spill] sm:$0xff] %v6276_v46  ;;  %v6286_v22 = vpack.c.bf16 %v2951_v30, %v2950_v26 }
 0x368   : > { %v2645_v31 = vpop.f32.mrf.mxu2 }
 0x369   : > { %v2835_v59 = vpop.f32.mrf.mxu3  ;;  %v2646_v44 = vadd.f32 %v2645_v31, %v6083_v25  ;;  %v3059_v56 = vpop.f32.mrf.mxu0  ;;  %v6290_v25 = vpack.c.bf16 %v2729_v3, %v2728_v24  ;;  %v2730_v3 = vld [vmem:[#allocation2 + $0x16a] sm:$0xff] }
 0x36a   : > { %v6281_v10 = vpop.f32.mrf.mxu1 }
 0x36b   : > { %v2900_v42 = vadd.f32 %v2835_v59, %v2646_v44  ;;  %6772 = vst [vmem:[#allocation23_spill] sm:$0xff] %v6290_v25 }
 0x36d   : > { %v6283_v23 = vadd.f32 %v3057_v8, %v2900_v42 }
 0x370   : > { %v2647_v34 = vpop.f32.mrf.mxu2 }
 0x371   : > { %v2837_v1 = vpop.f32.mrf.mxu3  ;;  %v2648_v37 = vadd.f32 %v2647_v34, %v6100_v60  ;;  %v3062_v55 = vpop.f32.mrf.mxu0  ;;  %v2953_v34 = vld [vmem:[#allocation2 + $0x188] sm:$0xff] }
 0x372   : > { %v6288_v46 = vpop.f32.mrf.mxu1 }
 0x373   : > { %v2901_v61 = vadd.f32 %v2837_v1, %v2648_v37  ;;  %v2731_v37 = vld [vmem:[#allocation2 + $0x172] sm:$0xff] }
 0x374   : > { %4861 = vmatmul.msk.bf16.gmra.mxu0 %vm2231_vm3, %v6286_v22 }
 0x375   : > { %4827 = vmatmul.msk.bf16.gmra.mxu2 %vm2231_vm3, %v6264_v4  ;;  %v6298_v8 = vadd.f32 %v3059_v56, %v2901_v61  ;;  %4869 = vmatmul.msk.bf16.gmra.mxu1 %vm2231_vm3, %v5927_v13 }
 0x376   : > { %4844 = vmatmul.msk.bf16.gmra.mxu3 %vm2231_vm3, %v6290_v25  ;;  %v2952_v25 = vld [vmem:[#allocation2 + $0x180] sm:$0xff] }
 0x377   : > { %6773 = vst [vmem:[#allocation24_spill] sm:$0xff] %v6298_v8  ;;  %v6308_v13 = vpack.c.bf16 %v2953_v34, %v2952_v25 }
 0x378   : > { %v2650_v60 = vpop.f32.mrf.mxu2 }
 0x379   : > { %v2840_v26 = vpop.f32.mrf.mxu3  ;;  %v2651_v31 = vadd.f32 %v2650_v60, %v6116_v36  ;;  %v3064_v59 = vpop.f32.mrf.mxu0  ;;  %v6312_v36 = vpack.c.bf16 %v2731_v37, %v2730_v3 }
 0x37a   : > { %v6303_v42 = vpop.f32.mrf.mxu1 }
 0x37b   : > { %v2902_v44 = vadd.f32 %v2840_v26, %v2651_v31 }
 0x37d   : > { %v6305_v30 = vadd.f32 %v3062_v55, %v2902_v44 }
 0x380   : > { %v2652_v1 = vpop.f32.mrf.mxu2 }
 0x381   : > { %v2842_v24 = vpop.f32.mrf.mxu3  ;;  %v2653_v61 = vadd.f32 %v2652_v1, %v6143_v19  ;;  %v3067_v56 = vpop.f32.mrf.mxu0 }
 0x382   : > { %v6310_v8 = vpop.f32.mrf.mxu1 }
 0x383   : > { %v2903_v4 = vadd.f32 %v2842_v24, %v2653_v61 }
 0x384   : > { %4862 = vmatmul.msk.bf16.gmra.mxu0 %vm2231_vm3, %v6308_v13 }
 0x385   : > { %4828 = vmatmul.msk.bf16.gmra.mxu2 %vm2231_vm3, %v6286_v22  ;;  %v6320_v55 = vadd.f32 %v3064_v59, %v2903_v4  ;;  %4870 = vmatmul.msk.bf16.gmra.mxu1 %vm2231_vm3, %v5941_v57 }
 0x386   : > { %4845 = vmatmul.msk.bf16.gmra.mxu3 %vm2231_vm3, %v6312_v36 }
 0x388   : > { %v2655_v19 = vpop.f32.mrf.mxu2 }
 0x389   : > { %v2845_v25 = vpop.f32.mrf.mxu3  ;;  %v2656_v60 = vadd.f32 %v2655_v19, %v6150_v5  ;;  %v3069_v26 = vpop.f32.mrf.mxu0 }
 0x38a   : > { %v6325_v44 = vpop.f32.mrf.mxu1 }
 0x38b   : > { %v2904_v31 = vadd.f32 %v2845_v25, %v2656_v60 }
 0x38d   : > { %v6327_v34 = vadd.f32 %v3067_v56, %v2904_v31 }
 0x390   : > { %v2657_v1 = vpop.f32.mrf.mxu2 }
 0x391   : > { %v2847_v24 = vpop.f32.mrf.mxu3  ;;  %v2658_v3 = vadd.f32 %v2657_v1, %v6166_v9  ;;  %v3072_v37 = vpop.f32.mrf.mxu0 }
 0x392   : > { %v6330_v59 = vpop.f32.mrf.mxu1 }
 0x393   : > { %v2905_v4 = vadd.f32 %v2847_v24, %v2658_v3 }
 0x394   : > { %4915 = vmatmul.msk.bf16.vlgmr.msra.gmra.mxu0 %vm2231_vm3, %v6200_v14 }
 0x395   : > { %4881 = vmatmul.msk.bf16.vlgmr.msra.gmra.mxu2 %vm2231_vm3, %v5963_v29  ;;  %v6338_v57 = vadd.f32 %v3069_v26, %v2905_v4  ;;  %4871 = vmatmul.msk.bf16.gmra.mxu1 %vm2231_vm3, %v5961_v48 }
 0x396   : > { %4898 = vmatmul.msk.bf16.vlgmr.msra.gmra.mxu3 %vm2231_vm3, %v5958_v50 }
 0x398   : > { %v2660_v5 = vpop.f32.mrf.mxu2 }
 0x399   : > { %v2850_v9 = vpop.f32.mrf.mxu3  ;;  %v2661_v61 = vadd.f32 %v2660_v5, %v6173_v58  ;;  %v3074_v56 = vpop.f32.mrf.mxu0 }
 0x39a   : > { %v6343_v25 = vpop.f32.mrf.mxu1 }
 0x39b   : > { %v2906_v19 = vadd.f32 %v2850_v9, %v2661_v61 }
 0x39d   : > { %v6345_v14 = vadd.f32 %v3072_v37, %v2906_v19 }
 0x3a0   : > { %v2662_v60 = vpop.f32.mrf.mxu2 }
 0x3a1   : > { %v2852_v29 = vpop.f32.mrf.mxu3  ;;  %v2663_v31 = vadd.f32 %v2662_v60, %v6187_v41  ;;  %v3077_v50 = vpop.f32.mrf.mxu0 }
 0x3a2   : > { %v3254_v1 = vpop.f32.mrf.mxu1 }
 0x3a3   : > { %v2907_v26 = vadd.f32 %v2852_v29, %v2663_v31  ;;  %v6349_v24 = vadd.f32 %v3254_v1, %v6168_v15 }
 0x3a4   : > { %4916 = vmatmul.msk.bf16.gmra.mxu0 %vm2231_vm3, %v6224_v52 }
 0x3a5   : > { %4882 = vmatmul.msk.bf16.gmra.mxu2 %vm2231_vm3, %v5987_v63  ;;  %v6357_v48 = vadd.f32 %v3074_v56, %v2907_v26  ;;  %4872 = vmatmul.msk.bf16.gmra.mxu1 %vm2231_vm3, %v5985_v16 }
 0x3a6   : > { %4899 = vmatmul.msk.bf16.gmra.mxu3 %vm2231_vm3, %v5980_v53 }
 0x3a8   : > { %v2665_v58 = vpop.f32.mrf.mxu2 }
 0x3a9   : > { %v2855_v41 = vpop.f32.mrf.mxu3  ;;  %v2666_v3 = vadd.f32 %v2665_v58, %v6194_v32  ;;  %v3079_v15 = vpop.f32.mrf.mxu0 }
 0x3aa   : > { %v3256_v4 = vpop.f32.mrf.mxu1 }
 0x3ab   : > { %v2908_v37 = vadd.f32 %v2855_v41, %v2666_v3  ;;  %v6363_v52 = vadd.f32 %v3256_v4, %v6183_v17  ;;  %v3817_v41 = vld [vmem:[#allocation2 + $0x79] sm:$0xff] }
 0x3ad   : > { %v6365_v5 = vadd.f32 %v3077_v50, %v2908_v37 }
 0x3b0   : > { %v2667_v63 = vpop.f32.mrf.mxu2 }
 0x3b1   : > { %v2857_v9 = vpop.f32.mrf.mxu3  ;;  %v2668_v53 = vadd.f32 %v2667_v63, %v6211_v28  ;;  %v3082_v61 = vpop.f32.mrf.mxu0 }
 0x3b2   : > { %v3259_v19 = vpop.f32.mrf.mxu1 }
 0x3b3   : > { %v2909_v56 = vadd.f32 %v2857_v9, %v2668_v53  ;;  %v6369_v16 = vadd.f32 %v3259_v19, %v6189_v21 }
 0x3b4   : > { %4917 = vmatmul.msk.bf16.gmra.mxu0 %vm2231_vm3, %v6248_v54 }
 0x3b5   : > { %4883 = vmatmul.msk.bf16.gmra.mxu2 %vm2231_vm3, %v6012_v39  ;;  %v6377_v17 = vadd.f32 %v3079_v15, %v2909_v56  ;;  %4873 = vmatmul.msk.bf16.gmra.mxu1 %vm2231_vm3, %v6010_v38  ;;  %v3818_v39 = vld [vmem:[#allocation2 + $0x81] sm:$0xff] }
 0x3b6   : > { %4900 = vmatmul.msk.bf16.gmra.mxu3 %vm2231_vm3, %v6005_v43  ;;  %v3846_v38 = vpack.c.bf16 %v3818_v39, %v3817_v41 }
 0x3b8   : > { %v2670_v32 = vpop.f32.mrf.mxu2 }
 0x3b9   : > { %v2860_v28 = vpop.f32.mrf.mxu3  ;;  %v2671_v60 = vadd.f32 %v2670_v32, %v6218_v35  ;;  %v3084_v21 = vpop.f32.mrf.mxu0 }
 0x3ba   : > { %v3261_v31 = vpop.f32.mrf.mxu1 }
 0x3bb   : > { %v2910_v29 = vadd.f32 %v2860_v28, %v2671_v60  ;;  %v6383_v54 = vadd.f32 %v3261_v31, %v6206_v33  ;;  %v3819_v28 = vld [vmem:[#allocation2 + $0x91] sm:$0xff] }
 0x3bd   : > { %v6385_v50 = vadd.f32 %v3082_v61, %v2910_v29 }
 0x3c0   : > { %v2672_v26 = vpop.f32.mrf.mxu2 }
 0x3c1   : > { %v2862_v43 = vpop.f32.mrf.mxu3  ;;  %v2673_v1 = vadd.f32 %v2672_v26, %v6235_v51  ;;  %v3087_v58 = vpop.f32.mrf.mxu0 }
 0x3c2   : > { %v3264_v15 = vpop.f32.mrf.mxu1 }
 0x3c3   : > { %v2911_v3 = vadd.f32 %v2862_v43, %v2673_v1  ;;  %v6389_v35 = vadd.f32 %v3264_v15, %v6213_v6 }
 0x3c4   : > { %4918 = vmatmul.msk.bf16.gmra.mxu0 %vm2231_vm3, %v3846_v38 }
 0x3c5   : > { %4884 = vmatmul.msk.bf16.gmra.mxu2 %vm2231_vm3, %v6037_v47  ;;  %v6396_v33 = vadd.f32 %v3084_v21, %v2911_v3  ;;  %4874 = vmatmul.msk.bf16.gmra.mxu1 %vm2231_vm3, %v6035_v2  ;;  %v3820_v47 = vld [vmem:[#allocation2 + $0x99] sm:$0xff]  ;;  %v3821_v3 = vld [vmem:[#allocation2 + $0xa9] sm:$0xff] }
 0x3c6   : > { %4901 = vmatmul.msk.bf16.gmra.mxu3 %vm2231_vm3, %v6030_v20  ;;  %v3847_v2 = vpack.c.bf16 %v3820_v47, %v3819_v28  ;;  %v3824_v28 = vld [vmem:[#allocation2 + $0xc9] sm:$0xff] }
 0x3c8   : > { %v2675_v51 = vpop.f32.mrf.mxu2 }
 0x3c9   : > { %v2865_v37 = vpop.f32.mrf.mxu3  ;;  %v2676_v4 = vadd.f32 %v2675_v51, %v6242_v18  ;;  %v3089_v63 = vpop.f32.mrf.mxu0 }
 0x3ca   : > { %v3266_v9 = vpop.f32.mrf.mxu1 }
 0x3cb   : > { %v2912_v6 = vadd.f32 %v2865_v37, %v2676_v4  ;;  %v6402_v53 = vadd.f32 %v3266_v9, %v6230_v49  ;;  %v6774_v37 = vld [vmem:[#allocation6_spill] sm:$0xff] }
 0x3cd   : > { %v6404_v61 = vadd.f32 %v3087_v58, %v2912_v6 }
 0x3d0   : > { %v2677_v56 = vpop.f32.mrf.mxu2 }
 0x3d1   : > { %v2867_v20 = vpop.f32.mrf.mxu3  ;;  %v2678_v19 = vadd.f32 %v2677_v56, %v6259_v11  ;;  %v3092_v32 = vpop.f32.mrf.mxu0 }
 0x3d2   : > { %v3269_v21 = vpop.f32.mrf.mxu1 }
 0x3d3   : > { %v2913_v60 = vadd.f32 %v2867_v20, %v2678_v19  ;;  %v6408_v18 = vadd.f32 %v3269_v21, %v6237_v62  ;;  %v6777_v20 = vld [vmem:[#allocation22_spill] sm:$0xff] }
 0x3d4   : > { %4919 = vmatmul.msk.bf16.gmra.mxu0 %vm2231_vm3, %v3847_v2 }
 0x3d5   : > { %4885 = vmatmul.msk.bf16.gmra.mxu2 %vm2231_vm3, %v6062_v45  ;;  %v6415_v49 = vadd.f32 %v3089_v63, %v2913_v60  ;;  %4875 = vmatmul.msk.bf16.gmra.mxu1 %vm2231_vm3, %v6060_v40  ;;  %v3822_v45 = vld [vmem:[#allocation2 + $0xb1] sm:$0xff]  ;;  %v6776_v63 = vld [vmem:[#allocation5_spill] sm:$0xff] }
 0x3d6   : > { %4902 = vmatmul.msk.bf16.gmra.mxu3 %vm2231_vm3, %v6055_v27  ;;  %v3848_v40 = vpack.c.bf16 %v3822_v45, %v3821_v3  ;;  %v6779_v45 = vld [vmem:[#allocation8_spill] sm:$0xff] }
 0x3d8   : > { %v2680_v11 = vpop.f32.mrf.mxu2 }
 0x3d9   : > { %v2870_v29 = vpop.f32.mrf.mxu3  ;;  %v2681_v31 = vadd.f32 %v2680_v11, %v6266_v7  ;;  %v3094_v39 = vpop.f32.mrf.mxu0 }
 0x3da   : > { %v3271_v26 = vpop.f32.mrf.mxu1 }
 0x3db   : > { %v2914_v62 = vadd.f32 %v2870_v29, %v2681_v31  ;;  %v6421_v43 = vadd.f32 %v3271_v26, %v6254_v12  ;;  %v6775_v12 = vld [vmem:[#allocation7_spill] sm:$0xff]  ;;  %v3823_v29 = vld [vmem:[#allocation2 + $0xc1] sm:$0xff] }
 0x3dc   : > { %v3849_v31 = vpack.c.bf16 %v3824_v28, %v3823_v29  ;;  %v6778_v26 = vld [vmem:[#allocation10_spill] sm:$0xff]  ;;  %v6782_v28 = vld [vmem:[#allocation11_spill] sm:$0xff] }
 0x3dd   : > { %v6423_v1 = vadd.f32 %v3092_v32, %v2914_v62 }
 0x3e0   : > { %v2682_v58 = vpop.f32.mrf.mxu2 }
 0x3e1   : > { %v2872_v27 = vpop.f32.mrf.mxu3  ;;  %v2683_v41 = vadd.f32 %v2682_v58, %v6281_v10  ;;  %v3097_v38 = vpop.f32.mrf.mxu0 }
 0x3e2   : > { %v3274_v51 = vpop.f32.mrf.mxu1 }
 0x3e3   : > { %v2915_v15 = vadd.f32 %v2872_v27, %v2683_v41  ;;  %v6427_v7 = vadd.f32 %v3274_v51, %v6261_v0  ;;  %v6780_v27 = vld [vmem:[#allocation9_spill] sm:$0xff] }
 0x3e4   : > { %4920 = vmatmul.msk.bf16.gmra.mxu0 %vm2231_vm3, %v3848_v40 }
 0x3e5   : > { %4886 = vmatmul.msk.bf16.gmra.mxu2 %vm2231_vm3, %v6774_v37  ;;  %v6434_v4 = vadd.f32 %v3094_v39, %v2915_v15  ;;  %4876 = vmatmul.msk.bf16.gmra.mxu1 %vm2231_vm3, %v6776_v63  ;;  %v6781_v15 = vld [vmem:[#allocation24_spill] sm:$0xff] }
 0x3e6   : > { %4903 = vmatmul.msk.bf16.gmra.mxu3 %vm2231_vm3, %v6775_v12  ;;  %v3826_v12 = vld [vmem:[#allocation2 + $0xe1] sm:$0xff] }
 0x3e8   : > { %v2685_v10 = vpop.f32.mrf.mxu2 }
 0x3e9   : > { %v2875_v6 = vpop.f32.mrf.mxu3  ;;  %v2686_v9 = vadd.f32 %v2685_v10, %v6288_v46  ;;  %v3099_v47 = vpop.f32.mrf.mxu0 }
 0x3ea   : > { %v3276_v56 = vpop.f32.mrf.mxu1 }
 0x3eb   : > { %v2916_v0 = vadd.f32 %v2875_v6, %v2686_v9  ;;  %v6440_v19 = vadd.f32 %v3276_v56, %v6777_v20 }
 0x3ed   : > { %v6442_v32 = vadd.f32 %v3097_v38, %v2916_v0 }
 0x3f0   : > { %v2687_v2 = vpop.f32.mrf.mxu2 }
 0x3f1   : > { %v2877_v60 = vpop.f32.mrf.mxu3  ;;  %v2688_v21 = vadd.f32 %v2687_v2, %v6303_v42  ;;  %v3102_v11 = vpop.f32.mrf.mxu0  ;;  %v6783_v2 = vld [vmem:[#allocation3_spill] sm:$0xff] }
 0x3f2   : > { %v3279_v62 = vpop.f32.mrf.mxu1 }
 0x3f3   : > { %v2917_v39 = vadd.f32 %v2877_v60, %v2688_v21  ;;  %v6446_v46 = vadd.f32 %v3279_v62, %v6283_v23  ;;  %v6784_v21 = vld [vmem:[#allocation4_spill] sm:$0xff] }
 0x3f4   : > { %4921 = vmatmul.msk.bf16.gmra.mxu0 %vm2231_vm3, %v3849_v31 }
 0x3f5   : > { %4887 = vmatmul.msk.bf16.gmra.mxu2 %vm2231_vm3, %v6778_v26  ;;  %v6453_v58 = vadd.f32 %v3099_v47, %v2917_v39  ;;  %4877 = vmatmul.msk.bf16.gmra.mxu1 %vm2231_vm3, %v6780_v27  ;;  %v3825_v47 = vld [vmem:[#allocation2 + $0xd9] sm:$0xff] }
 0x3f6   : > { %4904 = vmatmul.msk.bf16.gmra.mxu3 %vm2231_vm3, %v6779_v45  ;;  %v3850_v0 = vpack.c.bf16 %v3826_v12, %v3825_v47  ;;  %v3828_v45 = vld [vmem:[#allocation2 + $0xf9] sm:$0xff] }
 0x3f8   : > { %v2690_v42 = vpop.f32.mrf.mxu2 }
 0x3f9   : > { %v2880_v41 = vpop.f32.mrf.mxu3  ;;  %v2691_v38 = vadd.f32 %v2690_v42, %v6310_v8  ;;  %v3104_v3 = vpop.f32.mrf.mxu0 }
 0x3fa   : > { %v3281_v40 = vpop.f32.mrf.mxu1 }
 0x3fb   : > { %v2918_v23 = vadd.f32 %v2880_v41, %v2691_v38  ;;  %v6459_v51 = vadd.f32 %v3281_v40, %v6781_v15 }
 0x3fd   : > { %v6461_v37 = vadd.f32 %v3102_v11, %v2918_v23  ;;  %v3827_v23 = vld [vmem:[#allocation2 + $0xf1] sm:$0xff] }
 0x3fe   : > { %v3851_v40 = vpack.c.bf16 %v3828_v45, %v3827_v23  ;;  %v4034_v45 = vld [vmem:[#allocation2 + $0x3a] sm:$0xff] }
 0x400   : > { %v2692_v63 = vpop.f32.mrf.mxu2 }
 0x401   : > { %v2882_v10 = vpop.f32.mrf.mxu3  ;;  %v2693_v6 = vadd.f32 %v2692_v63, %v6325_v44  ;;  %v3107_v9 = vpop.f32.mrf.mxu0 }
 0x402   : > { %v3284_v20 = vpop.f32.mrf.mxu1 }
 0x403   : > { %v2919_v56 = vadd.f32 %v2882_v10, %v2693_v6  ;;  %v6465_v8 = vadd.f32 %v3284_v20, %v6305_v30  ;;  %v6786_v6 = vld [vmem:[#allocation12_spill] sm:$0xff] }
 0x404   : > { %4922 = vmatmul.msk.bf16.gmra.mxu0 %vm2231_vm3, %v3850_v0 }
 0x405   : > { %4888 = vmatmul.msk.bf16.gmra.mxu2 %vm2231_vm3, %v6782_v28  ;;  %v6472_v60 = vadd.f32 %v3104_v3, %v2919_v56  ;;  %4878 = vmatmul.msk.bf16.gmra.mxu1 %vm2231_vm3, %v6784_v21  ;;  %v3175_v3 = vld [vmem:[#allocation2 + $0x189] sm:$0xff]  ;;  %v3830_v21 = vld [vmem:[#allocation2 + $0x111] sm:$0xff] }
 0x406   : > { %4905 = vmatmul.msk.bf16.gmra.mxu3 %vm2231_vm3, %v6783_v2 }
 0x408   : > { %v2695_v44 = vpop.f32.mrf.mxu2 }
 0x409   : > { %v2885_v11 = vpop.f32.mrf.mxu3  ;;  %v2696_v29 = vadd.f32 %v2695_v44, %v6330_v59  ;;  %v3109_v31 = vpop.f32.mrf.mxu0  ;;  %v3174_v59 = vld [vmem:[#allocation2 + $0x181] sm:$0xff] }
 0x40a   : > { %v3286_v39 = vpop.f32.mrf.mxu1  ;;  %v6486_v10 = vpack.c.bf16 %v3175_v3, %v3174_v59  ;;  %v6788_v3 = vld [vmem:[#allocation14_spill] sm:$0xff] }
 0x40b   : > { %v2920_v30 = vadd.f32 %v2885_v11, %v2696_v29  ;;  %v6478_v62 = vadd.f32 %v3286_v39, %v6320_v55  ;;  %v6785_v55 = vld [vmem:[#allocation13_spill] sm:$0xff]  ;;  %v4033_v39 = vld [vmem:[#allocation2 + $0x32] sm:$0xff] }
 0x40d   : > { %v6480_v26 = vadd.f32 %v3107_v9, %v2920_v30  ;;  %v3829_v30 = vld [vmem:[#allocation2 + $0x109] sm:$0xff] }
 0x410   : > { %v2697_v27 = vpop.f32.mrf.mxu2 }
 0x411   : > { %v2887_v42 = vpop.f32.mrf.mxu3  ;;  %v2698_v41 = vadd.f32 %v2697_v27, %v6343_v25  ;;  %v3921_v38 = vpop.f32.mrf.mxu0  ;;  %v3852_v27 = vpack.c.bf16 %v3830_v21, %v3829_v30  ;;  %v4036_v21 = vld [vmem:[#allocation2 + $0x52] sm:$0xff] }
 0x412   : > { %v3289_v12 = vpop.f32.mrf.mxu1 }
 0x413   : > { %v2921_v15 = vadd.f32 %v2887_v42, %v2698_v41  ;;  %v6484_v63 = vadd.f32 %v3289_v12, %v6327_v34 }
 0x414   : > { %4923 = vmatmul.msk.bf16.gmra.mxu0 %vm2231_vm3, %v3851_v40 }
 0x415   : > { %4889 = vmatmul.msk.bf16.gmra.mxu2 %vm2231_vm3, %v6785_v55  ;;  %v6493_v25 = vadd.f32 %v3109_v31, %v2921_v15  ;;  %4879 = vmatmul.msk.bf16.gmra.mxu1 %vm2231_vm3, %v6486_v10 }
 0x416   : > { %4906 = vmatmul.msk.bf16.gmra.mxu3 %vm2231_vm3, %v6786_v6 }
 0x418   : > { %v3476_v9 = vpop.f32.mrf.mxu2 }
 0x419   : > { %v3699_v47 = vpop.f32.mrf.mxu3  ;;  %v3556_v34 = vadd.f32 %v3476_v9, %v6349_v24  ;;  %v3923_v0 = vpop.f32.mrf.mxu0  ;;  %v3832_v9 = vld [vmem:[#allocation2 + $0x129] sm:$0xff] }
 0x41a   : > { %v3291_v20 = vpop.f32.mrf.mxu1 }
 0x41b   : > { %v3779_v56 = vadd.f32 %v3699_v47, %v3556_v34  ;;  %v6499_v28 = vadd.f32 %v3291_v20, %v6338_v57  ;;  %v4065_v57 = vpack.c.bf16 %v4034_v45, %v4033_v39  ;;  %v4035_v20 = vld [vmem:[#allocation2 + $0x4a] sm:$0xff]  ;;  %v6790_v39 = vld [vmem:[#allocation16_spill] sm:$0xff] }
 0x41d   : > { %v6501_v2 = vadd.f32 %v3921_v38, %v3779_v56  ;;  %v6787_v38 = vld [vmem:[#allocation15_spill] sm:$0xff]  ;;  %v3831_v56 = vld [vmem:[#allocation2 + $0x121] sm:$0xff] }
 0x420   : > { %v3478_v44 = vpop.f32.mrf.mxu2 }
 0x421   : > { %v3701_v11 = vpop.f32.mrf.mxu3  ;;  %v3557_v29 = vadd.f32 %v3478_v44, %v6363_v52  ;;  %v3926_v31 = vpop.f32.mrf.mxu0  ;;  %v3853_v44 = vpack.c.bf16 %v3832_v9, %v3831_v56  ;;  %v4038_v9 = vld [vmem:[#allocation2 + $0x6a] sm:$0xff] }
 0x422   : > { %v3294_v24 = vpop.f32.mrf.mxu1  ;;  %v6791_v56 = vld [vmem:[#allocation19_spill] sm:$0xff] }
 0x423   : > { %v3780_v42 = vadd.f32 %v3701_v11, %v3557_v29  ;;  %v6505_v41 = vadd.f32 %v3294_v24, %v6345_v14 }
 0x424   : > { %4924 = vmatmul.msk.bf16.gmra.mxu0 %vm2231_vm3, %v3852_v27 }
 0x425   : > { %4890 = vmatmul.msk.bf16.gmra.mxu2 %vm2231_vm3, %v6787_v38  ;;  %v6512_v52 = vadd.f32 %v3923_v0, %v3780_v42  ;;  %4932 = vmatmul.msk.bf16.vlgmr.msra.gmra.mxu1 %vm2231_vm3, %v4065_v57 }
 0x426   : > { %4907 = vmatmul.msk.bf16.gmra.mxu3 %vm2231_vm3, %v6788_v3 }
 0x428   : > { %v3481_v23 = vpop.f32.mrf.mxu2 }
 0x429   : > { %v3704_v40 = vpop.f32.mrf.mxu3  ;;  %v3558_v15 = vadd.f32 %v3481_v23, %v6369_v16  ;;  %v3928_v59 = vpop.f32.mrf.mxu0  ;;  %v3834_v23 = vld [vmem:[#allocation2 + $0x141] sm:$0xff] }
 0x42a   : > { %v3296_v14 = vpop.f32.mrf.mxu1 }
 0x42b   : > { %v3781_v12 = vadd.f32 %v3704_v40, %v3558_v15  ;;  %v6517_v55 = vadd.f32 %v3296_v14, %v6357_v48  ;;  %v4066_v48 = vpack.c.bf16 %v4036_v21, %v4035_v20  ;;  %v3833_v14 = vld [vmem:[#allocation2 + $0x139] sm:$0xff]  ;;  %v6792_v20 = vld [vmem:[#allocation18_spill] sm:$0xff] }
 0x42d   : > { %v6519_v6 = vadd.f32 %v3926_v31, %v3781_v12  ;;  %v6789_v31 = vld [vmem:[#allocation17_spill] sm:$0xff] }
 0x430   : > { %v3483_v47 = vpop.f32.mrf.mxu2 }
 0x431   : > { %v3706_v34 = vpop.f32.mrf.mxu3  ;;  %v3559_v0 = vadd.f32 %v3483_v47, %v6383_v54  ;;  %v3931_v30 = vpop.f32.mrf.mxu0  ;;  %v3854_v47 = vpack.c.bf16 %v3834_v23, %v3833_v14  ;;  %v6793_v14 = vld [vmem:[#allocation21_spill] sm:$0xff] }
 0x432   : > { %v3299_v29 = vpop.f32.mrf.mxu1 }
 0x433   : > { %v3782_v11 = vadd.f32 %v3706_v34, %v3559_v0  ;;  %v6523_v16 = vadd.f32 %v3299_v29, %v6365_v5 }
 0x434   : > { %4925 = vmatmul.msk.bf16.gmra.mxu0 %vm2231_vm3, %v3853_v44 }
 0x435   : > { %4891 = vmatmul.msk.bf16.gmra.mxu2 %vm2231_vm3, %v6789_v31  ;;  %v6530_v54 = vadd.f32 %v3928_v59, %v3782_v11  ;;  %4933 = vmatmul.msk.bf16.gmra.mxu1 %vm2231_vm3, %v4066_v48  ;;  %v4037_v59 = vld [vmem:[#allocation2 + $0x62] sm:$0xff] }
 0x436   : > { %4908 = vmatmul.msk.bf16.gmra.mxu3 %vm2231_vm3, %v6790_v39  ;;  %v3836_v39 = vld [vmem:[#allocation2 + $0x159] sm:$0xff] }
 0x438   : > { %v3486_v45 = vpop.f32.mrf.mxu2 }
 0x439   : > { %v3709_v27 = vpop.f32.mrf.mxu3  ;;  %v3560_v42 = vadd.f32 %v3486_v45, %v6389_v35  ;;  %v3933_v3 = vpop.f32.mrf.mxu0 }
 0x43a   : > { %v3301_v24 = vpop.f32.mrf.mxu1 }
 0x43b   : > { %v3783_v5 = vadd.f32 %v3709_v27, %v3560_v42  ;;  %v6535_v57 = vadd.f32 %v3301_v24, %v6377_v17  ;;  %v4067_v17 = vpack.c.bf16 %v4038_v9, %v4037_v59  ;;  %v3835_v42 = vld [vmem:[#allocation2 + $0x151] sm:$0xff]  ;;  %v4040_v24 = vld [vmem:[#allocation2 + $0x82] sm:$0xff] }
 0x43c   : > { %v3855_v23 = vpack.c.bf16 %v3836_v39, %v3835_v42  ;;  %v6794_v59 = vld [vmem:[#allocation20_spill] sm:$0xff]  ;;  %v3842_v42 = vld [vmem:[#allocation2 + $0x1a1] sm:$0xff] }
 0x43d   : > { %v6537_v38 = vadd.f32 %v3931_v30, %v3783_v5  ;;  %v4039_v5 = vld [vmem:[#allocation2 + $0x7a] sm:$0xff] }
 0x440   : > { %v3488_v40 = vpop.f32.mrf.mxu2 }
 0x441   : > { %v3711_v15 = vpop.f32.mrf.mxu3  ;;  %v3561_v12 = vadd.f32 %v3488_v40, %v6402_v53  ;;  %v3936_v29 = vpop.f32.mrf.mxu0 }
 0x442   : > { %v3304_v0 = vpop.f32.mrf.mxu1 }
 0x443   : > { %v3784_v34 = vadd.f32 %v3711_v15, %v3561_v12  ;;  %v6541_v35 = vadd.f32 %v3304_v0, %v6385_v50  ;;  %v4041_v0 = vld [vmem:[#allocation2 + $0x92] sm:$0xff] }
 0x444   : > { %4926 = vmatmul.msk.bf16.gmra.mxu0 %vm2231_vm3, %v3854_v47 }
 0x445   : > { %4892 = vmatmul.msk.bf16.gmra.mxu2 %vm2231_vm3, %v6791_v56  ;;  %v6548_v21 = vadd.f32 %v3933_v3, %v3784_v34  ;;  %4934 = vmatmul.msk.bf16.gmra.mxu1 %vm2231_vm3, %v4067_v17  ;;  %v3838_v34 = vld [vmem:[#allocation2 + $0x171] sm:$0xff]  ;;  %v4042_v17 = vld [vmem:[#allocation2 + $0x9a] sm:$0xff] }
 0x446   : > { %4909 = vmatmul.msk.bf16.gmra.mxu3 %vm2231_vm3, %v6792_v20 }
 0x448   : > { %v3491_v53 = vpop.f32.mrf.mxu2 }
 0x449   : > { %v3714_v44 = vpop.f32.mrf.mxu3  ;;  %v3562_v11 = vadd.f32 %v3491_v53, %v6408_v18  ;;  %v3938_v18 = vpop.f32.mrf.mxu0 }
 0x44a   : > { %v3306_v48 = vpop.f32.mrf.mxu1 }
 0x44b   : > { %v3785_v50 = vadd.f32 %v3714_v44, %v3562_v11  ;;  %v6553_v30 = vadd.f32 %v3306_v48, %v6396_v33  ;;  %v4068_v33 = vpack.c.bf16 %v4040_v24, %v4039_v5  ;;  %v4069_v44 = vpack.c.bf16 %v4042_v17, %v4041_v0  ;;  %v6795_v11 = vld [vmem:[#allocation23_spill] sm:$0xff]  ;;  %v3620_v5 = vld [vmem:[#allocation2 + $0x1a0] sm:$0xff] }
 0x44c   : > { %v4044_v48 = vld [vmem:[#allocation2 + $0xb2] sm:$0xff]  ;;  %v3396_v24 = vld [vmem:[#allocation2 + $0x182] sm:$0xff] }
 0x44d   : > { %v6555_v31 = vadd.f32 %v3936_v29, %v3785_v50  ;;  %v4043_v50 = vld [vmem:[#allocation2 + $0xaa] sm:$0xff] }
 0x450   : > { %v3493_v45 = vpop.f32.mrf.mxu2 }
 0x451   : > { %v3563_v27 = vadd.f32 %v3493_v45, %v6421_v43  ;;  %v3716_v3 = vpop.f32.mrf.mxu3  ;;  %v4070_v45 = vpack.c.bf16 %v4044_v48, %v4043_v50 }
 0x452   : > { %v3309_v15 = vpop.f32.mrf.mxu1 }
 0x453   : > { %v3786_v40 = vadd.f32 %v3716_v3, %v3563_v27  ;;  %v6559_v12 = vadd.f32 %v3309_v15, %v6404_v61  ;;  %v3837_v61 = vld [vmem:[#allocation2 + $0x169] sm:$0xff]  ;;  %v3841_v27 = vld [vmem:[#allocation2 + $0x199] sm:$0xff] }
 0x454   : > { %4927 = vmatmul.msk.bf16.gmra.mxu0 %vm2231_vm3, %v3855_v23  ;;  %v3856_v56 = vpack.c.bf16 %v3838_v34, %v3837_v61  ;;  %v3397_v3 = vld [vmem:[#allocation2 + $0x18a] sm:$0xff]  ;;  %v4045_v23 = vld [vmem:[#allocation2 + $0xc2] sm:$0xff] }
 0x455   : > { %4893 = vmatmul.msk.bf16.gmra.mxu2 %vm2231_vm3, %v6793_v14  ;;  %v6566_v43 = vadd.f32 %v3938_v18, %v3786_v40  ;;  %4935 = vmatmul.msk.bf16.gmra.mxu1 %vm2231_vm3, %v4068_v33  ;;  %v4046_v40 = vld [vmem:[#allocation2 + $0xca] sm:$0xff]  ;;  %v6597_v18 = vpack.c.bf16 %v3397_v3, %v3396_v24 }
 0x456   : > { %4910 = vmatmul.msk.bf16.gmra.mxu3 %vm2231_vm3, %v6794_v59  ;;  %v4071_v33 = vpack.c.bf16 %v4046_v40, %v4045_v23  ;;  %v4047_v59 = vld [vmem:[#allocation2 + $0xda] sm:$0xff] }
 0x458   : > { %v3496_v48 = vpop.f32.mrf.mxu2 }
 0x45a   : > { %v3311_v9 = vpop.f32.mrf.mxu1 }
 0x45b   : > { %v6570_v47 = vadd.f32 %v3311_v9, %v6415_v49  ;;  %v4048_v9 = vld [vmem:[#allocation2 + $0xe2] sm:$0xff] }
 0x45c   : > { %v4072_v61 = vpack.c.bf16 %v4048_v9, %v4047_v59 }
 0x462   : > { %v3314_v20 = vpop.f32.mrf.mxu1 }
 0x463   : > { %v6573_v53 = vadd.f32 %v3314_v20, %v6423_v1  ;;  %v4050_v20 = vld [vmem:[#allocation2 + $0xfa] sm:$0xff] }
 0x464   : > { %4928 = vmatmul.msk.bf16.gmra.mxu0 %vm2231_vm3, %v3856_v56  ;;  %v4049_v56 = vld [vmem:[#allocation2 + $0xf2] sm:$0xff] }
 0x465   : > { %4894 = vmatmul.msk.bf16.gmra.mxu2 %vm2231_vm3, %v6795_v11  ;;  %4936 = vmatmul.msk.bf16.gmra.mxu1 %vm2231_vm3, %v4069_v44 }
 0x466   : > { %4911 = vmatmul.msk.bf16.gmra.mxu3 %vm2231_vm3, %v6286_v22 }
 0x46a   : > { %v3316_v49 = vpop.f32.mrf.mxu1 }
 0x46b   : > { %v6582_v29 = vadd.f32 %v3316_v49, %v6434_v4  ;;  %v4073_v49 = vpack.c.bf16 %v4050_v20, %v4049_v56 }
 0x472   : > { %v3319_v39 = vpop.f32.mrf.mxu1 }
 0x473   : > { %v6585_v1 = vadd.f32 %v3319_v39, %v6442_v32  ;;  %v3619_v32 = vld [vmem:[#allocation2 + $0x198] sm:$0xff] }
 0x474   : > { %4929 = vmatmul.msk.bf16.gmra.mxu0 %vm2231_vm3, %v6486_v10  ;;  %v3858_v10 = vpack.c.bf16 %v3842_v42, %v3841_v27  ;;  %v3636_v15 = vpack.c.bf16 %v3620_v5, %v3619_v32  ;;  %v4051_v42 = vld [vmem:[#allocation2 + $0x10a] sm:$0xff]  ;;  %v4052_v32 = vld [vmem:[#allocation2 + $0x112] sm:$0xff]  ;;  %v3941_v5 = vpop.f32.mrf.mxu0 }
 0x475   : > { %4895 = vmatmul.msk.bf16.gmra.mxu2 %vm2231_vm3, %v6312_v36  ;;  %4937 = vmatmul.msk.bf16.gmra.mxu1 %vm2231_vm3, %v4070_v45 }
 0x476   : > { %4912 = vmatmul.msk.bf16.gmra.mxu3 %vm2231_vm3, %v6308_v13 }
 0x47a   : > { %v3321_v22 = vpop.f32.mrf.mxu1 }
 0x47b   : > { %v6595_v4 = vadd.f32 %v3321_v22, %v6453_v58  ;;  %v3719_v22 = vpop.f32.mrf.mxu3 }
 0x482   : > { %v3324_v36 = vpop.f32.mrf.mxu1 }
 0x483   : > { %v6600_v13 = vadd.f32 %v3324_v36, %v6461_v37  ;;  %v3943_v36 = vpop.f32.mrf.mxu0 }
 0x484   : > { %4930 = vmatmul.msk.bf16.gmra.mxu0 %vm2231_vm3, %v3858_v10  ;;  %v4074_v10 = vpack.c.bf16 %v4052_v32, %v4051_v42  ;;  %v4056_v32 = vld [vmem:[#allocation2 + $0x142] sm:$0xff] }
 0x485   : > { %4896 = vmatmul.msk.bf16.gmra.mxu2 %vm2231_vm3, %v6597_v18  ;;  %4938 = vmatmul.msk.bf16.gmra.mxu1 %vm2231_vm3, %v4071_v33 }
 0x486   : > { %4913 = vmatmul.msk.bf16.gmra.mxu3 %vm2231_vm3, %v3636_v15  ;;  %v3721_v15 = vpop.f32.mrf.mxu3 }
 0x48a   : > { %v3326_v58 = vpop.f32.mrf.mxu1 }
 0x48b   : > { %v6608_v14 = vadd.f32 %v3326_v58, %v6472_v60  ;;  %v6620_v60 = vld [vmem:[%s6709_s4] ss:$0 sm:$0xff] }
 0x492   : > { %v3329_v34 = vpop.f32.mrf.mxu1 }
 0x493   : > { %v6611_v37 = vadd.f32 %v3329_v34, %v6480_v26  ;;  %v4053_v34 = vld [vmem:[#allocation2 + $0x122] sm:$0xff] }
 0x495   : > { %4939 = vmatmul.msk.bf16.gmra.mxu1 %vm2231_vm3, %v4072_v61  ;;  %v4054_v61 = vld [vmem:[#allocation2 + $0x12a] sm:$0xff] }
 0x496   : > { %v4075_v20 = vpack.c.bf16 %v4054_v61, %v4053_v34 }
 0x49a   : > { %v3331_v0 = vpop.f32.mrf.mxu1 }
 0x49b   : > { %v6615_v17 = vadd.f32 %v3331_v0, %v6493_v25 }
 0x4a2   : > { %v4143_v44 = vpop.f32.mrf.mxu1 }
 0x4a3   : > { %v4223_v11 = vadd.f32 %v4143_v44, %v6501_v2  ;;  %v3498_v2 = vpop.f32.mrf.mxu2  ;;  %v3946_v44 = vpop.f32.mrf.mxu0 }
 0x4a5   : > { %4940 = vmatmul.msk.bf16.gmra.mxu1 %vm2231_vm3, %v4073_v49  ;;  %v4259_v26 = vadd.f32 %v6620_v60, %v4223_v11 }
 0x4a7   : > { %v4291_v50 = vmax.f32 %v4259_v26, 0.0 }
 0x4a9   : > { %4323 = vxpose.xlu0.b32.start [1/16] (narrow) %v4291_v50, 8 }
 0x4aa   : > { %v4145_v25 = vpop.f32.mrf.mxu1 }
 0x4ab   : > { %v4224_v39 = vadd.f32 %v4145_v25, %v6512_v52  ;;  %v3501_v58 = vpop.f32.mrf.mxu2 }
 0x4ad   : > { %v4260_v45 = vadd.f32 %v6620_v60, %v4224_v39 }
 0x4af   : > { %v4292_v27 = vmax.f32 %v4260_v45, 0.0  ;;  %v6637_v45 = vpop.f32.mrf.mxu0 }
 0x4b1   : > { %4324 = vxpose.xlu0.b32.cont [2/16] (narrow) %v4292_v27, 8 }
 0x4b2   : > { %v4148_v24 = vpop.f32.mrf.mxu1 }
 0x4b3   : > { %v4225_v3 = vadd.f32 %v4148_v24, %v6519_v6  ;;  %v3724_v6 = vpop.f32.mrf.mxu3  ;;  %v3503_v49 = vpop.f32.mrf.mxu2 }
 0x4b5   : > { %4941 = vmatmul.msk.bf16.gmra.mxu1 %vm2231_vm3, %v4074_v10  ;;  %v4261_v23 = vadd.f32 %v6620_v60, %v4225_v3 }
 0x4b7   : > { %v4293_v40 = vmax.f32 %v4261_v23, 0.0 }
 0x4b9   : > { %4325 = vxpose.xlu0.b32.cont [3/16] (narrow) %v4293_v40, 8 }
 0x4ba   : > { %v4150_v52 = vpop.f32.mrf.mxu1 }
 0x4bb   : > { %v4226_v33 = vadd.f32 %v4150_v52, %v6530_v54  ;;  %v3726_v25 = vpop.f32.mrf.mxu3  ;;  %v3506_v42 = vpop.f32.mrf.mxu2  ;;  %v3564_v52 = vadd.f32 %v3496_v48, %v6427_v7 }
 0x4bd   : > { %v4262_v59 = vadd.f32 %v6620_v60, %v4226_v33  ;;  %v3951_v33 = vpop.f32.mrf.mxu0  ;;  %v3787_v61 = vadd.f32 %v3719_v22, %v3564_v52 }
 0x4bf   : > { %v4294_v9 = vmax.f32 %v4262_v59, 0.0 }
 0x4c1   : > { %4326 = vxpose.xlu0.b32.cont [4/16] (narrow) %v4294_v9, 8 }
 0x4c2   : > { %v4153_v0 = vpop.f32.mrf.mxu1 }
 0x4c3   : > { %v4227_v56 = vadd.f32 %v4153_v0, %v6537_v38  ;;  %v4055_v38 = vld [vmem:[#allocation2 + $0x13a] sm:$0xff]  ;;  %v3729_v40 = vpop.f32.mrf.mxu3  ;;  %v3508_v59 = vpop.f32.mrf.mxu2 }
 0x4c4   : > { %v4076_v10 = vpack.c.bf16 %v4056_v32, %v4055_v38  ;;  %v3566_v32 = vadd.f32 %v3501_v58, %v6446_v46 }
 0x4c5   : > { %4942 = vmatmul.msk.bf16.gmra.mxu1 %vm2231_vm3, %v4075_v20  ;;  %v4263_v11 = vadd.f32 %v6620_v60, %v4227_v56  ;;  %v4057_v20 = vld [vmem:[#allocation2 + $0x152] sm:$0xff] }
 0x4c7   : > { %v4295_v26 = vmax.f32 %v4263_v11, 0.0  ;;  %v4058_v11 = vld [vmem:[#allocation2 + $0x15a] sm:$0xff] }
 0x4c8   : > { %v4077_v48 = vpack.c.bf16 %v4058_v11, %v4057_v20 }
 0x4c9   : > { %4327 = vxpose.xlu0.b32.cont [5/16] (narrow) %v4295_v26, 8  ;;  %v3565_v26 = vadd.f32 %v3498_v2, %v6440_v19  ;;  %v3789_v2 = vadd.f32 %v3724_v6, %v3566_v32 }
 0x4ca   : > { %v4155_v54 = vpop.f32.mrf.mxu1 }
 0x4cb   : > { %v4228_v50 = vadd.f32 %v4155_v54, %v6548_v21  ;;  %v4009_v54 = vadd.f32 %v3941_v5, %v3787_v61  ;;  %v3788_v38 = vadd.f32 %v3721_v15, %v3565_v26  ;;  %v4060_v15 = vld [vmem:[#allocation2 + $0x172] sm:$0xff]  ;;  %v4011_v61 = vadd.f32 %v3946_v44, %v3789_v2 }
 0x4cd   : > { %v4264_v39 = vadd.f32 %v6620_v60, %v4228_v50 }
 0x4cf   : > { %v4296_v27 = vmax.f32 %v4264_v39, 0.0  ;;  %v3953_v39 = vpop.f32.mrf.mxu0 }
 0x4d1   : > { %4328 = vxpose.xlu0.b32.cont [6/16] (narrow) %v4296_v27, 8  ;;  %v3511_v27 = vpop.f32.mrf.mxu2 }
 0x4d2   : > { %v4158_v24 = vpop.f32.mrf.mxu1 }
 0x4d3   : > { %v4229_v3 = vadd.f32 %v4158_v24, %v6555_v31  ;;  %v3731_v31 = vpop.f32.mrf.mxu3  ;;  %v4010_v24 = vadd.f32 %v3943_v36, %v3788_v38 }
 0x4d5   : > { %4943 = vmatmul.msk.bf16.gmra.mxu1 %vm2231_vm3, %v4076_v10  ;;  %v4265_v23 = vadd.f32 %v6620_v60, %v4229_v3 }
 0x4d7   : > { %v4297_v21 = vmax.f32 %v4265_v23, 0.0  ;;  %v3956_v5 = vpop.f32.mrf.mxu0 }
 0x4d9   : > { %4329 = vxpose.xlu0.b32.cont [7/16] (narrow) %v4297_v21, 8  ;;  %v3513_v21 = vpop.f32.mrf.mxu2 }
 0x4da   : > { %v4160_v9 = vpop.f32.mrf.mxu1 }
 0x4db   : > { %v4230_v34 = vadd.f32 %v4160_v9, %v6566_v43  ;;  %v3734_v3 = vpop.f32.mrf.mxu3  ;;  %v4059_v9 = vld [vmem:[#allocation2 + $0x16a] sm:$0xff] }
 0x4dc   : > { %v4078_v46 = vpack.c.bf16 %v4060_v15, %v4059_v9  ;;  %v4063_v15 = vld [vmem:[#allocation2 + $0x19a] sm:$0xff] }
 0x4dd   : > { %v4266_v0 = vadd.f32 %v6620_v60, %v4230_v34  ;;  %v3567_v34 = vadd.f32 %v3503_v49, %v6459_v51 }
 0x4df   : > { %v4298_v56 = vmax.f32 %v4266_v0, 0.0  ;;  %v3790_v36 = vadd.f32 %v3726_v25, %v3567_v34  ;;  %v3958_v20 = vpop.f32.mrf.mxu0  ;;  %v3569_v25 = vadd.f32 %v3508_v59, %v6478_v62 }
 0x4e1   : > { %4330 = vxpose.xlu0.b32.cont [8/16] (narrow) %v4298_v56, 8  ;;  %v3516_v26 = vpop.f32.mrf.mxu2 }
 0x4e2   : > { %v4163_v50 = vpop.f32.mrf.mxu1 }
 0x4e3   : > { %v4231_v7 = vadd.f32 %v4163_v50, %v4009_v54  ;;  %v3736_v58 = vpop.f32.mrf.mxu3  ;;  %v3568_v54 = vadd.f32 %v3506_v42, %v6465_v8  ;;  %v4012_v50 = vadd.f32 %v6637_v45, %v3790_v36 }
 0x4e5   : > { %4944 = vmatmul.msk.bf16.gmra.mxu1 %vm2231_vm3, %v4077_v48  ;;  %v4267_v43 = vadd.f32 %v6620_v60, %v4231_v7  ;;  %v3791_v44 = vadd.f32 %v3729_v40, %v3568_v54  ;;  %v3570_v40 = vadd.f32 %v3511_v27, %v6484_v63 }
 0x4e7   : > { %v4299_v22 = vmax.f32 %v4267_v43, 0.0  ;;  %v3961_v43 = vpop.f32.mrf.mxu0 }
 0x4e9   : > { %4331 = vxpose.xlu0.b32.cont [9/16] (narrow) %v4299_v22, 8  ;;  %v4013_v22 = vadd.f32 %v3951_v33, %v3791_v44  ;;  %v3518_v32 = vpop.f32.mrf.mxu2  ;;  %v3793_v33 = vadd.f32 %v3734_v3, %v3570_v40 }
 0x4ea   : > { %v4165_v10 = vpop.f32.mrf.mxu1 }
 0x4eb   : > { %v4232_v19 = vadd.f32 %v4165_v10, %v4010_v24  ;;  %v3739_v48 = vpop.f32.mrf.mxu3 }
 0x4ed   : > { %v4268_v23 = vadd.f32 %v6620_v60, %v4232_v19  ;;  %v3792_v19 = vadd.f32 %v3731_v31, %v3569_v25  ;;  %v4064_v31 = vld [vmem:[#allocation2 + $0x1a2] sm:$0xff] }
 0x4ef   : > { %v4300_v52 = vmax.f32 %v4268_v23, 0.0  ;;  %v4014_v2 = vadd.f32 %v3953_v39, %v3792_v19  ;;  %v3963_v62 = vpop.f32.mrf.mxu0 }
 0x4f1   : > { %4332 = vxpose.xlu0.b32.cont [10/16] (narrow) %v4300_v52, 8  ;;  %v3521_v52 = vpop.f32.mrf.mxu2 }
 0x4f2   : > { %v4168_v0 = vpop.f32.mrf.mxu1 }
 0x4f3   : > { %v4233_v56 = vadd.f32 %v4168_v0, %v4011_v61  ;;  %v3741_v42 = vpop.f32.mrf.mxu3  ;;  %v4015_v61 = vadd.f32 %v3956_v5, %v3793_v33  ;;  %v4080_v0 = vpack.c.bf16 %v4064_v31, %v4063_v15 }
 0x4f5   : > { %4945 = vmatmul.msk.bf16.gmra.mxu1 %vm2231_vm3, %v4078_v46  ;;  %v4269_v6 = vadd.f32 %v6620_v60, %v4233_v56 }
 0x4f7   : > { %v4301_v11 = vmax.f32 %v4269_v6, 0.0  ;;  %v3966_v39 = vpop.f32.mrf.mxu0 }
 0x4f9   : > { %4333 = vxpose.xlu0.b32.cont [11/16] (narrow) %v4301_v11, 8  ;;  %v3523_v3 = vpop.f32.mrf.mxu2  ;;  %v3572_v11 = vadd.f32 %v3516_v26, %v6505_v41 }
 0x4fa   : > { %v4170_v51 = vpop.f32.mrf.mxu1 }
 0x4fb   : > { %v4234_v49 = vadd.f32 %v4170_v51, %v4012_v50  ;;  %v3744_v56 = vpop.f32.mrf.mxu3  ;;  %v3795_v5 = vadd.f32 %v3739_v48, %v3572_v11 }
 0x4fd   : > { %v4270_v7 = vadd.f32 %v6620_v60, %v4234_v49 }
 0x4ff   : > { %v4302_v38 = vmax.f32 %v4270_v7, 0.0  ;;  %v3968_v49 = vpop.f32.mrf.mxu0  ;;  %v3573_v7 = vadd.f32 %v3518_v32, %v6517_v55 }
 0x501   : > { %4334 = vxpose.xlu0.b32.cont [12/16] (narrow) %v4302_v38, 8  ;;  %v4017_v38 = vadd.f32 %v3961_v43, %v3795_v5 }
 0x502   : > { %v4173_v24 = vpop.f32.mrf.mxu1 }
 0x503   : > { %v4235_v10 = vadd.f32 %v4173_v24, %v4013_v22  ;;  %v3796_v24 = vadd.f32 %v3741_v42, %v3573_v7 }
 0x505   : > { %4946 = vmatmul.msk.bf16.gmra.mxu1 %vm2231_vm3, %v6597_v18  ;;  %v4271_v8 = vadd.f32 %v6620_v60, %v4235_v10  ;;  %v3571_v18 = vadd.f32 %v3513_v21, %v6499_v28  ;;  %v3746_v21 = vpop.f32.mrf.mxu3  ;;  %v3574_v10 = vadd.f32 %v3521_v52, %v6523_v16  ;;  %v4018_v48 = vadd.f32 %v3963_v62, %v3796_v24 }
 0x507   : > { %v4303_v45 = vmax.f32 %v4271_v8, 0.0  ;;  %v3794_v27 = vadd.f32 %v3736_v58, %v3571_v18  ;;  %v3526_v58 = vpop.f32.mrf.mxu2  ;;  %v3971_v19 = vpop.f32.mrf.mxu0 }
 0x508   : > { %v3576_v31 = vadd.f32 %v3526_v58, %v6541_v35 }
 0x509   : > { %4335 = vxpose.xlu0.b32.cont [13/16] (narrow) %v4303_v45, 8  ;;  %v4016_v54 = vadd.f32 %v3958_v20, %v3794_v27 }
 0x50a   : > { %v4175_v23 = vpop.f32.mrf.mxu1 }
 0x50b   : > { %v4236_v59 = vadd.f32 %v4175_v23, %v4014_v2  ;;  %v3797_v2 = vadd.f32 %v3744_v56, %v3574_v10  ;;  %v3575_v23 = vadd.f32 %v3523_v3, %v6535_v57 }
 0x50d   : > { %v4272_v9 = vadd.f32 %v6620_v60, %v4236_v59  ;;  %v3749_v26 = vpop.f32.mrf.mxu3  ;;  %v4019_v42 = vadd.f32 %v3966_v39, %v3797_v2  ;;  %v3798_v16 = vadd.f32 %v3746_v21, %v3575_v23 }
 0x50e   : > { %v3799_v56 = vadd.f32 %v3749_v26, %v3576_v31 }
 0x50f   : > { %v4304_v34 = vmax.f32 %v4272_v9, 0.0  ;;  %v3528_v8 = vpop.f32.mrf.mxu2  ;;  %v3973_v33 = vpop.f32.mrf.mxu0 }
 0x510   : > { %v3577_v39 = vadd.f32 %v3528_v8, %v6553_v30 }
 0x511   : > { %4336 = vxpose.xlu0.b32.cont [14/16] (narrow) %v4304_v34, 8  ;;  %v4020_v34 = vadd.f32 %v3968_v49, %v3798_v16 }
 0x512   : > { %v4178_v46 = vpop.f32.mrf.mxu1 }
 0x513   : > { %v4237_v63 = vadd.f32 %v4178_v46, %v4015_v61 }
 0x515   : > { %4947 = vmatmul.msk.bf16.gmra.mxu1 %vm2231_vm3, %v4080_v0  ;;  %v4273_v36 = vadd.f32 %v6620_v60, %v4237_v63  ;;  %v3751_v43 = vpop.f32.mrf.mxu3 }
 0x517   : > { %v4305_v6 = vmax.f32 %v4273_v36, 0.0  ;;  %v3531_v15 = vpop.f32.mrf.mxu2  ;;  %v3976_v46 = vpop.f32.mrf.mxu0  ;;  %v4021_v36 = vadd.f32 %v3971_v19, %v3799_v56 }
 0x518   : > { %v3578_v5 = vadd.f32 %v3531_v15, %v6559_v12 }
 0x519   : > { %4337 = vxpose.xlu0.b32.cont [15/16] (narrow) %v4305_v6, 8 }
 0x51a   : > { %v4180_v50 = vpop.f32.mrf.mxu1 }
 0x51b   : > { %v4238_v28 = vadd.f32 %v4180_v50, %v4016_v54  ;;  %v3800_v54 = vadd.f32 %v3751_v43, %v3577_v39 }
 0x51d   : > { %v4274_v51 = vadd.f32 %v6620_v60, %v4238_v28  ;;  %v3754_v18 = vpop.f32.mrf.mxu3 }
 0x51e   : > { %v3801_v58 = vadd.f32 %v3754_v18, %v3578_v5 }
 0x51f   : > { %v4306_v44 = vmax.f32 %v4274_v51, 0.0  ;;  %v3533_v63 = vpop.f32.mrf.mxu2  ;;  %v3978_v50 = vpop.f32.mrf.mxu0  ;;  %v4022_v51 = vadd.f32 %v3973_v33, %v3800_v54 }
 0x520   : > { %v4023_v24 = vadd.f32 %v3976_v46, %v3801_v58 }
 0x521   : > { %4338 = vxpose.xlu0.b32.end [16/16] (narrow) %v4306_v44, 8 }
 0x522   : > { %v4183_v25 = vpop.f32.mrf.mxu1 }
 0x523   : > { %v4239_v22 = vadd.f32 %v4183_v25, %v4017_v38  ;;  %v3579_v25 = vadd.f32 %v3533_v63, %v6570_v47 }
 0x525   : > { %v4275_v41 = vadd.f32 %v6620_v60, %v4239_v22  ;;  %v3756_v11 = vpop.f32.mrf.mxu3 }
 0x526   : > { %v3802_v10 = vadd.f32 %v3756_v11, %v3579_v25 }
 0x527   : > { %v4307_v20 = vmax.f32 %v4275_v41, 0.0  ;;  %v3536_v21 = vpop.f32.mrf.mxu2  ;;  %v3981_v22 = vpop.f32.mrf.mxu0 }
 0x528   : > { %v3580_v8 = vadd.f32 %v3536_v21, %v6573_v53 }
 0x529   : > { %4355 = vxpose.xlu1.b32.start [1/16] (narrow) %v4307_v20, 8 }
 0x52a   : > { %v4185_v45 = vpop.f32.mrf.mxu1 }
 0x52b   : > { %v4240_v40 = vadd.f32 %v4185_v45, %v4018_v48  ;;  %v4024_v45 = vadd.f32 %v3978_v50, %v3802_v10 }
 0x52d   : > { %v4276_v55 = vadd.f32 %v6620_v60, %v4240_v40  ;;  %v3759_v7 = vpop.f32.mrf.mxu3 }
 0x52e   : > { %v3803_v47 = vadd.f32 %v3759_v7, %v3580_v8 }
 0x52f   : > { %v4308_v32 = vmax.f32 %v4276_v55, 0.0  ;;  %v3538_v41 = vpop.f32.mrf.mxu2  ;;  %v3983_v2 = vpop.f32.mrf.mxu0 }
 0x531   : > { %4356 = vxpose.xlu1.b32.cont [2/16] (narrow) %v4308_v32, 8 }
 0x532   : > { %v4188_v59 = vpop.f32.mrf.mxu1 }
 0x533   : > { %v4241_v9 = vadd.f32 %v4188_v59, %v4019_v42  ;;  %v3581_v42 = vadd.f32 %v3538_v41, %v6582_v29  ;;  %v4025_v59 = vadd.f32 %v3981_v22, %v3803_v47 }
 0x535   : > { %v4277_v52 = vadd.f32 %v6620_v60, %v4241_v9  ;;  %v3761_v48 = vpop.f32.mrf.mxu3 }
 0x536   : > { %v3804_v16 = vadd.f32 %v3761_v48, %v3581_v42 }
 0x537   : > { %v4309_v62 = vmax.f32 %v4277_v52, 0.0  ;;  %v3541_v32 = vpop.f32.mrf.mxu2  ;;  %v3986_v52 = vpop.f32.mrf.mxu0 }
 0x538   : > { %v4026_v18 = vadd.f32 %v3983_v2, %v3804_v16 }
 0x539   : > { %4357 = vxpose.xlu1.b32.cont [3/16] (narrow) %v4309_v62, 8 }
 0x53a   : > { %v4190_v61 = vpop.f32.mrf.mxu1 }
 0x53b   : > { %v4242_v0 = vadd.f32 %v4190_v61, %v4020_v34  ;;  %v3582_v34 = vadd.f32 %v3541_v32, %v6585_v1 }
 0x53d   : > { %v4278_v57 = vadd.f32 %v6620_v60, %v4242_v0  ;;  %v3764_v33 = vpop.f32.mrf.mxu3 }
 0x53e   : > { %v3805_v46 = vadd.f32 %v3764_v33, %v3582_v34 }
 0x53f   : > { %v4310_v27 = vmax.f32 %v4278_v57, 0.0  ;;  %v3543_v62 = vpop.f32.mrf.mxu2  ;;  %v3988_v57 = vpop.f32.mrf.mxu0 }
 0x540   : > { %v3583_v39 = vadd.f32 %v3543_v62, %v6595_v4 }
 0x541   : > { %4358 = vxpose.xlu1.b32.cont [4/16] (narrow) %v4310_v27, 8 }
 0x542   : > { %v4193_v3 = vpop.f32.mrf.mxu1 }
 0x543   : > { %v4243_v6 = vadd.f32 %v4193_v3, %v4021_v36  ;;  %v4027_v36 = vadd.f32 %v3986_v52, %v3805_v46 }
 0x545   : > { %v4279_v35 = vadd.f32 %v6620_v60, %v4243_v6  ;;  %v3766_v56 = vpop.f32.mrf.mxu3 }
 0x546   : > { %v3806_v11 = vadd.f32 %v3766_v56, %v3583_v39 }
 0x547   : > { %v4311_v28 = vmax.f32 %v4279_v35, 0.0  ;;  %v3546_v27 = vpop.f32.mrf.mxu2  ;;  %v3991_v50 = vpop.f32.mrf.mxu0 }
 0x548   : > { %v4028_v21 = vadd.f32 %v3988_v57, %v3806_v11 }
 0x549   : > { %4359 = vxpose.xlu1.b32.cont [5/16] (narrow) %v4311_v28, 8  ;;  %v3584_v28 = vadd.f32 %v3546_v27, %v6600_v13 }
 0x54a   : > { %v4195_v49 = vpop.f32.mrf.mxu1 }
 0x54b   : > { %v4244_v44 = vadd.f32 %v4195_v49, %v4022_v51 }
 0x54d   : > { %v4280_v30 = vadd.f32 %v6620_v60, %v4244_v44  ;;  %v3769_v54 = vpop.f32.mrf.mxu3 }
 0x54e   : > { %v3807_v44 = vadd.f32 %v3769_v54, %v3584_v28 }
 0x54f   : > { %v4312_v38 = vmax.f32 %v4280_v30, 0.0  ;;  %v3548_v5 = vpop.f32.mrf.mxu2 }
 0x550   : > { %v3585_v7 = vadd.f32 %v3548_v5, %v6608_v14 }
 0x551   : > { %4360 = vxpose.xlu1.b32.cont [6/16] (narrow) %v4312_v38, 8  ;;  %v4029_v38 = vadd.f32 %v3991_v50, %v3807_v44 }
 0x552   : > { %v4198_v26 = vpop.f32.mrf.mxu1 }
 0x553   : > { %v4245_v20 = vadd.f32 %v4198_v26, %v4023_v24  ;;  %v3993_v24 = vpop.f32.mrf.mxu0 }
 0x555   : > { %v4281_v12 = vadd.f32 %v6620_v60, %v4245_v20  ;;  %v3771_v30 = vpop.f32.mrf.mxu3 }
 0x556   : > { %v3808_v26 = vadd.f32 %v3771_v30, %v3585_v7 }
 0x557   : > { %v4313_v19 = vmax.f32 %v4281_v12, 0.0  ;;  %v3551_v41 = vpop.f32.mrf.mxu2 }
 0x558   : > { %v3586_v12 = vadd.f32 %v3551_v41, %v6611_v37 }
 0x559   : > { %4361 = vxpose.xlu1.b32.cont [7/16] (narrow) %v4313_v19, 8  ;;  %v4030_v19 = vadd.f32 %v3993_v24, %v3808_v26 }
 0x55a   : > { %v4200_v40 = vpop.f32.mrf.mxu1 }
 0x55b   : > { %v4246_v55 = vadd.f32 %v4200_v40, %v4024_v45  ;;  %v3996_v45 = vpop.f32.mrf.mxu0 }
 0x55d   : > { %v4282_v43 = vadd.f32 %v6620_v60, %v4246_v55  ;;  %v3774_v10 = vpop.f32.mrf.mxu3 }
 0x55e   : > { %v3809_v40 = vadd.f32 %v3774_v10, %v3586_v12 }
 0x55f   : > { %v4314_v23 = vmax.f32 %v4282_v43, 0.0  ;;  %v3553_v2 = vpop.f32.mrf.mxu2 }
 0x560   : > { %v4031_v32 = vadd.f32 %v3996_v45, %v3809_v40  ;;  %v3587_v47 = vadd.f32 %v3553_v2, %v6615_v17  ;;  %v4339_v17 = vpop.trf.xlu0 }
 0x561   : > { %4362 = vxpose.xlu1.b32.cont [8/16] (narrow) %v4314_v23, 8  ;;  %4387 = vst [vmem:[%s224_s23] sm:$0xff] %v4339_v17 }
 0x562   : > { %v4203_v9 = vpop.f32.mrf.mxu1 }
 0x563   : > { %v4247_v15 = vadd.f32 %v4203_v9, %v4025_v59  ;;  %v3998_v33 = vpop.f32.mrf.mxu0 }
 0x565   : > { %v4283_v53 = vadd.f32 %v6620_v60, %v4247_v15  ;;  %v3776_v43 = vpop.f32.mrf.mxu3 }
 0x566   : > { %v3810_v59 = vadd.f32 %v3776_v43, %v3587_v47 }
 0x567   : > { %v4315_v31 = vmax.f32 %v4283_v53, 0.0 }
 0x568   : > { %v4032_v15 = vadd.f32 %v3998_v33, %v3810_v59 }
 0x569   : > { %4363 = vxpose.xlu1.b32.cont [9/16] (narrow) %v4315_v31, 8 }
 0x56a   : > { %v4205_v61 = vpop.f32.mrf.mxu1 }
 0x56b   : > { %v4248_v0 = vadd.f32 %v4205_v61, %v4026_v18 }
 0x56d   : > { %v4284_v29 = vadd.f32 %v6620_v60, %v4248_v0 }
 0x56f   : > { %v4316_v63 = vmax.f32 %v4284_v29, 0.0 }
 0x571   : > { %4364 = vxpose.xlu1.b32.cont [10/16] (narrow) %v4316_v63, 8 }
 0x572   : > { %v4208_v3 = vpop.f32.mrf.mxu1 }
 0x573   : > { %v4249_v6 = vadd.f32 %v4208_v3, %v4027_v36 }
 0x575   : > { %v4285_v1 = vadd.f32 %v6620_v60, %v4249_v6 }
 0x577   : > { %v4317_v35 = vmax.f32 %v4285_v1, 0.0 }
 0x579   : > { %4365 = vxpose.xlu1.b32.cont [11/16] (narrow) %v4317_v35, 8 }
 0x57a   : > { %v4210_v51 = vpop.f32.mrf.mxu1 }
 0x57b   : > { %v4250_v49 = vadd.f32 %v4210_v51, %v4028_v21 }
 0x57d   : > { %v4286_v4 = vadd.f32 %v6620_v60, %v4250_v49 }
 0x57f   : > { %v4318_v58 = vmax.f32 %v4286_v4, 0.0 }
 0x581   : > { %4366 = vxpose.xlu1.b32.cont [12/16] (narrow) %v4318_v58, 8 }
 0x582   : > { %v4213_v25 = vpop.f32.mrf.mxu1 }
 0x583   : > { %v4251_v22 = vadd.f32 %v4213_v25, %v4029_v38 }
 0x585   : > { %v4287_v13 = vadd.f32 %v6620_v60, %v4251_v22 }
 0x587   : > { %v4319_v20 = vmax.f32 %v4287_v13, 0.0 }
 0x589   : > { %4367 = vxpose.xlu1.b32.cont [13/16] (narrow) %v4319_v20, 8 }
 0x58a   : > { %v4215_v48 = vpop.f32.mrf.mxu1 }
 0x58b   : > { %v4252_v8 = vadd.f32 %v4215_v48, %v4030_v19 }
 0x58d   : > { %v4288_v14 = vadd.f32 %v6620_v60, %v4252_v8 }
 0x58f   : > { %v4320_v55 = vmax.f32 %v4288_v14, 0.0 }
 0x591   : > { %4368 = vxpose.xlu1.b32.cont [14/16] (narrow) %v4320_v55, 8 }
 0x592   : > { %v4218_v23 = vpop.f32.mrf.mxu1 }
 0x593   : > { %v4253_v42 = vadd.f32 %v4218_v23, %v4031_v32 }
 0x595   : > { %v4289_v37 = vadd.f32 %v6620_v60, %v4253_v42 }
 0x597   : > { %v4321_v9 = vmax.f32 %v4289_v37, 0.0 }
 0x599   : > { %4369 = vxpose.xlu1.b32.cont [15/16] (narrow) %v4321_v9, 8 }
 0x59a   : > { %v4220_v16 = vpop.f32.mrf.mxu1 }
 0x59b   : > { %v4254_v52 = vadd.f32 %v4220_v16, %v4032_v15 }
 0x59d   : > { %v4290_v53 = vadd.f32 %v6620_v60, %v4254_v52 }
 0x59f   : > { %v4322_v62 = vmax.f32 %v4290_v53, 0.0 }
 0x5a1   : > { %4370 = vxpose.xlu1.b32.end [16/16] (narrow) %v4322_v62, 8 }
 0x5cd   : > { %v4371_v31 = vpop.trf.xlu1 }
 0x5ce   : > { %4388 = vst [vmem:[%s224_s23 + $0x8] sm:$0xff] %v4371_v31 }
 0x5cf PF: > { %s15_s18 = sadd.s32 1, %s4972_s18  }
 0x5d0   : > { %p12_p4 = scmp.ge.s32.totalorder %s15_s18, 4  }
 0x5d2   :  { %14 = sbr.rel (!%p12_p4) target bundleno = 1 (0x1), region = 90 }

</bundles_post_ra>
